<compile_context>
chip_gen: v7x
topology: tpu7x:2x2x1
jax: 0.10.0
libtpu: 0.0.40
codegen_flags: <defaults>
</compile_context>

<pallas_src>
import functools

import jax
import jax.numpy as jnp
from jax import lax
from jax.experimental import pallas as pl
from jax.experimental.pallas import tpu as pltpu

BIG = 1e30        # plain Python floats (jnp scalars would be captured as
HALF_BIG = 5e29   # kernel constants and break the trace).


# ----------------------------------------------------------------------------
# One synchronous-auction price update for one stream.
#   value: (N, N) current cost+price (WITHOUT the row-constant ||x_i||^2 term)
#   returns delta: (1, N) non-negative column price increment.
# TODO(synk): if the bundle shows the XLU slot saturating, fuse best/second
# into a single-pass pltpu.roll reduction tree (measure first).
# ----------------------------------------------------------------------------
def _auction_delta(value, *, eps):
    best = jnp.min(value, axis=1, keepdims=True)                  # (N, 1)
    is_best = value <= best
    second = jnp.min(jnp.where(is_best, BIG, value), axis=1, keepdims=True)
    second = jnp.where(second >= HALF_BIG, best, second)
    bid_inc = second - best + eps                                  # (N, 1)
    col_inc = jnp.max(jnp.where(is_best, bid_inc, -BIG),
                      axis=0, keepdims=True)                       # (1, N)
    return jnp.maximum(col_inc, 0.0)


# ----------------------------------------------------------------------------
# Final assignment + mean sqrt distance.  xx is the (N, 1) row-constant
# ||x_i||^2 that was kept out of the loop; it is re-added before the sqrt.
# Returns (1, 1).
# ----------------------------------------------------------------------------
def _auction_finish(value, price, xx, *, n):
    best = jnp.min(value, axis=1, keepdims=True)                   # (N, 1)
    col = lax.broadcasted_iota(jnp.int32, (n, n), 1)
    jmin = jnp.min(jnp.where(value <= best, col, n), axis=1, keepdims=True)
    sel = col == jmin                                              # one per row
    # value - price == ||y_j||^2 - 2<x_i, y_j>; add xx_i back, clamp, sqrt on
    # the lane-dense matrix (only selected entries contribute to the sum).
    d = jnp.maximum(value - price + xx, 0.0)                       # (N, N)
    contrib = jnp.where(sel, jnp.sqrt(d), 0.0)                     # (N, N)
    row = jnp.sum(contrib, axis=1, keepdims=True)                  # (N, 1)
    return jnp.sum(row, axis=0, keepdims=True) * (1.0 / n)         # (1, 1)


# ----------------------------------------------------------------------------
# Fused kernel: stand-in model + both EMDs, one grid step per batch element.
# ----------------------------------------------------------------------------
def _fused_kernel(x_ref, m_ref, gt_ref, w1_ref, b1_ref, w2_ref, b2_ref,
                  w3_ref, b3_ref, out1_ref, out2_ref, emd1_ref, emd2_ref,
                  *, eps, iters, n):
    x = x_ref[0]                                                   # (CP, N)
    m = m_ref[0]                                                   # (CP, CP)
    g = gt_ref[0]                                                  # (CP, N)

    # Stand-in model in channel-first orientation (lane-dense outputs):
    #   xt = m^T @ x  (== (x_row @ m)^T of the row-major layout)
    xt = lax.dot_general(m, x, (((0,), (0,)), ((), ())),
                         preferred_element_type=jnp.float32)       # (CP, N)
    h = jnp.maximum(
        jnp.dot(w1_ref[...], xt, preferred_element_type=jnp.float32)
        + b1_ref[...], 0.0)                                        # (H, N)
    o1 = (jnp.dot(w2_ref[...], h, preferred_element_type=jnp.float32)
          + b2_ref[...])                                           # (CP, N)
    o2 = o1 + jnp.tanh(
        jnp.dot(w3_ref[...], h, preferred_element_type=jnp.float32)
        + b3_ref[...])                                             # (CP, N)
    out1_ref[0] = o1
    out2_ref[0] = o2

    # Shared target-side squared norms.
    yy = jnp.sum(g * g, axis=0, keepdims=True)                     # (1, N)

    # Batch both cost cross products into one MXU call.
    xcat = jnp.concatenate([o1, o2], axis=1)                       # (CP, 2N)
    cross = lax.dot_general(xcat, g, (((0,), (0,)), ((), ())),
                            preferred_element_type=jnp.float32)    # (2N, N)
    # Row-constant ||x_i||^2 terms, used ONLY in the epilogue (one tiny MXU
    # call for both streams, outside the loop).
    ones_c = jnp.ones((xcat.shape[0], 1), jnp.float32)
    xxcat = lax.dot_general(xcat * xcat, ones_c, (((0,), (0,)), ((), ())),
                            preferred_element_type=jnp.float32)    # (2N, 1)

    # Initial "value" (cost without the row-constant xx) and zero prices.
    v1 = yy - 2.0 * cross[:n, :]                                   # (N, N)
    v2 = yy - 2.0 * cross[n:, :]                                   # (N, N)
    p0 = jnp.zeros((1, n), jnp.float32)

    # Both independent auctions interleaved in a single loop body so their
    # serial XLU reduction chains overlap.
    def body(_, carry):
        va, pa, vb, pb = carry
        da = _auction_delta(va, eps=eps)
        db = _auction_delta(vb, eps=eps)
        return va + da, pa + da, vb + db, pb + db

    v1, p1, v2, p2 = lax.fori_loop(0, iters, body, (v1, p0, v2, p0))

    emd1_ref[0] = _auction_finish(v1, p1, xxcat[:n, :], n=n)
    emd2_ref[0] = _auction_finish(v2, p2, xxcat[n:, :], n=n)


# ----------------------------------------------------------------------------
# Wrapper (FullModel.forward)
# ----------------------------------------------------------------------------
def _to_channel_first_padded(x, c_pad):
    """(B, N, C) -> (B, c_pad, N) with zero-padded channels."""
    b, n, c = x.shape
    x_cn = jnp.transpose(x.astype(jnp.float32), (0, 2, 1))
    return jnp.pad(x_cn, ((0, 0), (0, c_pad - c), (0, 0)))


@functools.partial(jax.jit, static_argnames=("eps", "iters"))
def full_model_forward(params, inputs, pc_end, ray_start, ray_end, m_trans,
                       gt, eps, iters):
    del pc_end, ray_start, ray_end  # TODO(synk): unused by the stand-in model.
    B, N, C = inputs.shape
    H, CP = params["w1t"].shape

    x_cn = _to_channel_first_padded(inputs, CP)
    g_cn = _to_channel_first_padded(gt, CP)
    m_p = jnp.pad(m_trans.astype(jnp.float32),
                  ((0, 0), (0, CP - C), (0, CP - C)))

    per_b3 = lambda b: (b, 0, 0)
    full2 = lambda b: (0, 0)

    kernel = functools.partial(_fused_kernel, eps=float(eps),
                               iters=int(iters), n=N)
    out1_cn, out2_cn, emd1, emd2 = pl.pallas_call(
        kernel,
        out_shape=(jax.ShapeDtypeStruct((B, CP, N), jnp.float32),
                   jax.ShapeDtypeStruct((B, CP, N), jnp.float32),
                   jax.ShapeDtypeStruct((B, 1, 1), jnp.float32),
                   jax.ShapeDtypeStruct((B, 1, 1), jnp.float32)),
        grid=(B,),
        in_specs=[
            pl.BlockSpec((1, CP, N), per_b3),    # inputs  (channel-first)
            pl.BlockSpec((1, CP, CP), per_b3),   # m_trans (padded)
            pl.BlockSpec((1, CP, N), per_b3),    # gt      (channel-first)
            pl.BlockSpec((H, CP), full2),        # w1t
            pl.BlockSpec((H, 1), full2),         # b1
            pl.BlockSpec((CP, H), full2),        # w2t
            pl.BlockSpec((CP, 1), full2),        # b2
            pl.BlockSpec((CP, H), full2),        # w3t
            pl.BlockSpec((CP, 1), full2),        # b3
        ],
        out_specs=(pl.BlockSpec((1, CP, N), per_b3),
                   pl.BlockSpec((1, CP, N), per_b3),
                   pl.BlockSpec((1, 1, 1), per_b3),
                   pl.BlockSpec((1, 1, 1), per_b3)),
        compiler_params=pltpu.CompilerParams(
            dimension_semantics=("parallel",),   # shards batch over TCs on v7x
            vmem_limit_bytes=32 * 1024 * 1024),
    )(x_cn, m_p, g_cn, params["w1t"], params["b1"], params["w2t"],
      params["b2"], params["w3t"], params["b3"])

    out1 = jnp.transpose(out1_cn[:, :C, :], (0, 2, 1))
    out2 = jnp.transpose(out2_cn[:, :C, :], (0, 2, 1))
    return {"output1": out1, "output2": out2,
            "emd1": emd1.reshape(B), "emd2": emd2.reshape(B)}


def init_params(key, c_in=3, c_pad=8, hidden=64):
    """Stand-in model weights, stored transposed + channel-padded."""
    ks = jax.random.split(key, 3)
    w1 = 0.1 * jax.random.normal(ks[0], (hidden, c_in), jnp.float32)
    w2 = 0.1 * jax.random.normal(ks[1], (c_in, hidden), jnp.float32)
    w3 = 0.1 * jax.random.normal(ks[2], (c_in, hidden), jnp.float32)
    return {
        "w1t": jnp.zeros((hidden, c_pad), jnp.float32).at[:, :c_in].set(w1),
        "b1": jnp.zeros((hidden, 1), jnp.float32),
        "w2t": jnp.zeros((c_pad, hidden), jnp.float32).at[:c_in, :].set(w2),
        "b2": jnp.zeros((c_pad, 1), jnp.float32),
        "w3t": jnp.zeros((c_pad, hidden), jnp.float32).at[:c_in, :].set(w3),
        "b3": jnp.zeros((c_pad, 1), jnp.float32),
    }


if __name__ == "__main__":
    B, N, C, H, CP = 2, 128, 3, 64, 8
    key = jax.random.PRNGKey(0)
    ks = jax.random.split(key, 8)

    params = init_params(ks[0], c_in=C, c_pad=CP, hidden=H)
    inputs = jax.random.normal(ks[1], (B, N, C), jnp.float32)
    pc_end = jax.random.normal(ks[2], (B, N, C), jnp.float32)
    ray_start = jax.random.normal(ks[3], (B, N, C), jnp.float32)
    ray_end = jax.random.normal(ks[4], (B, N, C), jnp.float32)
    m_trans = (jnp.tile(jnp.eye(C, dtype=jnp.float32)[None], (B, 1, 1))
               + 0.01 * jax.random.normal(ks[5], (B, C, C), jnp.float32))
    gt = jax.random.normal(ks[6], (B, N, C), jnp.float32)

    ret = full_model_forward(params, inputs, pc_end, ray_start, ray_end,
                             m_trans, gt, eps=0.005, iters=16)
    jax.block_until_ready(ret)

    assert ret["output1"].shape == (B, N, C)
    assert ret["output2"].shape == (B, N, C)
    assert ret["emd1"].shape == (B,)
    assert ret["emd2"].shape == (B,)
    assert bool(jnp.all(jnp.isfinite(ret["emd1"])))
    assert bool(jnp.all(jnp.isfinite(ret["emd2"])))
    print("KERNEL_OK")
</pallas_src>

<mosaic_0001>
module attributes {stable_mosaic.version = 11 : i64} {
  func.func @_fused_kernel(%arg0: i32, %arg1: memref<1x8x128xf32, #tpu.memory_space<vmem>>, %arg2: memref<1x8x8xf32, #tpu.memory_space<vmem>>, %arg3: memref<1x8x128xf32, #tpu.memory_space<vmem>>, %arg4: memref<64x8xf32, #tpu.memory_space<vmem>>, %arg5: memref<64x1xf32, #tpu.memory_space<vmem>>, %arg6: memref<8x64xf32, #tpu.memory_space<vmem>>, %arg7: memref<8x1xf32, #tpu.memory_space<vmem>>, %arg8: memref<8x64xf32, #tpu.memory_space<vmem>>, %arg9: memref<8x1xf32, #tpu.memory_space<vmem>>, %arg10: memref<1x8x128xf32, #tpu.memory_space<vmem>>, %arg11: memref<1x8x128xf32, #tpu.memory_space<vmem>>, %arg12: memref<1x1x1xf32, #tpu.memory_space<vmem>>, %arg13: memref<1x1x1xf32, #tpu.memory_space<vmem>>) attributes {dimension_semantics = [#tpu.dimension_semantics<parallel>], iteration_bounds = array<i64: 2>, scalar_prefetch = 0 : i64, scratch_operands = 0 : i64, tpu.core_type = #tpu.core_type<tc>, window_params = [{transform_indices = @transform_0, window_bounds = array<i64: 1, 8, 128>}, {transform_indices = @transform_1, window_bounds = array<i64: 1, 8, 8>}, {transform_indices = @transform_2, window_bounds = array<i64: 1, 8, 128>}, {pipeline_mode = #tpu.pipeline_mode<synchronous>, transform_indices = @transform_3, window_bounds = array<i64: 64, 8>}, {pipeline_mode = #tpu.pipeline_mode<synchronous>, transform_indices = @transform_4, window_bounds = array<i64: 64, 1>}, {pipeline_mode = #tpu.pipeline_mode<synchronous>, transform_indices = @transform_5, window_bounds = array<i64: 8, 64>}, {pipeline_mode = #tpu.pipeline_mode<synchronous>, transform_indices = @transform_6, window_bounds = array<i64: 8, 1>}, {pipeline_mode = #tpu.pipeline_mode<synchronous>, transform_indices = @transform_7, window_bounds = array<i64: 8, 64>}, {pipeline_mode = #tpu.pipeline_mode<synchronous>, transform_indices = @transform_8, window_bounds = array<i64: 8, 1>}, {transform_indices = @transform_9, window_bounds = array<i64: 1, 8, 128>}, {transform_indices = @transform_10, window_bounds = array<i64: 1, 8, 128>}, {transform_indices = @transform_11, window_bounds = array<i64: 1, 1, 1>}, {transform_indices = @transform_12, window_bounds = array<i64: 1, 1, 1>}]} {
    %c0 = arith.constant 0 : index
    %c0_0 = arith.constant 0 : index
    %c0_1 = arith.constant 0 : index
    %0 = vector.load %arg1[%c0, %c0_0, %c0_1] : memref<1x8x128xf32, #tpu.memory_space<vmem>>, vector<1x8x128xf32>
    %1 = vector.shape_cast %0 : vector<1x8x128xf32> to vector<8x128xf32>
    %c0_2 = arith.constant 0 : index
    %c0_3 = arith.constant 0 : index
    %c0_4 = arith.constant 0 : index
    %2 = vector.load %arg2[%c0_2, %c0_3, %c0_4] : memref<1x8x8xf32, #tpu.memory_space<vmem>>, vector<1x8x8xf32>
    %3 = vector.shape_cast %2 : vector<1x8x8xf32> to vector<8x8xf32>
    %c0_5 = arith.constant 0 : index
    %c0_6 = arith.constant 0 : index
    %c0_7 = arith.constant 0 : index
    %4 = vector.load %arg3[%c0_5, %c0_6, %c0_7] : memref<1x8x128xf32, #tpu.memory_space<vmem>>, vector<1x8x128xf32>
    %5 = vector.shape_cast %4 : vector<1x8x128xf32> to vector<8x128xf32>
    %cst = arith.constant dense<0.000000e+00> : vector<8x128xf32>
    %6 = tpu.matmul %3, %1, %cst {dimension_numbers = #tpu.dot_dimension_numbers<[0], [0], [1], [1], [0, 1, 1, 1], [], []>} : vector<8x8xf32>, vector<8x128xf32>, vector<8x128xf32> -> vector<8x128xf32>
    %c0_8 = arith.constant 0 : index
    %c0_9 = arith.constant 0 : index
    %7 = vector.load %arg4[%c0_8, %c0_9] : memref<64x8xf32, #tpu.memory_space<vmem>>, vector<64x8xf32>
    %cst_10 = arith.constant dense<0.000000e+00> : vector<64x128xf32>
    %8 = tpu.matmul %7, %6, %cst_10 {dimension_numbers = #tpu.dot_dimension_numbers<[1], [0], [0], [1], [0, 0, 1, 1], [], []>} : vector<64x8xf32>, vector<8x128xf32>, vector<64x128xf32> -> vector<64x128xf32>
    %c0_11 = arith.constant 0 : index
    %c0_12 = arith.constant 0 : index
    %9 = vector.load %arg5[%c0_11, %c0_12] : memref<64x1xf32, #tpu.memory_space<vmem>>, vector<64x1xf32>
    %10 = vector.broadcast %9 : vector<64x1xf32> to vector<64x128xf32>
    %11 = arith.addf %8, %10 : vector<64x128xf32>
    %cst_13 = arith.constant 0.000000e+00 : f32
    %12 = vector.broadcast %cst_13 : f32 to vector<64x128xf32>
    %13 = arith.maximumf %11, %12 : vector<64x128xf32>
    %c0_14 = arith.constant 0 : index
    %c0_15 = arith.constant 0 : index
    %14 = vector.load %arg6[%c0_14, %c0_15] : memref<8x64xf32, #tpu.memory_space<vmem>>, vector<8x64xf32>
    %cst_16 = arith.constant dense<0.000000e+00> : vector<8x128xf32>
    %15 = tpu.matmul %14, %13, %cst_16 {dimension_numbers = #tpu.dot_dimension_numbers<[1], [0], [0], [1], [0, 0, 1, 1], [], []>} : vector<8x64xf32>, vector<64x128xf32>, vector<8x128xf32> -> vector<8x128xf32>
    %c0_17 = arith.constant 0 : index
    %c0_18 = arith.constant 0 : index
    %16 = vector.load %arg7[%c0_17, %c0_18] : memref<8x1xf32, #tpu.memory_space<vmem>>, vector<8x1xf32>
    %17 = vector.broadcast %16 : vector<8x1xf32> to vector<8x128xf32>
    %18 = arith.addf %15, %17 : vector<8x128xf32>
    %c0_19 = arith.constant 0 : index
    %c0_20 = arith.constant 0 : index
    %19 = vector.load %arg8[%c0_19, %c0_20] : memref<8x64xf32, #tpu.memory_space<vmem>>, vector<8x64xf32>
    %cst_21 = arith.constant dense<0.000000e+00> : vector<8x128xf32>
    %20 = tpu.matmul %19, %13, %cst_21 {dimension_numbers = #tpu.dot_dimension_numbers<[1], [0], [0], [1], [0, 0, 1, 1], [], []>} : vector<8x64xf32>, vector<64x128xf32>, vector<8x128xf32> -> vector<8x128xf32>
    %c0_22 = arith.constant 0 : index
    %c0_23 = arith.constant 0 : index
    %21 = vector.load %arg9[%c0_22, %c0_23] : memref<8x1xf32, #tpu.memory_space<vmem>>, vector<8x1xf32>
    %22 = vector.broadcast %21 : vector<8x1xf32> to vector<8x128xf32>
    %23 = arith.addf %20, %22 : vector<8x128xf32>
    %24 = math.tanh %23 : vector<8x128xf32>
    %25 = arith.addf %18, %24 : vector<8x128xf32>
    %c0_24 = arith.constant 0 : index
    %c0_25 = arith.constant 0 : index
    %c0_26 = arith.constant 0 : index
    %26 = vector.load %arg10[%c0_24, %c0_25, %c0_26] : memref<1x8x128xf32, #tpu.memory_space<vmem>>, vector<1x8x128xf32>
    %27 = vector.shape_cast %26 : vector<1x8x128xf32> to vector<8x128xf32>
    %28 = vector.shape_cast %18 : vector<8x128xf32> to vector<1x8x128xf32>
    tpu.vector_store %arg10[%c0_24, %c0_25, %c0_26], %28 {strides = array<i32>} : memref<1x8x128xf32, #tpu.memory_space<vmem>>, vector<1x8x128xf32>,
    %c0_27 = arith.constant 0 : index
    %c0_28 = arith.constant 0 : index
    %c0_29 = arith.constant 0 : index
    %29 = vector.load %arg11[%c0_27, %c0_28, %c0_29] : memref<1x8x128xf32, #tpu.memory_space<vmem>>, vector<1x8x128xf32>
    %30 = vector.shape_cast %29 : vector<1x8x128xf32> to vector<8x128xf32>
    %31 = vector.shape_cast %25 : vector<8x128xf32> to vector<1x8x128xf32>
    tpu.vector_store %arg11[%c0_27, %c0_28, %c0_29], %31 {strides = array<i32>} : memref<1x8x128xf32, #tpu.memory_space<vmem>>, vector<1x8x128xf32>,
    %32 = arith.mulf %5, %5 : vector<8x128xf32>
    %cst_30 = arith.constant dense<0.000000e+00> : vector<128xf32>
    %33 = vector.multi_reduction <add>, %32, %cst_30 [0] : vector<8x128xf32> to vector<128xf32>
    %34 = vector.shape_cast %33 : vector<128xf32> to vector<1x128xf32>
    %35 = tpu.concatenate %18, %25 in 1 : vector<8x128xf32>, vector<8x128xf32> -> vector<8x256xf32>
    %cst_31 = arith.constant dense<0.000000e+00> : vector<256x128xf32>
    %36 = tpu.matmul %35, %5, %cst_31 {dimension_numbers = #tpu.dot_dimension_numbers<[0], [0], [1], [1], [0, 1, 1, 1], [], []>} : vector<8x256xf32>, vector<8x128xf32>, vector<256x128xf32> -> vector<256x128xf32>
    %cst_32 = arith.constant 1.000000e+00 : f32
    %37 = vector.broadcast %cst_32 : f32 to vector<8x1xf32>
    %38 = arith.mulf %35, %35 : vector<8x256xf32>
    %cst_33 = arith.constant dense<0.000000e+00> : vector<256x1xf32>
    %39 = tpu.matmul %38, %37, %cst_33 {dimension_numbers = #tpu.dot_dimension_numbers<[0], [0], [1], [1], [0, 1, 1, 1], [], []>} : vector<8x256xf32>, vector<8x1xf32>, vector<256x1xf32> -> vector<256x1xf32>
    %40 = vector.extract_strided_slice %36 {offsets = [0, 0], sizes = [128, 128], strides = [1, 1]} : vector<256x128xf32> to vector<128x128xf32>
    %cst_34 = arith.constant 2.000000e+00 : f32
    %41 = vector.broadcast %cst_34 : f32 to vector<128x128xf32>
    %42 = arith.mulf %41, %40 : vector<128x128xf32>
    %43 = vector.broadcast %34 : vector<1x128xf32> to vector<128x128xf32>
    %44 = arith.subf %43, %42 : vector<128x128xf32>
    %45 = vector.extract_strided_slice %36 {offsets = [128, 0], sizes = [128, 128], strides = [1, 1]} : vector<256x128xf32> to vector<128x128xf32>
    %cst_35 = arith.constant 2.000000e+00 : f32
    %46 = vector.broadcast %cst_35 : f32 to vector<128x128xf32>
    %47 = arith.mulf %46, %45 : vector<128x128xf32>
    %48 = vector.broadcast %34 : vector<1x128xf32> to vector<128x128xf32>
    %49 = arith.subf %48, %47 : vector<128x128xf32>
    %cst_36 = arith.constant 0.000000e+00 : f32
    %50 = vector.broadcast %cst_36 : f32 to vector<1x128xf32>
    %c0_i32 = arith.constant 0 : i32
    %c16_i32 = arith.constant 16 : i32
    %51 = arith.addi %c0_i32, %c16_i32 : i32
    %c1_i32 = arith.constant 1 : i32
    %52:4 = scf.for %arg14 = %c0_i32 to %51 step %c1_i32 iter_args(%arg15 = %44, %arg16 = %50, %arg17 = %49, %arg18 = %50) -> (vector<128x128xf32>, vector<1x128xf32>, vector<128x128xf32>, vector<1x128xf32>)  : i32 {
      %cst_58 = arith.constant dense<0x7F800000> : vector<128xf32>
      %113 = vector.multi_reduction <minimumf>, %arg15, %cst_58 [1] : vector<128x128xf32> to vector<128xf32>
      %114 = vector.shape_cast %113 : vector<128xf32> to vector<128x1xf32>
      %115 = vector.broadcast %114 : vector<128x1xf32> to vector<128x128xf32>
      %116 = arith.cmpf ole, %arg15, %115 : vector<128x128xf32>
      %cst_59 = arith.constant 1.000000e+30 : f32
      %117 = vector.broadcast %cst_59 : f32 to vector<128x128xf32>
      %118 = arith.select %116, %117, %arg15 : vector<128x128xi1>, vector<128x128xf32>
      %cst_60 = arith.constant dense<0x7F800000> : vector<128xf32>
      %119 = vector.multi_reduction <minimumf>, %118, %cst_60 [1] : vector<128x128xf32> to vector<128xf32>
      %120 = vector.shape_cast %119 : vector<128xf32> to vector<128x1xf32>
      %cst_61 = arith.constant 5.000000e+29 : f32
      %121 = vector.broadcast %cst_61 : f32 to vector<128x1xf32>
      %122 = arith.cmpf oge, %120, %121 : vector<128x1xf32>
      %123 = arith.select %122, %114, %120 : vector<128x1xi1>, vector<128x1xf32>
      %124 = arith.subf %123, %114 : vector<128x1xf32>
      %cst_62 = arith.constant 5.000000e-03 : f32
      %125 = vector.broadcast %cst_62 : f32 to vector<128x1xf32>
      %126 = arith.addf %124, %125 : vector<128x1xf32>
      %cst_63 = arith.constant -1.000000e+30 : f32
      %127 = vector.shape_cast %126 : vector<128x1xf32> to vector<128x1xf32>
      %128 = vector.broadcast %127 : vector<128x1xf32> to vector<128x128xf32>
      %129 = vector.broadcast %cst_63 : f32 to vector<128x128xf32>
      %130 = arith.select %116, %128, %129 : vector<128x128xi1>, vector<128x128xf32>
      %cst_64 = arith.constant dense<0xFF800000> : vector<128xf32>
      %131 = vector.multi_reduction <maximumf>, %130, %cst_64 [0] : vector<128x128xf32> to vector<128xf32>
      %132 = vector.shape_cast %131 : vector<128xf32> to vector<1x128xf32>
      %cst_65 = arith.constant 0.000000e+00 : f32
      %133 = vector.broadcast %cst_65 : f32 to vector<1x128xf32>
      %134 = arith.maximumf %132, %133 : vector<1x128xf32>
      %cst_66 = arith.constant dense<0x7F800000> : vector<128xf32>
      %135 = vector.multi_reduction <minimumf>, %arg17, %cst_66 [1] : vector<128x128xf32> to vector<128xf32>
      %136 = vector.shape_cast %135 : vector<128xf32> to vector<128x1xf32>
      %137 = vector.broadcast %136 : vector<128x1xf32> to vector<128x128xf32>
      %138 = arith.cmpf ole, %arg17, %137 : vector<128x128xf32>
      %cst_67 = arith.constant 1.000000e+30 : f32
      %139 = vector.broadcast %cst_67 : f32 to vector<128x128xf32>
      %140 = arith.select %138, %139, %arg17 : vector<128x128xi1>, vector<128x128xf32>
      %cst_68 = arith.constant dense<0x7F800000> : vector<128xf32>
      %141 = vector.multi_reduction <minimumf>, %140, %cst_68 [1] : vector<128x128xf32> to vector<128xf32>
      %142 = vector.shape_cast %141 : vector<128xf32> to vector<128x1xf32>
      %cst_69 = arith.constant 5.000000e+29 : f32
      %143 = vector.broadcast %cst_69 : f32 to vector<128x1xf32>
      %144 = arith.cmpf oge, %142, %143 : vector<128x1xf32>
      %145 = arith.select %144, %136, %142 : vector<128x1xi1>, vector<128x1xf32>
      %146 = arith.subf %145, %136 : vector<128x1xf32>
      %cst_70 = arith.constant 5.000000e-03 : f32
      %147 = vector.broadcast %cst_70 : f32 to vector<128x1xf32>
      %148 = arith.addf %146, %147 : vector<128x1xf32>
      %cst_71 = arith.constant -1.000000e+30 : f32
      %149 = vector.shape_cast %148 : vector<128x1xf32> to vector<128x1xf32>
      %150 = vector.broadcast %149 : vector<128x1xf32> to vector<128x128xf32>
      %151 = vector.broadcast %cst_71 : f32 to vector<128x128xf32>
      %152 = arith.select %138, %150, %151 : vector<128x128xi1>, vector<128x128xf32>
      %cst_72 = arith.constant dense<0xFF800000> : vector<128xf32>
      %153 = vector.multi_reduction <maximumf>, %152, %cst_72 [0] : vector<128x128xf32> to vector<128xf32>
      %154 = vector.shape_cast %153 : vector<128xf32> to vector<1x128xf32>
      %cst_73 = arith.constant 0.000000e+00 : f32
      %155 = vector.broadcast %cst_73 : f32 to vector<1x128xf32>
      %156 = arith.maximumf %154, %155 : vector<1x128xf32>
      %157 = vector.broadcast %134 : vector<1x128xf32> to vector<128x128xf32>
      %158 = arith.addf %arg15, %157 : vector<128x128xf32>
      %159 = arith.addf %arg16, %134 : vector<1x128xf32>
      %160 = vector.broadcast %156 : vector<1x128xf32> to vector<128x128xf32>
      %161 = arith.addf %arg17, %160 : vector<128x128xf32>
      %162 = arith.addf %arg18, %156 : vector<1x128xf32>
      scf.yield %158, %159, %161, %162 : vector<128x128xf32>, vector<1x128xf32>, vector<128x128xf32>, vector<1x128xf32>
    }
    %53 = vector.extract_strided_slice %39 {offsets = [0, 0], sizes = [128, 1], strides = [1, 1]} : vector<256x1xf32> to vector<128x1xf32>
    %cst_37 = arith.constant dense<0x7F800000> : vector<128xf32>
    %54 = vector.multi_reduction <minimumf>, %52#0, %cst_37 [1] : vector<128x128xf32> to vector<128xf32>
    %55 = vector.shape_cast %54 : vector<128xf32> to vector<128x1xf32>
    %56 = tpu.iota {dimensions = array<i32: 1>} : vector<128x128xi32>
    %57 = vector.broadcast %55 : vector<128x1xf32> to vector<128x128xf32>
    %58 = arith.cmpf ole, %52#0, %57 : vector<128x128xf32>
    %c128_i32 = arith.constant 128 : i32
    %59 = vector.broadcast %c128_i32 : i32 to vector<128x128xi32>
    %60 = arith.select %58, %56, %59 : vector<128x128xi1>, vector<128x128xi32>
    %cst_38 = arith.constant dense<2147483647> : vector<128xi32>
    %61 = vector.multi_reduction <minsi>, %60, %cst_38 [1] : vector<128x128xi32> to vector<128xi32>
    %62 = vector.shape_cast %61 : vector<128xi32> to vector<128x1xi32>
    %63 = vector.broadcast %62 : vector<128x1xi32> to vector<128x128xi32>
    %64 = arith.cmpi eq, %56, %63 : vector<128x128xi32>
    %65 = vector.broadcast %52#1 : vector<1x128xf32> to vector<128x128xf32>
    %66 = arith.subf %52#0, %65 : vector<128x128xf32>
    %67 = vector.broadcast %53 : vector<128x1xf32> to vector<128x128xf32>
    %68 = arith.addf %66, %67 : vector<128x128xf32>
    %cst_39 = arith.constant 0.000000e+00 : f32
    %69 = vector.broadcast %cst_39 : f32 to vector<128x128xf32>
    %70 = arith.maximumf %68, %69 : vector<128x128xf32>
    %71 = math.sqrt %70 : vector<128x128xf32>
    %cst_40 = arith.constant 0.000000e+00 : f32
    %72 = vector.broadcast %cst_40 : f32 to vector<128x128xf32>
    %73 = arith.select %64, %71, %72 : vector<128x128xi1>, vector<128x128xf32>
    %cst_41 = arith.constant dense<0.000000e+00> : vector<128xf32>
    %74 = vector.multi_reduction <add>, %73, %cst_41 [1] : vector<128x128xf32> to vector<128xf32>
    %75 = vector.shape_cast %74 : vector<128xf32> to vector<128x1xf32>
    %cst_42 = arith.constant dense<0.000000e+00> : vector<1xf32>
    %76 = vector.multi_reduction <add>, %75, %cst_42 [0] : vector<128x1xf32> to vector<1xf32>
    %77 = vector.shape_cast %76 : vector<1xf32> to vector<1x1xf32>
    %cst_43 = arith.constant 7.812500e-03 : f32
    %78 = vector.broadcast %cst_43 : f32 to vector<1x1xf32>
    %79 = arith.mulf %77, %78 : vector<1x1xf32>
    %c0_44 = arith.constant 0 : index
    %c0_45 = arith.constant 0 : index
    %c0_46 = arith.constant 0 : index
    %80 = vector.load %arg12[%c0_44, %c0_45, %c0_46] : memref<1x1x1xf32, #tpu.memory_space<vmem>>, vector<1x1x1xf32>
    %81 = vector.shape_cast %80 : vector<1x1x1xf32> to vector<1x1xf32>
    %82 = vector.shape_cast %79 : vector<1x1xf32> to vector<1x1x1xf32>
    tpu.vector_store %arg12[%c0_44, %c0_45, %c0_46], %82 {strides = array<i32>} : memref<1x1x1xf32, #tpu.memory_space<vmem>>, vector<1x1x1xf32>,
    %83 = vector.extract_strided_slice %39 {offsets = [128, 0], sizes = [128, 1], strides = [1, 1]} : vector<256x1xf32> to vector<128x1xf32>
    %cst_47 = arith.constant dense<0x7F800000> : vector<128xf32>
    %84 = vector.multi_reduction <minimumf>, %52#2, %cst_47 [1] : vector<128x128xf32> to vector<128xf32>
    %85 = vector.shape_cast %84 : vector<128xf32> to vector<128x1xf32>
    %86 = tpu.iota {dimensions = array<i32: 1>} : vector<128x128xi32>
    %87 = vector.broadcast %85 : vector<128x1xf32> to vector<128x128xf32>
    %88 = arith.cmpf ole, %52#2, %87 : vector<128x128xf32>
    %c128_i32_48 = arith.constant 128 : i32
    %89 = vector.broadcast %c128_i32_48 : i32 to vector<128x128xi32>
    %90 = arith.select %88, %86, %89 : vector<128x128xi1>, vector<128x128xi32>
    %cst_49 = arith.constant dense<2147483647> : vector<128xi32>
    %91 = vector.multi_reduction <minsi>, %90, %cst_49 [1] : vector<128x128xi32> to vector<128xi32>
    %92 = vector.shape_cast %91 : vector<128xi32> to vector<128x1xi32>
    %93 = vector.broadcast %92 : vector<128x1xi32> to vector<128x128xi32>
    %94 = arith.cmpi eq, %86, %93 : vector<128x128xi32>
    %95 = vector.broadcast %52#3 : vector<1x128xf32> to vector<128x128xf32>
    %96 = arith.subf %52#2, %95 : vector<128x128xf32>
    %97 = vector.broadcast %83 : vector<128x1xf32> to vector<128x128xf32>
    %98 = arith.addf %96, %97 : vector<128x128xf32>
    %cst_50 = arith.constant 0.000000e+00 : f32
    %99 = vector.broadcast %cst_50 : f32 to vector<128x128xf32>
    %100 = arith.maximumf %98, %99 : vector<128x128xf32>
    %101 = math.sqrt %100 : vector<128x128xf32>
    %cst_51 = arith.constant 0.000000e+00 : f32
    %102 = vector.broadcast %cst_51 : f32 to vector<128x128xf32>
    %103 = arith.select %94, %101, %102 : vector<128x128xi1>, vector<128x128xf32>
    %cst_52 = arith.constant dense<0.000000e+00> : vector<128xf32>
    %104 = vector.multi_reduction <add>, %103, %cst_52 [1] : vector<128x128xf32> to vector<128xf32>
    %105 = vector.shape_cast %104 : vector<128xf32> to vector<128x1xf32>
    %cst_53 = arith.constant dense<0.000000e+00> : vector<1xf32>
    %106 = vector.multi_reduction <add>, %105, %cst_53 [0] : vector<128x1xf32> to vector<1xf32>
    %107 = vector.shape_cast %106 : vector<1xf32> to vector<1x1xf32>
    %cst_54 = arith.constant 7.812500e-03 : f32
    %108 = vector.broadcast %cst_54 : f32 to vector<1x1xf32>
    %109 = arith.mulf %107, %108 : vector<1x1xf32>
    %c0_55 = arith.constant 0 : index
    %c0_56 = arith.constant 0 : index
    %c0_57 = arith.constant 0 : index
    %110 = vector.load %arg13[%c0_55, %c0_56, %c0_57] : memref<1x1x1xf32, #tpu.memory_space<vmem>>, vector<1x1x1xf32>
    %111 = vector.shape_cast %110 : vector<1x1x1xf32> to vector<1x1xf32>
    %112 = vector.shape_cast %109 : vector<1x1xf32> to vector<1x1x1xf32>
    tpu.vector_store %arg13[%c0_55, %c0_56, %c0_57], %112 {strides = array<i32>} : memref<1x1x1xf32, #tpu.memory_space<vmem>>, vector<1x1x1xf32>,
    return
  }
  func.func @transform_0(%arg0: i32) -> (i32, i32, i32) {
    %c0_i32 = arith.constant 0 : i32
    %c0_i32_0 = arith.constant 0 : i32
    %c0_i32_1 = arith.constant 0 : i32
    return %arg0, %c0_i32, %c0_i32_0 : i32, i32, i32
  }
  func.func @transform_1(%arg0: i32) -> (i32, i32, i32) {
    %c0_i32 = arith.constant 0 : i32
    %c0_i32_0 = arith.constant 0 : i32
    %c0_i32_1 = arith.constant 0 : i32
    return %arg0, %c0_i32, %c0_i32_0 : i32, i32, i32
  }
  func.func @transform_2(%arg0: i32) -> (i32, i32, i32) {
    %c0_i32 = arith.constant 0 : i32
    %c0_i32_0 = arith.constant 0 : i32
    %c0_i32_1 = arith.constant 0 : i32
    return %arg0, %c0_i32, %c0_i32_0 : i32, i32, i32
  }
  func.func @transform_3(%arg0: i32) -> (i32, i32) {
    %c0_i32 = arith.constant 0 : i32
    %c0_i32_0 = arith.constant 0 : i32
    %c0_i32_1 = arith.constant 0 : i32
    return %c0_i32, %c0_i32_0 : i32, i32
  }
  func.func @transform_4(%arg0: i32) -> (i32, i32) {
    %c0_i32 = arith.constant 0 : i32
    %c0_i32_0 = arith.constant 0 : i32
    %c0_i32_1 = arith.constant 0 : i32
    return %c0_i32, %c0_i32_0 : i32, i32
  }
  func.func @transform_5(%arg0: i32) -> (i32, i32) {
    %c0_i32 = arith.constant 0 : i32
    %c0_i32_0 = arith.constant 0 : i32
    %c0_i32_1 = arith.constant 0 : i32
    return %c0_i32, %c0_i32_0 : i32, i32
  }
  func.func @transform_6(%arg0: i32) -> (i32, i32) {
    %c0_i32 = arith.constant 0 : i32
    %c0_i32_0 = arith.constant 0 : i32
    %c0_i32_1 = arith.constant 0 : i32
    return %c0_i32, %c0_i32_0 : i32, i32
  }
  func.func @transform_7(%arg0: i32) -> (i32, i32) {
    %c0_i32 = arith.constant 0 : i32
    %c0_i32_0 = arith.constant 0 : i32
    %c0_i32_1 = arith.constant 0 : i32
    return %c0_i32, %c0_i32_0 : i32, i32
  }
  func.func @transform_8(%arg0: i32) -> (i32, i32) {
    %c0_i32 = arith.constant 0 : i32
    %c0_i32_0 = arith.constant 0 : i32
    %c0_i32_1 = arith.constant 0 : i32
    return %c0_i32, %c0_i32_0 : i32, i32
  }
  func.func @transform_9(%arg0: i32) -> (i32, i32, i32) {
    %c0_i32 = arith.constant 0 : i32
    %c0_i32_0 = arith.constant 0 : i32
    %c0_i32_1 = arith.constant 0 : i32
    return %arg0, %c0_i32, %c0_i32_0 : i32, i32, i32
  }
  func.func @transform_10(%arg0: i32) -> (i32, i32, i32) {
    %c0_i32 = arith.constant 0 : i32
    %c0_i32_0 = arith.constant 0 : i32
    %c0_i32_1 = arith.constant 0 : i32
    return %arg0, %c0_i32, %c0_i32_0 : i32, i32, i32
  }
  func.func @transform_11(%arg0: i32) -> (i32, i32, i32) {
    %c0_i32 = arith.constant 0 : i32
    %c0_i32_0 = arith.constant 0 : i32
    %c0_i32_1 = arith.constant 0 : i32
    return %arg0, %c0_i32, %c0_i32_0 : i32, i32, i32
  }
  func.func @transform_12(%arg0: i32) -> (i32, i32, i32) {
    %c0_i32 = arith.constant 0 : i32
    %c0_i32_0 = arith.constant 0 : i32
    %c0_i32_1 = arith.constant 0 : i32
    return %arg0, %c0_i32, %c0_i32_0 : i32, i32, i32
  }
}

</mosaic_0001>

<bundles_post_ra>
// kernel: full_model_forward.1
= control target key start
LH: loop header
LB: loop body
LE: loop exit
PB: predicated region body
PF: predicated region fallthrough
CT: control target
= control target key end

     0   :  { %s4832_s21 = smov 0   ;;  %s7380_s0 = inlined_call_operand.vmem [shape: f32[2,8,128], index: 0, kind: input, shape index: {}]   ;;  %s7381_s1 = inlined_call_operand.vmem [shape: f32[2,8,8], index: 1, kind: input, shape index: {}]   ;;  %s7382_s2 = inlined_call_operand.vmem [shape: f32[2,8,128], index: 2, kind: input, shape index: {}]   ;;  %s7383_s3 = inlined_call_operand.vmem [shape: f32[64,8], index: 3, kind: input, shape index: {}]   ;;  %s7384_s4 = inlined_call_operand.vmem [shape: f32[64,1], index: 4, kind: input, shape index: {}]   ;;  %s7385_s5 = inlined_call_operand.vmem [shape: f32[8,64], index: 5, kind: input, shape index: {}]   ;;  %s7386_s6 = inlined_call_operand.vmem [shape: f32[8,1], index: 6, kind: input, shape index: {}]   ;;  %s7387_s7 = inlined_call_operand.vmem [shape: f32[8,64], index: 7, kind: input, shape index: {}]   ;;  %s7388_s8 = inlined_call_operand.vmem [shape: f32[8,1], index: 8, kind: input, shape index: {}]   ;;  %s7389_s9 = inlined_call_operand.vmem [shape: f32[2,8,128], index: 9, kind: output, shape index: {0}]   ;;  %s7390_s10 = inlined_call_operand.vmem [shape: f32[2,8,128], index: 10, kind: output, shape index: {1}]   ;;  %s7391_s11 = inlined_call_operand.vmem [shape: f32[2,1,1], index: 11, kind: output, shape index: {2}]   ;;  %s7392_s12 = inlined_call_operand.vmem [shape: f32[2,1,1], index: 12, kind: output, shape index: {3}]  }
   0x1 LB: > { %s3748_s22 = sadd.s32 4294967295, %s4620_s21   ;;  %p3752_p0 = scmp.ge.s32.totalorder %s4620_s21, 1  ;;  %s4620_s21 = sphi %s4832_s21, %s23_s21  }
   0x2   : > { %p386_p1 = scmp.lt.s32.totalorder %s4620_s21, 3 }
   0x4   : > { %p387_p2 = pnand %p3752_p0, %p386_p1 }
   0x6   : > { %390 = sbr.rel (%p387_p2) target bundleno = 2500 (0x9c4), region = 56 }
   0xd   : > { %p444_p3 = scmp.lt.s32.totalorder %s3748_s22, 1  ;;  %v4762_v0 = vmov 0.0   ;;  %vm4763_vm0 = vmmov 0   ;;  %vm505_vm1 = vcmask 64512   ;;  %v579_v4 = vld [vmem:[%s7383_s3] sm:$0xff]  ;;  %v588_v5 = vld [vmem:[%s7384_s4 + $0x8] sm:$0xff] }
   0xe   : > { %3930 = vmatprep.subr.mxu0 %v4762_v0  ;;  %3932 = vmatprep.mubr.msk.f32.mxu0 %vm4763_vm0, %v4762_v0  ;;  %v7393_v6 = vmov 0   ;;  %v589_v7 = vld [vmem:[%s7384_s4 + $0x10] sm:$0xff]  ;;  %v587_v8 = vld [vmem:[%s7384_s4] sm:$0xff]  ;;  %v590_v9 = vld [vmem:[%s7384_s4 + $0x18] sm:$0xff]  ;;  %v4765_v25 = vmov 0.0|0.0   ;;  %vm779_vm2 = vcmask 523264  }
   0xf   : > { %s7950_s22 = smov (!%p444_p3, %s3748_s22), 1  ;;  %3937 = vmatprep.mubr.msk.f32.mxu1 %vm505_vm1, %v579_v4  ;;  %4405 = vset.pattern.permute.xlu1 %v7393_v6  ;;  %v591_v10 = vld [vmem:[%s7384_s4 + $0x20] sm:$0xff]  ;;  %v592_v11 = vld [vmem:[%s7384_s4 + $0x28] sm:$0xff]  ;;  %v593_v12 = vld [vmem:[%s7384_s4 + $0x30] sm:$0xff] }
  0x10   : > { %s4844_s23 = sshll.u32 %s7950_s22, 3  ;;  %s466_s26 = scalar_lea.vmem %s7391_s11, %s7950_s22  ;;  %602 = vperm.xlu1 %4405, %v588_v5   ;;  %v594_v13 = vld [vmem:[%s7384_s4 + $0x38] sm:$0xff]  ;;  %v773_v14 = vld [vmem:[%s7386_s6] sm:$0xff]  ;;  %v580_v17 = vld [vmem:[%s7383_s3 + $0x8] sm:$0xff] }
  0x11   : > { %s451_s29 = scalar_lea.vmem %s7381_s1, %s4844_s23  ;;  %s469_s14 = scalar_lea.vmem %s7392_s12, %s7950_s22  ;;  %v854_v15 = vld [vmem:[%s7388_s8] sm:$0xff]  ;;  %v581_v19 = vld [vmem:[%s7383_s3 + $0x10] sm:$0xff]  ;;  %v582_v20 = vld [vmem:[%s7383_s3 + $0x18] sm:$0xff] }
  0x12   : > { %v471_v1 = vld [vmem:[%s451_s29] sm:$0xff]  ;;  %s447_s17 = scalar_lea.vmem %s7380_s0, %s4844_s23  ;;  %v584_v22 = vld [vmem:[%s7383_s3 + $0x28] sm:$0xff]  ;;  %v585_v23 = vld [vmem:[%s7383_s3 + $0x30] sm:$0xff]  ;;  %s459_s24 = scalar_lea.vmem %s7389_s9, %s4844_s23 }
  0x13   : > { %473 = vxpose.xlu0.b32.start.end [1/1] (short) (narrow) %v471_v1, 8  ;;  %v470_v2 = vld [vmem:[%s447_s17] sm:$0xff]  ;;  %v586_v24 = vld [vmem:[%s7383_s3 + $0x38] sm:$0xff]  ;;  %s455_s28 = scalar_lea.vmem %s7382_s2, %s4844_s23  ;;  %s463_s13 = scalar_lea.vmem %s7390_s10, %s4844_s23 }
  0x14   : > { %3931 = vmatpush3.msra.mxu0 %v470_v2  ;;  %607 = vperm.xlu1 %4405, %v589_v7   ;;  %v583_v21 = vld [vmem:[%s7383_s3 + $0x20] sm:$0xff]  ;;  %s5297_s23 = smov 0  }
  0x15   : > { %4087 = vmatprep.subr.bf16.mxu0 %v4765_v25  ;;  %v772_v62 = vld [vmem:[%s7385_s5] sm:$0xff] }
  0x16   : > { %v853_v63 = vld [vmem:[%s7387_s7] sm:$0xff] }
  0x18   : > { %612 = vperm.xlu1 %4405, %v590_v9  }
  0x1c   : > { %617 = vperm.xlu1 %4405, %v591_v10   ;;  %v4766_v10 = vmov 1.0  }
  0x20   : > { %622 = vperm.xlu1 %4405, %v592_v11   ;;  %v4943_v11 = vld [vmem:[%s455_s28] sm:$0xff] }
  0x24   : > { %627 = vperm.xlu1 %4405, %v593_v12  }
  0x28   : > { %632 = vperm.xlu1 %4405, %v594_v13  }
  0x2c   : > { %776 = vperm.xlu1 %4405, %v773_v14  }
  0x30   : > { %857 = vperm.xlu1 %4405, %v854_v15  }
  0x3c   : > { %4404 = vset.pattern.permute.xlu0 %v7393_v6 }
  0x3d   : > { %597 = vperm.xlu0 %4404, %v587_v8  }
  0x8f   : > { %v603_v26 = vpop.permute.xlu1 %602 }
  0x93   : > { %v489_v3 = vpop.trf.xlu0  ;;  %v608_v27 = vpop.permute.xlu1 %607 }
  0x94   : > { %3933 = vmatmul.mubr.msk.f32.vlgmr.msra.gmra.mrb[0].mxu0 %vm505_vm1, %v489_v3 }
  0x95   : > { %3965 = vmatprep.mubr.msk.f32.mxu0 %vm4763_vm0, %v4762_v0 }
  0x97   : > { %v613_v28 = vpop.permute.xlu1 %612 }
  0x9b   : > { %v618_v29 = vpop.permute.xlu1 %617 }
  0x9f   : > { %v623_v31 = vpop.permute.xlu1 %622 }
  0xa3   : > { %v628_v41 = vpop.permute.xlu1 %627 }
  0xa7   : > { %v633_v52 = vpop.permute.xlu1 %632 }
  0xbc   : > { %v598_v30 = vpop.permute.xlu0 %597 }
 0x167   : > { %v575_v16 = vpop.f32.mrb[0].mxu0 }
 0x168   : > { %v3934_v18 = vpop.f32.mrb[1].mxu0  ;;  %3935 = vmatprep.subr.mxu1 %v575_v16 }
 0x169   : > { %3936 = vmatpush3.msra.mxu1 %v575_v16 }
 0x16a   : > { %3938 = vmatmul.mubr.msk.f32.vlgmr.msra.gmra.mrb[0].mxu1 %vm505_vm1, %v580_v17  ;;  %4099 = vmatprep.subr.bf16.mxu1 %v4765_v25 }
 0x16b   : > { %3940 = vmatprep.mubr.msk.f32.mxu1 %vm505_vm1, %v581_v19 }
 0x16e   : > { %3941 = vmatmul.mubr.msk.f32.gmra.mrb[2].mxu1 %vm505_vm1, %v582_v20 }
 0x16f   : > { %3943 = vmatprep.mubr.msk.f32.mxu1 %vm505_vm1, %v583_v21 }
 0x172   : > { %3944 = vmatmul.mubr.msk.f32.gmra.mrb[4].mxu1 %vm505_vm1, %v584_v22 }
 0x173   : > { %3946 = vmatprep.mubr.msk.f32.mxu1 %vm505_vm1, %v585_v23 }
 0x176   : > { %3947 = vmatmul.mubr.msk.f32.gmra.mrb[6].mxu1 %vm505_vm1, %v586_v24 }
 0x177   : > { %3984 = vmatprep.mubr.msk.f32.mxu1 %vm4763_vm0, %v4762_v0  ;;  %v777_v0 = vpop.permute.xlu1 %776 }
 0x17b   : > { %v858_v1 = vpop.permute.xlu1 %857 }
 0x23d   : > { %v3939_v32 = vpop.f32.mrb[0].mxu1 }
 0x23e   : > { %v731_v33 = vadd.f32 %v3939_v32, %v603_v26  ;;  %v725_v34 = vpop.f32.mrb[1].mxu1 }
 0x23f   : > { %v726_v35 = vadd.f32 %v725_v34, %v598_v30 }
 0x240   : > { %v765_v36 = vmax.f32 %v731_v33, 0.0 }
 0x241   : > { %v764_v37 = vmax.f32 %v726_v35, 0.0  ;;  %v3942_v38 = vpop.f32.mrb[2].mxu1 }
 0x242   : > { %v741_v39 = vadd.f32 %v3942_v38, %v613_v28  ;;  %v735_v40 = vpop.f32.mrb[3].mxu1 }
 0x243   : > { %v4088_v42 = vpack.c.bf16 %v765_v36, %v764_v37  ;;  %v736_v43 = vadd.f32 %v735_v40, %v608_v27 }
 0x244   : > { %v767_v44 = vmax.f32 %v741_v39, 0.0 }
 0x245   : > { %v766_v45 = vmax.f32 %v736_v43, 0.0  ;;  %v3945_v46 = vpop.f32.mrb[4].mxu1  ;;  %4089 = vmatpush3.bf16.msra.mxu0 %v4088_v42  ;;  %4101 = vmatpush3.bf16.msra.mxu1 %v4088_v42 }
 0x246   : > { %v751_v47 = vadd.f32 %v3945_v46, %v623_v31  ;;  %v745_v48 = vpop.f32.mrb[5].mxu1  ;;  %4090 = vmatprep.subr.bf16.mxu0 %v4765_v25  ;;  %4102 = vmatprep.subr.bf16.mxu1 %v4765_v25 }
 0x247   : > { %v4091_v49 = vpack.c.bf16 %v767_v44, %v766_v45  ;;  %v746_v50 = vadd.f32 %v745_v48, %v618_v29 }
 0x248   : > { %v769_v51 = vmax.f32 %v751_v47, 0.0 }
 0x249   : > { %v768_v53 = vmax.f32 %v746_v50, 0.0  ;;  %v3948_v54 = vpop.f32.mrb[6].mxu1  ;;  %4092 = vmatpush3.bf16.msra.mxu0 %v4091_v49  ;;  %4104 = vmatpush3.bf16.msra.mxu1 %v4091_v49 }
 0x24a   : > { %v761_v55 = vadd.f32 %v3948_v54, %v633_v52  ;;  %v755_v56 = vpop.f32.mrb[7].mxu1  ;;  %4093 = vmatprep.subr.bf16.mxu0 %v4765_v25  ;;  %4105 = vmatprep.subr.bf16.mxu1 %v4765_v25 }
 0x24b   : > { %v4094_v57 = vpack.c.bf16 %v769_v51, %v768_v53  ;;  %v756_v58 = vadd.f32 %v755_v56, %v628_v41 }
 0x24c   : > { %v771_v59 = vmax.f32 %v761_v55, 0.0 }
 0x24d   : > { %v770_v60 = vmax.f32 %v756_v58, 0.0  ;;  %4095 = vmatpush3.bf16.msra.mxu0 %v4094_v57  ;;  %4107 = vmatpush3.bf16.msra.mxu1 %v4094_v57 }
 0x24e   : > { %4096 = vmatprep.subr.bf16.mxu0 %v4765_v25  ;;  %4108 = vmatprep.subr.bf16.mxu1 %v4765_v25 }
 0x24f   : > { %v4097_v61 = vpack.c.bf16 %v771_v59, %v770_v60 }
 0x251   : > { %4098 = vmatpush3.bf16.msra.mxu0 %v4097_v61  ;;  %4110 = vmatpush3.bf16.msra.mxu1 %v4097_v61 }
 0x252   : > { %4037 = vmatprep.subr.mxu1 %v4766_v10  ;;  %3987 = vmatprep.subr.mxu0 %v4943_v11 }
 0x254   : > { %3966 = vmatmul.mubr.msk.f32.vlgmr.msra.gmra.mrb[2].mxu0 %vm779_vm2, %v772_v62  ;;  %3985 = vmatmul.mubr.msk.f32.vlgmr.msra.gmra.mrb[8].mxu1 %vm779_vm2, %v853_v63 }
 0x255   : > { %4038 = vmatpush3.msra.mxu1 %v4766_v10  ;;  %3988 = vmatpush3.msra.mxu0 %v4943_v11 }
 0x327   : > { %v849_v2 = vpop.f32.mrb[2].mxu0  ;;  %v929_v3 = vpop.f32.mrb[8].mxu1 }
 0x328   : > { %v850_v4 = vadd.f32 %v849_v2, %v777_v0  ;;  %v930_v5 = vadd.f32 %v929_v3, %v858_v1  ;;  %v3967_v7 = vpop.f32.mrb[3].mxu0  ;;  %v3986_v8 = vpop.f32.mrb[9].mxu1 }
 0x32a   : > { %935 = vst [vmem:[%s459_s24] sm:$0xff] %v850_v4  ;;  %4406 = vtanh.f32 %v930_v5  ;;  %944 = vxpose.xlu1.b32.start.end [1/1] (short) %v850_v4, 128  ;;  %v1329_v9 = vmul.f32 %v850_v4, %v850_v4 }
 0x32c   : > { %1331 = vxpose.xlu0.b32.start.end [1/1] (short) %v1329_v9, 128 }
 0x334   : > { %v4407_v12 = vpop.eup %4406 }
 0x335   : > { %v934_v13 = vadd.f32 %v4407_v12, %v850_v4 }
 0x337   : > { %936 = vst [vmem:[%s463_s13] sm:$0xff] %v934_v13  ;;  %v1330_v14 = vmul.f32 %v934_v13, %v934_v13 }
 0x367   : > { %1363 = vxpose.xlu1.b32.start.end [1/1] (short) %v1330_v14, 128 }
 0x369   : > { %976 = vxpose.xlu0.b32.start.end [1/1] (short) %v934_v13, 128 }
 0x3aa   : > { %v960_v15 = vpop.trf.xlu1 }
 0x3ab   : > { %3989 = vmatprep.mubr.msk.f32.mxu0 %vm505_vm1, %v960_v15 }
 0x3ac   : > { %v1347_v16 = vpop.trf.xlu0 }
 0x3ad   : > { %4039 = vmatprep.mubr.msk.f32.mxu1 %vm505_vm1, %v1347_v16 }
 0x3ae   : > { %v961_v17 = vpop.trf.xlu1 }
 0x3af   : > { %3990 = vmatmul.mubr.msk.f32.vlgmr.msra.gmra.mrb[4].mxu0 %vm505_vm1, %v961_v17  ;;  %v937_v17 = vmul.f32 %v4943_v11, %v4943_v11 }
 0x3b0   : > { %v1348_v18 = vpop.trf.xlu0 }
 0x3b1   : > { %4040 = vmatmul.mubr.msk.f32.vlgmr.msra.gmra.mrb[10].mxu1 %vm505_vm1, %v1348_v18  ;;  %v938_v18 = vrot.slane %v937_v17, 4 }
 0x3b2   : > { %v962_v19 = vpop.trf.xlu1 }
 0x3b3   : > { %3992 = vmatprep.mubr.msk.f32.mxu0 %vm505_vm1, %v962_v19  ;;  %v939_v19 = vadd.f32 %v938_v18, %v937_v17 }
 0x3b4   : > { %v1349_v20 = vpop.trf.xlu0 }
 0x3b5   : > { %4042 = vmatprep.mubr.msk.f32.mxu1 %vm505_vm1, %v1349_v20  ;;  %v940_v20 = vrot.slane %v939_v19, 2 }
 0x3b6   : > { %v963_v21 = vpop.trf.xlu1 }
 0x3b7   : > { %3993 = vmatmul.mubr.msk.f32.gmra.mrb[6].mxu0 %vm505_vm1, %v963_v21  ;;  %v941_v21 = vadd.f32 %v940_v20, %v939_v19 }
 0x3b8   : > { %v1350_v22 = vpop.trf.xlu0 }
 0x3b9   : > { %4043 = vmatmul.mubr.msk.f32.gmra.mrb[12].mxu1 %vm505_vm1, %v1350_v22  ;;  %v942_v22 = vrot.slane %v941_v21, 1 }
 0x3ba   : > { %v964_v23 = vpop.trf.xlu1 }
 0x3bb   : > { %3995 = vmatprep.mubr.msk.f32.mxu0 %vm505_vm1, %v964_v23  ;;  %v5017_v23 = vadd.f32 %v942_v22, %v941_v21 }
 0x3bc   : > { %v1351_v24 = vpop.trf.xlu0 }
 0x3bd   : > { %4045 = vmatprep.mubr.msk.f32.mxu1 %vm505_vm1, %v1351_v24 }
 0x3be   : > { %v965_v25 = vpop.trf.xlu1 }
 0x3bf   : > { %3996 = vmatmul.mubr.msk.f32.gmra.mrb[8].mxu0 %vm505_vm1, %v965_v25 }
 0x3c0   : > { %v1352_v26 = vpop.trf.xlu0 }
 0x3c1   : > { %4046 = vmatmul.mubr.msk.f32.gmra.mrb[14].mxu1 %vm505_vm1, %v1352_v26 }
 0x3c2   : > { %v966_v27 = vpop.trf.xlu1 }
 0x3c3   : > { %3998 = vmatprep.mubr.msk.f32.mxu0 %vm505_vm1, %v966_v27 }
 0x3c4   : > { %v1353_v28 = vpop.trf.xlu0 }
 0x3c5   : > { %4048 = vmatprep.mubr.msk.f32.mxu1 %vm505_vm1, %v1353_v28 }
 0x3c6   : > { %v967_v29 = vpop.trf.xlu1 }
 0x3c7   : > { %3999 = vmatmul.mubr.msk.f32.gmra.mrb[10].mxu0 %vm505_vm1, %v967_v29 }
 0x3c8   : > { %v1354_v30 = vpop.trf.xlu0 }
 0x3c9   : > { %4049 = vmatmul.mubr.msk.f32.gmra.mrb[16].mxu1 %vm505_vm1, %v1354_v30 }
 0x3ca   : > { %v968_v31 = vpop.trf.xlu1 }
 0x3cb   : > { %4001 = vmatprep.mubr.msk.f32.mxu0 %vm505_vm1, %v968_v31 }
 0x3cc   : > { %v1355_v32 = vpop.trf.xlu0 }
 0x3cd   : > { %4051 = vmatprep.mubr.msk.f32.mxu1 %vm505_vm1, %v1355_v32 }
 0x3ce   : > { %v969_v33 = vpop.trf.xlu1 }
 0x3cf   : > { %4002 = vmatmul.mubr.msk.f32.gmra.mrb[12].mxu0 %vm505_vm1, %v969_v33 }
 0x3d0   : > { %v1356_v34 = vpop.trf.xlu0 }
 0x3d1   : > { %4052 = vmatmul.mubr.msk.f32.gmra.mrb[18].mxu1 %vm505_vm1, %v1356_v34 }
 0x3d2   : > { %v970_v35 = vpop.trf.xlu1 }
 0x3d3   : > { %4004 = vmatprep.mubr.msk.f32.mxu0 %vm505_vm1, %v970_v35 }
 0x3d4   : > { %v1357_v36 = vpop.trf.xlu0 }
 0x3d5   : > { %4054 = vmatprep.mubr.msk.f32.mxu1 %vm505_vm1, %v1357_v36 }
 0x3d6   : > { %v971_v37 = vpop.trf.xlu1 }
 0x3d7   : > { %4005 = vmatmul.mubr.msk.f32.gmra.mrb[14].mxu0 %vm505_vm1, %v971_v37 }
 0x3d8   : > { %v1358_v38 = vpop.trf.xlu0 }
 0x3d9   : > { %4055 = vmatmul.mubr.msk.f32.gmra.mrb[20].mxu1 %vm505_vm1, %v1358_v38 }
 0x3da   : > { %v972_v39 = vpop.trf.xlu1 }
 0x3db   : > { %4007 = vmatprep.mubr.msk.f32.mxu0 %vm505_vm1, %v972_v39 }
 0x3dc   : > { %v1359_v40 = vpop.trf.xlu0 }
 0x3dd   : > { %4057 = vmatprep.mubr.msk.f32.mxu1 %vm505_vm1, %v1359_v40 }
 0x3de   : > { %v973_v41 = vpop.trf.xlu1 }
 0x3df   : > { %4008 = vmatmul.mubr.msk.f32.gmra.mrb[16].mxu0 %vm505_vm1, %v973_v41 }
 0x3e0   : > { %v1360_v42 = vpop.trf.xlu0 }
 0x3e1   : > { %4058 = vmatmul.mubr.msk.f32.gmra.mrb[22].mxu1 %vm505_vm1, %v1360_v42 }
 0x3e2   : > { %v974_v43 = vpop.trf.xlu1 }
 0x3e3   : > { %4010 = vmatprep.mubr.msk.f32.mxu0 %vm505_vm1, %v974_v43 }
 0x3e4   : > { %v1361_v44 = vpop.trf.xlu0 }
 0x3e5   : > { %4060 = vmatprep.mubr.msk.f32.mxu1 %vm505_vm1, %v1361_v44 }
 0x3e6   : > { %v975_v45 = vpop.trf.xlu1 }
 0x3e7   : > { %4011 = vmatmul.mubr.msk.f32.gmra.mrb[18].mxu0 %vm505_vm1, %v975_v45 }
 0x3e8   : > { %v1362_v46 = vpop.trf.xlu0 }
 0x3e9   : > { %4061 = vmatmul.mubr.msk.f32.gmra.mrb[24].mxu1 %vm505_vm1, %v1362_v46 }
 0x3ea   : > { %v1379_v47 = vpop.trf.xlu1 }
 0x3eb   : > { %4063 = vmatprep.mubr.msk.f32.mxu1 %vm505_vm1, %v1379_v47 }
 0x3ec   : > { %v992_v48 = vpop.trf.xlu0 }
 0x3ed   : > { %4013 = vmatprep.mubr.msk.f32.mxu0 %vm505_vm1, %v992_v48 }
 0x3ee   : > { %v1380_v49 = vpop.trf.xlu1 }
 0x3ef   : > { %4064 = vmatmul.mubr.msk.f32.gmra.mrb[26].mxu1 %vm505_vm1, %v1380_v49 }
 0x3f0   : > { %v993_v50 = vpop.trf.xlu0 }
 0x3f1   : > { %4014 = vmatmul.mubr.msk.f32.gmra.mrb[20].mxu0 %vm505_vm1, %v993_v50 }
 0x3f2   : > { %v1381_v51 = vpop.trf.xlu1 }
 0x3f3   : > { %4066 = vmatprep.mubr.msk.f32.mxu1 %vm505_vm1, %v1381_v51 }
 0x3f4   : > { %v994_v52 = vpop.trf.xlu0 }
 0x3f5   : > { %4016 = vmatprep.mubr.msk.f32.mxu0 %vm505_vm1, %v994_v52 }
 0x3f6   : > { %v1382_v53 = vpop.trf.xlu1 }
 0x3f7   : > { %4067 = vmatmul.mubr.msk.f32.gmra.mrb[28].mxu1 %vm505_vm1, %v1382_v53 }
 0x3f8   : > { %v995_v54 = vpop.trf.xlu0 }
 0x3f9   : > { %4017 = vmatmul.mubr.msk.f32.gmra.mrb[22].mxu0 %vm505_vm1, %v995_v54 }
 0x3fa   : > { %v1383_v55 = vpop.trf.xlu1 }
 0x3fb   : > { %4069 = vmatprep.mubr.msk.f32.mxu1 %vm505_vm1, %v1383_v55 }
 0x3fc   : > { %v996_v56 = vpop.trf.xlu0 }
 0x3fd   : > { %4019 = vmatprep.mubr.msk.f32.mxu0 %vm505_vm1, %v996_v56 }
 0x3fe   : > { %v1384_v57 = vpop.trf.xlu1 }
 0x3ff   : > { %4070 = vmatmul.mubr.msk.f32.gmra.mrb[30].mxu1 %vm505_vm1, %v1384_v57 }
 0x400   : > { %v997_v58 = vpop.trf.xlu0 }
 0x401   : > { %4020 = vmatmul.mubr.msk.f32.gmra.mrb[24].mxu0 %vm505_vm1, %v997_v58 }
 0x402   : > { %v1385_v59 = vpop.trf.xlu1 }
 0x403   : > { %4072 = vmatprep.mubr.msk.f32.mxu1 %vm505_vm1, %v1385_v59 }
 0x404   : > { %v998_v60 = vpop.trf.xlu0 }
 0x405   : > { %4022 = vmatprep.mubr.msk.f32.mxu0 %vm505_vm1, %v998_v60 }
 0x406   : > { %v1386_v61 = vpop.trf.xlu1 }
 0x407   : > { %4073 = vmatmul.mubr.msk.f32.gmra.mrb[32].mxu1 %vm505_vm1, %v1386_v61 }
 0x408   : > { %v999_v62 = vpop.trf.xlu0 }
 0x409   : > { %4023 = vmatmul.mubr.msk.f32.gmra.mrb[26].mxu0 %vm505_vm1, %v999_v62 }
 0x40a   : > { %v1387_v63 = vpop.trf.xlu1 }
 0x40b   : > { %4075 = vmatprep.mubr.msk.f32.mxu1 %vm505_vm1, %v1387_v63 }
 0x40c   : > { %v1000_v0 = vpop.trf.xlu0 }
 0x40d   : > { %4025 = vmatprep.mubr.msk.f32.mxu0 %vm505_vm1, %v1000_v0 }
 0x40e   : > { %v1388_v1 = vpop.trf.xlu1 }
 0x40f   : > { %4076 = vmatmul.mubr.msk.f32.gmra.mrb[34].mxu1 %vm505_vm1, %v1388_v1 }
 0x410   : > { %v1001_v2 = vpop.trf.xlu0 }
 0x411   : > { %4026 = vmatmul.mubr.msk.f32.gmra.mrb[28].mxu0 %vm505_vm1, %v1001_v2 }
 0x412   : > { %v1389_v3 = vpop.trf.xlu1 }
 0x413   : > { %4078 = vmatprep.mubr.msk.f32.mxu1 %vm505_vm1, %v1389_v3 }
 0x414   : > { %v1002_v4 = vpop.trf.xlu0 }
 0x415   : > { %4028 = vmatprep.mubr.msk.f32.mxu0 %vm505_vm1, %v1002_v4 }
 0x416   : > { %v1390_v5 = vpop.trf.xlu1 }
 0x417   : > { %4079 = vmatmul.mubr.msk.f32.gmra.mrb[36].mxu1 %vm505_vm1, %v1390_v5 }
 0x418   : > { %v1003_v7 = vpop.trf.xlu0 }
 0x419   : > { %4029 = vmatmul.mubr.msk.f32.gmra.mrb[30].mxu0 %vm505_vm1, %v1003_v7 }
 0x41a   : > { %v1391_v8 = vpop.trf.xlu1 }
 0x41b   : > { %4081 = vmatprep.mubr.msk.f32.mxu1 %vm505_vm1, %v1391_v8 }
 0x41c   : > { %v1004_v9 = vpop.trf.xlu0 }
 0x41d   : > { %4031 = vmatprep.mubr.msk.f32.mxu0 %vm505_vm1, %v1004_v9 }
 0x41e   : > { %v1392_v10 = vpop.trf.xlu1 }
 0x41f   : > { %4082 = vmatmul.mubr.msk.f32.gmra.mrb[38].mxu1 %vm505_vm1, %v1392_v10 }
 0x420   : > { %v1005_v12 = vpop.trf.xlu0 }
 0x421   : > { %4032 = vmatmul.mubr.msk.f32.gmra.mrb[32].mxu0 %vm505_vm1, %v1005_v12 }
 0x422   : > { %v1393_v13 = vpop.trf.xlu1 }
 0x423   : > { %4084 = vmatprep.mubr.msk.f32.mxu1 %vm505_vm1, %v1393_v13 }
 0x424   : > { %v1006_v14 = vpop.trf.xlu0 }
 0x425   : > { %4034 = vmatprep.mubr.msk.f32.mxu0 %vm505_vm1, %v1006_v14 }
 0x426   : > { %v1394_v15 = vpop.trf.xlu1 }
 0x427   : > { %4085 = vmatmul.mubr.msk.f32.gmra.mrb[40].mxu1 %vm505_vm1, %v1394_v15 }
 0x428   : > { %v1007_v16 = vpop.trf.xlu0 }
 0x429   : > { %4035 = vmatmul.mubr.msk.f32.gmra.mrb[34].mxu0 %vm505_vm1, %v1007_v16 }
 0x482   : > { %v3991_v24 = vpop.f32.mrb[4].mxu0 }
 0x483   : > { %v5019_v25 = vmul.f32 2.0, %v3991_v24  ;;  %v1170_v26 = vpop.f32.mrb[5].mxu0 }
 0x484   : > { %v5021_v27 = vpop.f32.mrb[10].mxu1  ;;  %v5023_v28 = vmul.f32 2.0, %v1170_v26 }
 0x485   : > { %7552 = vst [vmem:[#allocation2_spill] sm:$0xff] %v5021_v27  ;;  %v5025_v29 = vpop.f32.mrb[11].mxu1 }
 0x486   : > { %7553 = vst [vmem:[#allocation3_spill] sm:$0xff] %v5025_v29 }
 0x48a   : > { %v3994_v31 = vpop.f32.mrb[6].mxu0 }
 0x48b   : > { %v5031_v32 = vmul.f32 2.0, %v3994_v31  ;;  %v1180_v33 = vpop.f32.mrb[7].mxu0 }
 0x48c   : > { %v5033_v34 = vpop.f32.mrb[12].mxu1  ;;  %v5035_v35 = vmul.f32 2.0, %v1180_v33 }
 0x48d   : > { %7554 = vst [vmem:[#allocation4_spill] sm:$0xff] %v5033_v34  ;;  %v5037_v36 = vpop.f32.mrb[13].mxu1 }
 0x48e   : > { %7555 = vst [vmem:[#allocation5_spill] sm:$0xff] %v5037_v36 }
 0x492   : > { %v3997_v39 = vpop.f32.mrb[8].mxu0 }
 0x493   : > { %v5043_v40 = vmul.f32 2.0, %v3997_v39  ;;  %v1190_v41 = vpop.f32.mrb[9].mxu0 }
 0x494   : > { %v5045_v42 = vpop.f32.mrb[14].mxu1  ;;  %v5047_v43 = vmul.f32 2.0, %v1190_v41 }
 0x495   : > { %7556 = vst [vmem:[#allocation6_spill] sm:$0xff] %v5045_v42  ;;  %v5049_v44 = vpop.f32.mrb[15].mxu1 }
 0x496   : > { %7557 = vst [vmem:[#allocation7_spill] sm:$0xff] %v5049_v44 }
 0x49a   : > { %v4000_v47 = vpop.f32.mrb[10].mxu0 }
 0x49b   : > { %v5055_v48 = vmul.f32 2.0, %v4000_v47  ;;  %v1200_v49 = vpop.f32.mrb[11].mxu0 }
 0x49c   : > { %v5057_v50 = vpop.f32.mrb[16].mxu1  ;;  %v5059_v51 = vmul.f32 2.0, %v1200_v49 }
 0x49d   : > { %7558 = vst [vmem:[#allocation8_spill] sm:$0xff] %v5057_v50  ;;  %v5061_v52 = vpop.f32.mrb[17].mxu1 }
 0x49e   : > { %7559 = vst [vmem:[#allocation9_spill] sm:$0xff] %v5061_v52 }
 0x4a2   : > { %v4003_v55 = vpop.f32.mrb[12].mxu0 }
 0x4a3   : > { %v5067_v56 = vmul.f32 2.0, %v4003_v55  ;;  %v1210_v57 = vpop.f32.mrb[13].mxu0 }
 0x4a4   : > { %v5069_v58 = vpop.f32.mrb[18].mxu1  ;;  %v5071_v59 = vmul.f32 2.0, %v1210_v57 }
 0x4a5   : > { %7560 = vst [vmem:[#allocation10_spill] sm:$0xff] %v5069_v58  ;;  %v5073_v60 = vpop.f32.mrb[19].mxu1 }
 0x4a6   : > { %7561 = vst [vmem:[#allocation11_spill] sm:$0xff] %v5073_v60 }
 0x4aa   : > { %v4006_v63 = vpop.f32.mrb[14].mxu0 }
 0x4ab   : > { %v5079_v0 = vmul.f32 2.0, %v4006_v63  ;;  %v1220_v1 = vpop.f32.mrb[15].mxu0 }
 0x4ac   : > { %v5081_v2 = vpop.f32.mrb[20].mxu1  ;;  %v5083_v3 = vmul.f32 2.0, %v1220_v1 }
 0x4ad   : > { %7562 = vst [vmem:[#allocation12_spill] sm:$0xff] %v5081_v2  ;;  %v5085_v4 = vpop.f32.mrb[21].mxu1 }
 0x4ae   : > { %7563 = vst [vmem:[#allocation13_spill] sm:$0xff] %v5085_v4 }
 0x4b2   : > { %v4009_v8 = vpop.f32.mrb[16].mxu0 }
 0x4b3   : > { %v5091_v9 = vmul.f32 2.0, %v4009_v8  ;;  %v1230_v10 = vpop.f32.mrb[17].mxu0 }
 0x4b4   : > { %v5093_v12 = vpop.f32.mrb[22].mxu1  ;;  %v5095_v13 = vmul.f32 2.0, %v1230_v10 }
 0x4b5   : > { %7564 = vst [vmem:[#allocation14_spill] sm:$0xff] %v5093_v12  ;;  %v5097_v14 = vpop.f32.mrb[23].mxu1  ;;  %v5175_v12 = vmov 0.0  }
 0x4b6   : > { %7565 = vst [vmem:[#allocation15_spill] sm:$0xff] %v5097_v14 }
 0x4ba   : > { %v4012_v17 = vpop.f32.mrb[18].mxu0 }
 0x4bb   : > { %v5103_v18 = vmul.f32 2.0, %v4012_v17  ;;  %v1240_v19 = vpop.f32.mrb[19].mxu0 }
 0x4bc   : > { %v5105_v20 = vpop.f32.mrb[24].mxu1  ;;  %v5107_v21 = vmul.f32 2.0, %v1240_v19 }
 0x4bd   : > { %7566 = vst [vmem:[#allocation16_spill] sm:$0xff] %v5105_v20  ;;  %v5109_v22 = vpop.f32.mrb[25].mxu1 }
 0x4be   : > { %7567 = vst [vmem:[#allocation17_spill] sm:$0xff] %v5109_v22 }
 0x4c2   : > { %v5115_v31 = vpop.f32.mrb[26].mxu1 }
 0x4c3   : > { %7568 = vst [vmem:[#allocation18_spill] sm:$0xff] %v5115_v31  ;;  %v5117_v33 = vpop.f32.mrb[27].mxu1 }
 0x4c4   : > { %7569 = vst [vmem:[#allocation19_spill] sm:$0xff] %v5117_v33  ;;  %v4015_v39 = vpop.f32.mrb[20].mxu0 }
 0x4c5   : > { %v5119_v41 = vmul.f32 2.0, %v4015_v39  ;;  %v1250_v47 = vpop.f32.mrb[21].mxu0 }
 0x4c6   : > { %v5121_v49 = vmul.f32 2.0, %v1250_v47 }
 0x4ca   : > { %v5127_v63 = vpop.f32.mrb[28].mxu1 }
 0x4cb   : > { %7570 = vst [vmem:[#allocation20_spill] sm:$0xff] %v5127_v63  ;;  %v5129_v1 = vpop.f32.mrb[29].mxu1 }
 0x4cc   : > { %7571 = vst [vmem:[#allocation21_spill] sm:$0xff] %v5129_v1  ;;  %v4018_v8 = vpop.f32.mrb[22].mxu0 }
 0x4cd   : > { %v5131_v10 = vmul.f32 2.0, %v4018_v8  ;;  %v1260_v17 = vpop.f32.mrb[23].mxu0 }
 0x4ce   : > { %v5133_v19 = vmul.f32 2.0, %v1260_v17 }
 0x4cf   : > { %v1767_v39 = vsub.f32 %v5017_v23, %v5131_v10  }
 0x4d0   : > { %v1766_v47 = vsub.f32 %v5017_v23, %v5133_v19  }
 0x4d2   : > { %v5139_v6 = vpop.f32.mrb[30].mxu1 }
 0x4d3   : > { %7572 = vst [vmem:[#allocation22_spill] sm:$0xff] %v5139_v6  ;;  %v5141_v30 = vpop.f32.mrb[31].mxu1 }
 0x4d4   : > { %7573 = vst [vmem:[#allocation23_spill] sm:$0xff] %v5141_v30  ;;  %v4021_v11 = vpop.f32.mrb[24].mxu0 }
 0x4d5   : > { %v1753_v38 = vmul.f32 2.0, %v4021_v11  ;;  %v1270_v37 = vpop.f32.mrb[25].mxu0 }
 0x4d6   : > { %v1752_v46 = vmul.f32 2.0, %v1270_v37 }
 0x4d7   : > { %v1769_v8 = vsub.f32 %v5017_v23, %v1753_v38  }
 0x4d8   : > { %v1768_v45 = vsub.f32 %v5017_v23, %v1752_v46  }
 0x4da   : > { %v5145_v17 = vpop.f32.mrb[32].mxu1 }
 0x4db   : > { %7574 = vst [vmem:[#allocation24_spill] sm:$0xff] %v5145_v17  ;;  %v5147_v54 = vpop.f32.mrb[33].mxu1 }
 0x4dc   : > { %7575 = vst [vmem:[#allocation25_spill] sm:$0xff] %v5147_v54  ;;  %v4024_v10 = vpop.f32.mrb[26].mxu0 }
 0x4dd   : > { %v1755_v53 = vmul.f32 2.0, %v4024_v10  ;;  %v1280_v62 = vpop.f32.mrb[27].mxu0 }
 0x4de   : > { %v1754_v19 = vmul.f32 2.0, %v1280_v62 }
 0x4df   : > { %v1771_v61 = vsub.f32 %v5017_v23, %v1755_v53  }
 0x4e0   : > { %v1770_v7 = vsub.f32 %v5017_v23, %v1754_v19  }
 0x4e2   : > { %v5151_v5 = vpop.f32.mrb[34].mxu1 }
 0x4e3   : > { %7576 = vst [vmem:[#allocation26_spill] sm:$0xff] %v5151_v5  ;;  %v5153_v11 = vpop.f32.mrb[35].mxu1 }
 0x4e4   : > { %7577 = vst [vmem:[#allocation27_spill] sm:$0xff] %v5153_v11  ;;  %v4027_v37 = vpop.f32.mrb[28].mxu0 }
 0x4e5   : > { %v1757_v38 = vmul.f32 2.0, %v4027_v37  ;;  %v1290_v16 = vpop.f32.mrb[29].mxu0 }
 0x4e6   : > { %v1756_v46 = vmul.f32 2.0, %v1290_v16 }
 0x4e7   : > { %v1773_v15 = vsub.f32 %v5017_v23, %v1757_v38  }
 0x4e8   : > { %v1772_v26 = vsub.f32 %v5017_v23, %v1756_v46  }
 0x4ea   : > { %v5157_v24 = vpop.f32.mrb[36].mxu1 }
 0x4eb   : > { %7578 = vst [vmem:[#allocation28_spill] sm:$0xff] %v5157_v24  ;;  %v5159_v10 = vpop.f32.mrb[37].mxu1 }
 0x4ec   : > { %7579 = vst [vmem:[#allocation29_spill] sm:$0xff] %v5159_v10  ;;  %v4030_v62 = vpop.f32.mrb[30].mxu0 }
 0x4ed   : > { %v1759_v53 = vmul.f32 2.0, %v4030_v62  ;;  %v1300_v57 = vpop.f32.mrb[31].mxu0 }
 0x4ee   : > { %v1758_v19 = vmul.f32 2.0, %v1300_v57 }
 0x4ef   : > { %v1775_v55 = vsub.f32 %v5017_v23, %v1759_v53  }
 0x4f0   : > { %v1774_v22 = vsub.f32 %v5017_v23, %v1758_v19  }
 0x4f2   : > { %v5163_v14 = vpop.f32.mrb[38].mxu1 }
 0x4f3   : > { %7580 = vst [vmem:[#allocation30_spill] sm:$0xff] %v5163_v14  ;;  %v5165_v37 = vpop.f32.mrb[39].mxu1 }
 0x4f4   : > { %7581 = vst [vmem:[#allocation31_spill] sm:$0xff] %v5165_v37  ;;  %v4033_v16 = vpop.f32.mrb[32].mxu0 }
 0x4f5   : > { %v1761_v38 = vmul.f32 2.0, %v4033_v16  ;;  %v1310_v4 = vpop.f32.mrb[33].mxu0  ;;  %v5215_v16 = vmov 0.0  }
 0x4f6   : > { %v1760_v46 = vmul.f32 2.0, %v1310_v4  ;;  %v7584_v4 = vsub.f32 %v5017_v23, %v5119_v41   ;;  %v7588_v41 = vsub.f32 %v5017_v23, %v5091_v9   ;;  %v7592_v9 = vsub.f32 %v5017_v23, %v5067_v56  }
 0x4f7   : > { %v1777_v20 = vsub.f32 %v5017_v23, %v1761_v38   ;;  %v7586_v38 = vsub.f32 %v5017_v23, %v5103_v18   ;;  %v7590_v18 = vsub.f32 %v5017_v23, %v5079_v0   ;;  %v7594_v0 = vsub.f32 %v5017_v23, %v5055_v48  }
 0x4f8   : > { %v1776_v10 = vsub.f32 %v5017_v23, %v1760_v46   ;;  %v7587_v46 = vsub.f32 %v5017_v23, %v5107_v21   ;;  %v7591_v21 = vsub.f32 %v5017_v23, %v5083_v3   ;;  %v7595_v3 = vsub.f32 %v5017_v23, %v5059_v51  }
 0x4f9   : > { %v7596_v56 = vsub.f32 %v5017_v23, %v5043_v40   ;;  %v7598_v48 = vsub.f32 %v5017_v23, %v5031_v32   ;;  %v7599_v51 = vsub.f32 %v5017_v23, %v5035_v35   ;;  %v7600_v40 = vsub.f32 %v5017_v23, %v5019_v25  }
 0x4fa   : > { %v5169_v5 = vpop.f32.mrb[40].mxu1 }
 0x4fb   : > { %7582 = vst [vmem:[#allocation32_spill] sm:$0xff] %v5169_v5  ;;  %v5171_v62 = vpop.f32.mrb[41].mxu1 }
 0x4fc   : > { %7583 = vst [vmem:[#allocation33_spill] sm:$0xff] %v5171_v62  ;;  %v4036_v57 = vpop.f32.mrb[34].mxu0 }
 0x4fd   : > { %v1763_v53 = vmul.f32 2.0, %v4036_v57  ;;  %v1320_v11 = vpop.f32.mrb[35].mxu0 }
 0x4fe   : > { %v1762_v19 = vmul.f32 2.0, %v1320_v11  ;;  %v7585_v11 = vsub.f32 %v5017_v23, %v5121_v49   ;;  %v7589_v49 = vsub.f32 %v5017_v23, %v5095_v13   ;;  %v7593_v13 = vsub.f32 %v5017_v23, %v5071_v59  }
 0x4ff   : > { %v1779_v14 = vsub.f32 %v5017_v23, %v1763_v53   ;;  %v7597_v59 = vsub.f32 %v5017_v23, %v5047_v43   ;;  %v7601_v43 = vsub.f32 %v5017_v23, %v5023_v28  }
 0x500   : > { %v1778_v37 = vsub.f32 %v5017_v23, %v1762_v19  }
 0x501 LB: >> { %7602 = vst [vmem:[#allocation34_spill] sm:$0xff] %v4624_v12  ;;  %7603 = vst [vmem:[#allocation35_spill] sm:$0xff] %v4628_v14  ;;  %1820 = vmin.xlane.f32.xlu0 %v4756_v43  ;;  %1824 = vmin.xlane.f32.xlu1 %v4748_v51  ;;  %s1785_s15 = sadd.s32 1, %s4760_s23   ;;  %s4760_s23 = sphi %s5297_s23, %s7781_s23   ;;  %v4756_v43 = vphi %v7601_v43, %v7780_v43   ;;  %v4752_v40 = vphi %v7600_v40, %v5907_v40   ;;  %v4748_v51 = vphi %v7599_v51, %v5910_v51   ;;  %v4744_v48 = vphi %v7598_v48, %v7779_v48   ;;  %v4740_v59 = vphi %v7597_v59, %v5916_v59   ;;  %v4736_v56 = vphi %v7596_v56, %v7778_v56   ;;  %v4732_v3 = vphi %v7595_v3, %v7777_v3   ;;  %v4728_v0 = vphi %v7594_v0, %v7776_v0   ;;  %v4724_v13 = vphi %v7593_v13, %v7775_v13   ;;  %v4720_v9 = vphi %v7592_v9, %v7774_v9   ;;  %v4716_v21 = vphi %v7591_v21, %v7773_v21   ;;  %v4712_v18 = vphi %v7590_v18, %v7772_v18   ;;  %v4708_v49 = vphi %v7589_v49, %v7771_v49   ;;  %v4704_v41 = vphi %v7588_v41, %v7770_v41   ;;  %v4700_v46 = vphi %v7587_v46, %v7769_v46   ;;  %v4696_v38 = vphi %v7586_v38, %v7768_v38   ;;  %v4692_v16 = vphi %v5215_v16, %v7767_v16   ;;  %v4688_v11 = vphi %v7585_v11, %v7765_v11   ;;  %v4684_v4 = vphi %v7584_v4, %v7764_v4   ;;  %v4680_v47 = vphi %v1766_v47, %v7763_v47   ;;  %v4676_v39 = vphi %v1767_v39, %v7762_v39   ;;  %v4672_v45 = vphi %v1768_v45, %v7761_v45   ;;  %v4668_v8 = vphi %v1769_v8, %v7760_v8   ;;  %v4664_v7 = vphi %v1770_v7, %v7759_v7   ;;  %v4660_v61 = vphi %v1771_v61, %v7758_v61   ;;  %v4656_v26 = vphi %v1772_v26, %v7757_v26   ;;  %v4652_v15 = vphi %v1773_v15, %v7756_v15   ;;  %v4648_v22 = vphi %v1774_v22, %v7755_v22   ;;  %v4644_v55 = vphi %v1775_v55, %v7754_v55   ;;  %v4640_v10 = vphi %v1776_v10, %v7753_v10   ;;  %v4636_v20 = vphi %v1777_v20, %v7752_v20   ;;  %v4632_v37 = vphi %v1778_v37, %v7751_v37   ;;  %v4628_v14 = vphi %v1779_v14, %v7750_v14   ;;  %v4624_v12 = vphi %v5175_v12, %v7749_v12  }
 0x502   : >> { %7604 = vst [vmem:[#allocation36_spill] sm:$0xff] %v4632_v37  ;;  %7605 = vst [vmem:[#allocation37_spill] sm:$0xff] %v4636_v20  ;;  %p6008_p4 = scmp.ge.s32.totalorder %s1785_s15, 16   ;;  %s7781_s23 = smov %s1785_s15 }
 0x503   : >> { %7606 = vst [vmem:[#allocation38_spill] sm:$0xff] %v4640_v10  ;;  %7607 = vst [vmem:[#allocation39_spill] sm:$0xff] %v4644_v55 }
 0x504   : >> { %7608 = vst [vmem:[#allocation40_spill] sm:$0xff] %v4648_v22  ;;  %7609 = vst [vmem:[#allocation41_spill] sm:$0xff] %v4652_v15 }
 0x505   : >> { %7610 = vst [vmem:[#allocation42_spill] sm:$0xff] %v4656_v26  ;;  %7611 = vst [vmem:[#allocation43_spill] sm:$0xff] %v4660_v61  ;;  %1822 = vmin.xlane.f32.xlu0 %v4752_v40  ;;  %1826 = vmin.xlane.f32.xlu1 %v4744_v48 }
 0x506   : >> { %7612 = vst [vmem:[#allocation44_spill] sm:$0xff] %v4664_v7  ;;  %7613 = vst [vmem:[#allocation45_spill] sm:$0xff] %v4692_v16 }
 0x507   : >> { %7614 = vst [vmem:[#allocation46_spill] sm:$0xff] %v4696_v38  ;;  %7615 = vst [vmem:[#allocation47_spill] sm:$0xff] %v4700_v46 }
 0x508   : >> { %7616 = vst [vmem:[#allocation48_spill] sm:$0xff] %v4704_v41  ;;  %7617 = vst [vmem:[#allocation49_spill] sm:$0xff] %v4708_v49 }
 0x509   : >> { %7618 = vst [vmem:[#allocation50_spill] sm:$0xff] %v4712_v18  ;;  %7619 = vst [vmem:[#allocation51_spill] sm:$0xff] %v4720_v9  ;;  %1828 = vmin.xlane.f32.xlu0 %v4740_v59  ;;  %1830 = vmin.xlane.f32.xlu1 %v4736_v56 }
 0x50a   : >> { %7620 = vst [vmem:[#allocation52_spill] sm:$0xff] %v4740_v59  ;;  %7621 = vst [vmem:[#allocation53_spill] sm:$0xff] %v4748_v51 }
 0x50b   : >> { %7622 = vst [vmem:[#allocation54_spill] sm:$0xff] %v4752_v40 }
 0x50d   : >> { %1832 = vmin.xlane.f32.xlu0 %v4732_v3  ;;  %1834 = vmin.xlane.f32.xlu1 %v4728_v0 }
 0x511   : >> { %2018 = vmin.xlane.f32.xlu0 %v4688_v11  ;;  %2020 = vmin.xlane.f32.xlu1 %v4684_v4 }
 0x515   : >> { %2022 = vmin.xlane.f32.xlu0 %v4680_v47  ;;  %2024 = vmin.xlane.f32.xlu1 %v4676_v39 }
 0x519   : >> { %2026 = vmin.xlane.f32.xlu0 %v4672_v45  ;;  %2028 = vmin.xlane.f32.xlu1 %v4668_v8 }
 0x51d   : >> { %2030 = vmin.xlane.f32.xlu0 %v4664_v7  ;;  %2032 = vmin.xlane.f32.xlu1 %v4660_v61 }
 0x521   : >> { %1836 = vmin.xlane.f32.xlu0 %v4724_v13  ;;  %1838 = vmin.xlane.f32.xlu1 %v4720_v9 }
 0x525   : >> { %1840 = vmin.xlane.f32.xlu0 %v4716_v21  ;;  %1842 = vmin.xlane.f32.xlu1 %v4712_v18 }
 0x529   : >> { %2034 = vmin.xlane.f32.xlu0 %v4656_v26  ;;  %2036 = vmin.xlane.f32.xlu1 %v4652_v15 }
 0x52d   : >> { %2038 = vmin.xlane.f32.xlu0 %v4648_v22  ;;  %2040 = vmin.xlane.f32.xlu1 %v4644_v55 }
 0x531   : >> { %1844 = vmin.xlane.f32.xlu0 %v4708_v49  ;;  %1846 = vmin.xlane.f32.xlu1 %v4704_v41 }
 0x535   : >> { %1848 = vmin.xlane.f32.xlu0 %v4700_v46  ;;  %1850 = vmin.xlane.f32.xlu1 %v4696_v38 }
 0x539   : >> { %2042 = vmin.xlane.f32.xlu0 %v4640_v10  ;;  %2044 = vmin.xlane.f32.xlu1 %v4636_v20 }
 0x53d   : >> { %2046 = vmin.xlane.f32.xlu0 %v4632_v37  ;;  %2048 = vmin.xlane.f32.xlu1 %v4628_v14 }
 0x58e   : >> { %v5436_v23 = vpop.xlane.xlu0 %1820  ;;  %v5438_v25 = vpop.xlane.xlu1 %1824 }
 0x58f   : >> { %vm1852_vm3 = vcmp.le.f32.partialorder %v4756_v43, %v5436_v23  ;;  %vm1854_vm4 = vcmp.le.f32.partialorder %v4748_v51, %v5438_v25 }
 0x590   : >> { %v1868_v28 = vsel %vm1852_vm3, 1e+30, %v4756_v43  ;;  %v1870_v35 = vsel %vm1854_vm4, 1e+30, %v4748_v51 }
 0x591   : >> { %1884 = vmin.xlane.f32.xlu0 %v1868_v28 }
 0x592   : >> { %v5448_v32 = vpop.xlane.xlu0 %1822  ;;  %v5454_v57 = vpop.xlane.xlu1 %1826 }
 0x593   : >> { %vm1853_vm5 = vcmp.le.f32.partialorder %v4752_v40, %v5448_v32  ;;  %vm1855_vm6 = vcmp.le.f32.partialorder %v4744_v48, %v5454_v57 }
 0x594   : >> { %v1869_v53 = vsel %vm1853_vm5, 1e+30, %v4752_v40  ;;  %v1871_v28 = vsel %vm1855_vm6, 1e+30, %v4744_v48 }
 0x595   : >> { %1888 = vmin.xlane.f32.xlu0 %v1870_v35  ;;  %1886 = vmin.xlane.f32.xlu1 %v1869_v53 }
 0x596   : >> { %v5464_v19 = vpop.xlane.xlu0 %1828  ;;  %v5470_v62 = vpop.xlane.xlu1 %1830 }
 0x597   : >> { %vm1856_vm7 = vcmp.le.f32.partialorder %v4740_v59, %v5464_v19  ;;  %vm1857_vm8 = vcmp.le.f32.partialorder %v4736_v56, %v5470_v62 }
 0x598   : >> { %v1872_v35 = vsel %vm1856_vm7, 1e+30, %v4740_v59  ;;  %v1873_v5 = vsel %vm1857_vm8, 1e+30, %v4736_v56 }
 0x599   : >> { %1892 = vmin.xlane.f32.xlu0 %v1872_v35  ;;  %1890 = vmin.xlane.f32.xlu1 %v1871_v28 }
 0x59a   : >> { %v5480_v53 = vpop.xlane.xlu0 %1832  ;;  %v5486_v60 = vpop.xlane.xlu1 %1834 }
 0x59b   : >> { %vm1858_vm9 = vcmp.le.f32.partialorder %v4732_v3, %v5480_v53  ;;  %vm7466_vm10 = vcmp.le.f32.partialorder %v4728_v0, %v5486_v60 }
 0x59c   : >> { %v1874_v28 = vsel %vm1858_vm9, 1e+30, %v4732_v3  ;;  %v1875_v24 = vsel %vm7466_vm10, 1e+30, %v4728_v0 }
 0x59d   : >> { %1896 = vmin.xlane.f32.xlu0 %v1874_v28  ;;  %1894 = vmin.xlane.f32.xlu1 %v1873_v5 }
 0x59e   : >> { %v5496_v35 = vpop.xlane.xlu0 %2018  ;;  %v5502_v17 = vpop.xlane.xlu1 %2020 }
 0x59f   : >> { %vm2050_vm11 = vcmp.le.f32.partialorder %v4688_v11, %v5496_v35  ;;  %vm7464_vm12 = vcmp.le.f32.partialorder %v4684_v4, %v5502_v17 }
 0x5a0   : >> { %v2066_v5 = vsel %vm2050_vm11, 1e+30, %v4688_v11  ;;  %v2067_v2 = vsel %vm7464_vm12, 1e+30, %v4684_v4 }
 0x5a1   : >> { %2082 = vmin.xlane.f32.xlu0 %v2066_v5  ;;  %1898 = vmin.xlane.f32.xlu1 %v1875_v24 }
 0x5a2   : >> { %v5512_v28 = vpop.xlane.xlu0 %2022  ;;  %v5518_v54 = vpop.xlane.xlu1 %2024 }
 0x5a3   : >> { %vm7465_vm13 = vcmp.le.f32.partialorder %v4680_v47, %v5512_v28  ;;  %vm7396_vm14 = vcmp.le.f32.partialorder %v4676_v39, %v5518_v54 }
 0x5a4   : >> { %v2068_v24 = vsel %vm7465_vm13, 1e+30, %v4680_v47  ;;  %v2069_v58 = vsel %vm7396_vm14, 1e+30, %v4676_v39 }
 0x5a5   : >> { %2086 = vmin.xlane.f32.xlu0 %v2068_v24  ;;  %2084 = vmin.xlane.f32.xlu1 %v2067_v2 }
 0x5a6   : >> { %v5528_v5 = vpop.xlane.xlu0 %2026  ;;  %v5534_v52 = vpop.xlane.xlu1 %2028 }
 0x5a7   : >> { %vm7438_vm15 = vcmp.le.f32.partialorder %v4672_v45, %v5528_v5  ;;  %vm7395_vm0 = vcmp.le.f32.partialorder %v4668_v8, %v5534_v52 }
 0x5a8   : >> { %v2070_v2 = vsel %vm7438_vm15, 1e+30, %v4672_v45  ;;  %v2071_v50 = vsel %vm7395_vm0, 1e+30, %v4668_v8 }
 0x5a9   : >> { %2090 = vmin.xlane.f32.xlu0 %v2070_v2  ;;  %2088 = vmin.xlane.f32.xlu1 %v2069_v58 }
 0x5aa   : >> { %v5544_v24 = vpop.xlane.xlu0 %2030  ;;  %v5550_v42 = vpop.xlane.xlu1 %2032 }
 0x5ab   : >> { %vm7398_vm1 = vcmp.le.f32.partialorder %v4664_v7, %v5544_v24  ;;  %vm7397_vm2 = vcmp.le.f32.partialorder %v4660_v61, %v5550_v42 }
 0x5ac   : >> { %v2072_v58 = vsel %vm7398_vm1, 1e+30, %v4664_v7  ;;  %v2073_v6 = vsel %vm7397_vm2, 1e+30, %v4660_v61 }
 0x5ad   : >> { %2094 = vmin.xlane.f32.xlu0 %v2072_v58  ;;  %2092 = vmin.xlane.f32.xlu1 %v2071_v50 }
 0x5ae   : >> { %v5560_v2 = vpop.xlane.xlu0 %1836  ;;  %v5566_v30 = vpop.xlane.xlu1 %1838 }
 0x5af   : >> { %vm7400_vm0 = vcmp.le.f32.partialorder %v4724_v13, %v5560_v2  ;;  %vm7399_vm14 = vcmp.le.f32.partialorder %v4720_v9, %v5566_v30 }
 0x5b0   : >> { %v1876_v50 = vsel %vm7400_vm0, 1e+30, %v4724_v13  ;;  %v1877_v44 = vsel %vm7399_vm14, 1e+30, %v4720_v9 }
 0x5b1   : >> { %1900 = vmin.xlane.f32.xlu0 %v1876_v50  ;;  %2096 = vmin.xlane.f32.xlu1 %v2073_v6 }
 0x5b2   : >> { %v5576_v58 = vpop.xlane.xlu0 %1840  ;;  %v5582_v63 = vpop.xlane.xlu1 %1842 }
 0x5b3   : >> { %vm7402_vm2 = vcmp.le.f32.partialorder %v4716_v21, %v5576_v58  ;;  %vm7401_vm1 = vcmp.le.f32.partialorder %v4712_v18, %v5582_v63 }
 0x5b4   : >> { %v1878_v6 = vsel %vm7402_vm2, 1e+30, %v4716_v21  ;;  %v1879_v34 = vsel %vm7401_vm1, 1e+30, %v4712_v18 }
 0x5b5   : >> { %1904 = vmin.xlane.f32.xlu0 %v1878_v6  ;;  %1902 = vmin.xlane.f32.xlu1 %v1877_v44 }
 0x5b6   : >> { %v5592_v50 = vpop.xlane.xlu0 %2034  ;;  %v5598_v1 = vpop.xlane.xlu1 %2036 }
 0x5b7   : >> { %7623 = vst [vmem:[#allocation55_spill] sm:$0xff] %v5598_v1  ;;  %vm7403_vm14 = vcmp.le.f32.partialorder %v4656_v26, %v5592_v50  ;;  %vm7404_vm0 = vcmp.le.f32.partialorder %v4652_v15, %v5598_v1 }
 0x5b8   : >> { %v2074_v44 = vsel %vm7403_vm14, 1e+30, %v4656_v26  ;;  %v2075_v31 = vsel %vm7404_vm0, 1e+30, %v4652_v15 }
 0x5b9   : >> { %2098 = vmin.xlane.f32.xlu0 %v2074_v44  ;;  %1906 = vmin.xlane.f32.xlu1 %v1879_v34 }
 0x5ba   : >> { %v5608_v6 = vpop.xlane.xlu0 %2038  ;;  %v5614_v36 = vpop.xlane.xlu1 %2040 }
 0x5bb   : >> { %7624 = vst [vmem:[#allocation56_spill] sm:$0xff] %v5614_v36  ;;  %vm7406_vm1 = vcmp.le.f32.partialorder %v4648_v22, %v5608_v6  ;;  %vm7405_vm2 = vcmp.le.f32.partialorder %v4644_v55, %v5614_v36 }
 0x5bc   : >> { %v2076_v34 = vsel %vm7406_vm1, 1e+30, %v4648_v22  ;;  %v2077_v33 = vsel %vm7405_vm2, 1e+30, %v4644_v55 }
 0x5bd   : >> { %2102 = vmin.xlane.f32.xlu0 %v2076_v34  ;;  %2100 = vmin.xlane.f32.xlu1 %v2075_v31 }
 0x5be   : >> { %v5624_v44 = vpop.xlane.xlu0 %1844  ;;  %v5630_v29 = vpop.xlane.xlu1 %1846 }
 0x5bf   : >> { %7625 = vst [vmem:[#allocation57_spill] sm:$0xff] %v5630_v29  ;;  %vm7410_vm14 = vcmp.le.f32.partialorder %v4708_v49, %v5624_v44  ;;  %vm7409_vm0 = vcmp.le.f32.partialorder %v4704_v41, %v5630_v29 }
 0x5c0   : >> { %v1880_v31 = vsel %vm7410_vm14, 1e+30, %v4708_v49  ;;  %v1881_v27 = vsel %vm7409_vm0, 1e+30, %v4704_v41 }
 0x5c1   : >> { %1908 = vmin.xlane.f32.xlu0 %v1880_v31  ;;  %2104 = vmin.xlane.f32.xlu1 %v2077_v33 }
 0x5c2   : >> { %v5640_v34 = vpop.xlane.xlu0 %1848  ;;  %v5646_v12 = vpop.xlane.xlu1 %1850 }
 0x5c3   : >> { %7626 = vst [vmem:[#allocation58_spill] sm:$0xff] %v5640_v34  ;;  %7627 = vst [vmem:[#allocation59_spill] sm:$0xff] %v5646_v12  ;;  %vm7416_vm2 = vcmp.le.f32.partialorder %v4700_v46, %v5640_v34  ;;  %vm7415_vm1 = vcmp.le.f32.partialorder %v4696_v38, %v5646_v12 }
 0x5c4   : >> { %v1882_v33 = vsel %vm7416_vm2, 1e+30, %v4700_v46  ;;  %v1883_v16 = vsel %vm7415_vm1, 1e+30, %v4696_v38 }
 0x5c5   : >> { %1912 = vmin.xlane.f32.xlu0 %v1882_v33  ;;  %1910 = vmin.xlane.f32.xlu1 %v1881_v27 }
 0x5c6   : >> { %v5656_v31 = vpop.xlane.xlu0 %2042  ;;  %v5662_v55 = vpop.xlane.xlu1 %2044 }
 0x5c7   : >> { %7628 = vst [vmem:[#allocation60_spill] sm:$0xff] %v5656_v31  ;;  %7629 = vst [vmem:[#allocation61_spill] sm:$0xff] %v5662_v55  ;;  %vm7431_vm0 = vcmp.le.f32.partialorder %v4640_v10, %v5656_v31  ;;  %vm7436_vm14 = vcmp.le.f32.partialorder %v4636_v20, %v5662_v55 }
 0x5c8   : >> { %v2078_v27 = vsel %vm7431_vm0, 1e+30, %v4640_v10  ;;  %v2079_v22 = vsel %vm7436_vm14, 1e+30, %v4636_v20 }
 0x5c9   : >> { %2106 = vmin.xlane.f32.xlu0 %v2078_v27  ;;  %1914 = vmin.xlane.f32.xlu1 %v1883_v16 }
 0x5ca   : >> { %v5672_v33 = vpop.xlane.xlu0 %2046  ;;  %v5678_v26 = vpop.xlane.xlu1 %2048 }
 0x5cb   : >> { %7630 = vst [vmem:[#allocation62_spill] sm:$0xff] %v5672_v33  ;;  %7631 = vst [vmem:[#allocation63_spill] sm:$0xff] %v5678_v26  ;;  %vm7437_vm1 = vcmp.le.f32.partialorder %v4632_v37, %v5672_v33  ;;  %vm7463_vm2 = vcmp.le.f32.partialorder %v4628_v14, %v5678_v26 }
 0x5cc   : >> { %v2080_v16 = vsel %vm7437_vm1, 1e+30, %v4632_v37  ;;  %v2081_v27 = vsel %vm7463_vm2, 1e+30, %v4628_v14 }
 0x5cd   : >> { %2110 = vmin.xlane.f32.xlu0 %v2080_v16  ;;  %2108 = vmin.xlane.f32.xlu1 %v2079_v22 }
 0x5d1   : >> { %2112 = vmin.xlane.f32.xlu1 %v2081_v27 }
 0x61e   : >> { %v1885_v10 = vpop.xlane.xlu0 %1884 }
 0x61f   : >> { %vm1916_vm0 = vcmp.ge.f32.partialorder %v1885_v10, 5e+29 }
 0x620   : >> { %v1932_v22 = vsel %vm1916_vm0, %v5436_v23, %v1885_v10 }
 0x621   : >> { %v1948_v26 = vsub.f32 %v1932_v22, %v5436_v23 }
 0x622   : >> { %v1889_v20 = vpop.xlane.xlu0 %1888  ;;  %v1887_v38 = vpop.xlane.xlu1 %1886 }
 0x623   : >> { %vm1918_vm14 = vcmp.ge.f32.partialorder %v1889_v20, 5e+29  ;;  %vm1917_vm1 = vcmp.ge.f32.partialorder %v1887_v38, 5e+29  ;;  %v1964_v10 = vadd.f32 0.005, %v1948_v26 }
 0x624   : >> { %v1934_v14 = vsel %vm1918_vm14, %v5438_v25, %v1889_v20  ;;  %v1933_v27 = vsel %vm1917_vm1, %v5448_v32, %v1887_v38 }
 0x625   : >> { %v1950_v31 = vsub.f32 %v1934_v14, %v5438_v25  ;;  %v1949_v18 = vsub.f32 %v1933_v27, %v5448_v32  ;;  %v5704_v14 = vsel %vm1852_vm3, %v1964_v10, -1e+30 }
 0x626   : >> { %v1893_v15 = vpop.xlane.xlu0 %1892  ;;  %v1891_v55 = vpop.xlane.xlu1 %1890 }
 0x627   : >> { %vm1920_vm15 = vcmp.ge.f32.partialorder %v1893_v15, 5e+29  ;;  %vm1919_vm0 = vcmp.ge.f32.partialorder %v1891_v55, 5e+29  ;;  %v1966_v34 = vadd.f32 0.005, %v1950_v31 }
 0x628   : >> { %v1936_v33 = vsel %vm1920_vm15, %v5464_v19, %v1893_v15  ;;  %v1965_v9 = vadd.f32 0.005, %v1949_v18  ;;  %v1935_v20 = vsel %vm1919_vm0, %v5454_v57, %v1891_v55 }
 0x629   : >> { %v1952_v29 = vsub.f32 %v1936_v33, %v5464_v19  ;;  %v1951_v15 = vsub.f32 %v1935_v20, %v5454_v57  ;;  %v5713_v23 = vsel %vm1854_vm4, %v1966_v34, -1e+30 }
 0x62a   : >> { %v1897_v46 = vpop.xlane.xlu0 %1896  ;;  %v1895_v41 = vpop.xlane.xlu1 %1894  ;;  %v5718_v33 = vsel %vm1853_vm5, %v1965_v9, -1e+30 }
 0x62b   : >> { %vm1922_vm14 = vcmp.ge.f32.partialorder %v1897_v46, 5e+29  ;;  %v1968_v22 = vadd.f32 0.005, %v1952_v29  ;;  %vm1921_vm1 = vcmp.ge.f32.partialorder %v1895_v41, 5e+29 }
 0x62c   : >> { %v1938_v26 = vsel %vm1922_vm14, %v5480_v53, %v1897_v46  ;;  %v1937_v55 = vsel %vm1921_vm1, %v5470_v62, %v1895_v41  ;;  %v1967_v20 = vadd.f32 0.005, %v1951_v15  ;;  %vm7637_vm1 = vcmp.le.f32.partialorder %v4668_v8, %v5534_v52 }
 0x62d   : >> { %v5723_v46 = vsel %vm1856_vm7, %v1968_v22, -1e+30  ;;  %v1953_v34 = vsub.f32 %v1937_v55, %v5470_v62 }
 0x62e   : >> { %v2083_v49 = vpop.xlane.xlu0 %2082  ;;  %v1899_v12 = vpop.xlane.xlu1 %1898 }
 0x62f   : >> { %vm2114_vm15 = vcmp.ge.f32.partialorder %v2083_v49, 5e+29  ;;  %vm1923_vm2 = vcmp.ge.f32.partialorder %v1899_v12, 5e+29  ;;  %v1969_v19 = vadd.f32 0.005, %v1953_v34 }
 0x630   : >> { %v2130_v18 = vsel %vm2114_vm15, %v5496_v35, %v2083_v49  ;;  %v1939_v41 = vsel %vm1923_vm2, %v5486_v60, %v1899_v12  ;;  %v1954_v49 = vsub.f32 %v1938_v26, %v5480_v53  ;;  %vm7636_vm2 = vcmp.le.f32.partialorder %v4676_v39, %v5518_v54 }
 0x631   : >> { %v2146_v32 = vsub.f32 %v2130_v18, %v5496_v35  ;;  %v1955_v12 = vsub.f32 %v1939_v41, %v5486_v60 }
 0x632   : >> { %v2087_v16 = vpop.xlane.xlu0 %2086  ;;  %v2085_v37 = vpop.xlane.xlu1 %2084  ;;  %v1970_v18 = vadd.f32 0.005, %v1954_v49 }
 0x633   : >> { %vm2116_vm12 = vcmp.ge.f32.partialorder %v2087_v16, 5e+29  ;;  %vm2115_vm13 = vcmp.ge.f32.partialorder %v2085_v37, 5e+29  ;;  %v2162_v15 = vadd.f32 0.005, %v2146_v32 }
 0x634   : >> { %v2132_v27 = vsel %vm2116_vm12, %v5512_v28, %v2087_v16  ;;  %v2131_v25 = vsel %vm2115_vm13, %v5502_v17, %v2085_v37  ;;  %vm7635_vm13 = vcmp.le.f32.partialorder %v4672_v45, %v5528_v5 }
 0x635   : >> { %v2148_v37 = vsub.f32 %v2132_v27, %v5512_v28  ;;  %v2147_v26 = vsub.f32 %v2131_v25, %v5502_v17  ;;  %v5745_v27 = vsel %vm1855_vm6, %v1967_v20, -1e+30  ;;  %v1971_v25 = vadd.f32 0.005, %v1955_v12 }
 0x636   : >> { %v2091_v61 = vpop.xlane.xlu0 %2090  ;;  %v2089_v36 = vpop.xlane.xlu1 %2088  ;;  %v1986_v20 = vsel %vm1858_vm9, %v1970_v18, -1e+30  ;;  %v5763_v12 = vsel %vm2050_vm11, %v2162_v15, -1e+30  ;;  %vm7632_vm9 = vcmp.le.f32.partialorder %v4728_v0, %v5486_v60  ;;  %vm7634_vm11 = vcmp.le.f32.partialorder %v4684_v4, %v5502_v17 }
 0x637   : >> { %vm2118_vm0 = vcmp.ge.f32.partialorder %v2091_v61, 5e+29  ;;  %vm2117_vm10 = vcmp.ge.f32.partialorder %v2089_v36, 5e+29  ;;  %v2164_v51 = vadd.f32 0.005, %v2148_v37  ;;  %v1998_v18 = vmax.f32 %v5713_v23, %v1986_v20 }
 0x638   : >> { %v2134_v9 = vsel %vm2118_vm0, %v5528_v5, %v2091_v61  ;;  %v2133_v10 = vsel %vm2117_vm10, %v5518_v54, %v2089_v36  ;;  %v5771_v62 = vsel %vm7632_vm9, %v1971_v25, -1e+30 }
 0x639   : >> { %v2150_v61 = vsub.f32 %v2134_v9, %v5528_v5  ;;  %v2149_v36 = vsub.f32 %v2133_v10, %v5518_v54  ;;  %v2163_v10 = vadd.f32 0.005, %v2147_v26 }
 0x63a   : >> { %v2095_v38 = vpop.xlane.xlu0 %2094  ;;  %v2093_v1 = vpop.xlane.xlu1 %2092 }
 0x63b   : >> { %vm2119_vm3 = vcmp.ge.f32.partialorder %v2093_v1, 5e+29  ;;  %vm2120_vm4 = vcmp.ge.f32.partialorder %v2095_v38, 5e+29  ;;  %v2166_v32 = vadd.f32 0.005, %v2150_v61 }
 0x63c   : >> { %v2135_v55 = vsel %vm2119_vm3, %v5534_v52, %v2093_v1  ;;  %v2136_v41 = vsel %vm2120_vm4, %v5544_v24, %v2095_v38  ;;  %v2165_v38 = vadd.f32 0.005, %v2149_v36  ;;  %vm7638_vm4 = vcmp.le.f32.partialorder %v4664_v7, %v5544_v24  ;;  %v7666_v7 = vld [vmem:[#allocation42_spill] sm:$0xff] }
 0x63d   : >> { %v2151_v1 = vsub.f32 %v2135_v55, %v5534_v52  ;;  %v2152_v40 = vsub.f32 %v2136_v41, %v5544_v24  ;;  %v5788_v60 = vsel %vm7635_vm13, %v2166_v32, -1e+30  ;;  %v7641_v32 = vld [vmem:[#allocation55_spill] sm:$0xff] }
 0x63e   : >> { %v1901_v29 = vpop.xlane.xlu0 %1900  ;;  %v2097_v31 = vpop.xlane.xlu1 %2096 }
 0x63f   : >> { %vm1924_vm5 = vcmp.ge.f32.partialorder %v1901_v29, 5e+29  ;;  %vm2121_vm12 = vcmp.ge.f32.partialorder %v2097_v31, 5e+29  ;;  %v2167_v37 = vadd.f32 0.005, %v2151_v1 }
 0x640   : >> { %v1940_v49 = vsel %vm1924_vm5, %v5560_v2, %v1901_v29  ;;  %v5758_v29 = vsel %vm1857_vm8, %v1969_v19, -1e+30  ;;  %v2137_v26 = vsel %vm2121_vm12, %v5550_v42, %v2097_v31  ;;  %vm7633_vm8 = vcmp.le.f32.partialorder %v4680_v47, %v5512_v28 }
 0x641   : >> { %v5776_v35 = vsel %vm7633_vm8, %v2164_v51, -1e+30  ;;  %v5781_v19 = vsel %vm7634_vm11, %v2163_v10, -1e+30  ;;  %v5793_v28 = vsel %vm7636_vm2, %v2165_v38, -1e+30  ;;  %v2153_v17 = vsub.f32 %v2137_v26, %v5550_v42 }
 0x642   : >> { %v1905_v22 = vpop.xlane.xlu0 %1904  ;;  %v1903_v16 = vpop.xlane.xlu1 %1902  ;;  %v2168_v51 = vadd.f32 0.005, %v2152_v40  ;;  %v1997_v23 = vmax.f32 %v5718_v33, %v5758_v29  ;;  %v5802_v5 = vsel %vm7637_vm1, %v2167_v37, -1e+30  ;;  %v1999_v40 = vmax.f32 %v5745_v27, %v5771_v62  ;;  %v7642_v29 = vld [vmem:[#allocation51_spill] sm:$0xff] }
 0x643   : >> { %vm1926_vm7 = vcmp.ge.f32.partialorder %v1905_v22, 5e+29  ;;  %vm1925_vm10 = vcmp.ge.f32.partialorder %v1903_v16, 5e+29  ;;  %vm7639_vm5 = vcmp.le.f32.partialorder %v4724_v13, %v5560_v2  ;;  %v2169_v10 = vadd.f32 0.005, %v2153_v17 }
 0x644   : >> { %v1942_v34 = vsel %vm1926_vm7, %v5576_v58, %v1905_v22  ;;  %v1941_v57 = vsel %vm1925_vm10, %v5566_v30, %v1903_v16  ;;  %v1956_v22 = vsub.f32 %v1940_v49, %v5560_v2  ;;  %v5809_v1 = vsel %vm7638_vm4, %v2168_v51, -1e+30 }
 0x645   : >> { %v1958_v16 = vsub.f32 %v1942_v34, %v5576_v58  ;;  %v1957_v31 = vsub.f32 %v1941_v57, %v5566_v30  ;;  %vm7640_vm7 = vcmp.le.f32.partialorder %v4716_v21, %v5576_v58  ;;  %vm7643_vm12 = vcmp.le.f32.partialorder %v7642_v29, %v5566_v30  ;;  %v7644_v58 = vld [vmem:[#allocation58_spill] sm:$0xff] }
 0x646   : >> { %v2099_v59 = vpop.xlane.xlu0 %2098  ;;  %v1907_v9 = vpop.xlane.xlu1 %1906  ;;  %v1972_v61 = vadd.f32 0.005, %v1956_v22  ;;  %v7647_v17 = vmax.f32 %v5704_v14, %v5723_v46  ;;  %v7652_v46 = vld [vmem:[#allocation60_spill] sm:$0xff] }
 0x647   : >> { %vm1927_vm6 = vcmp.ge.f32.partialorder %v1907_v9, 5e+29  ;;  %vm2122_vm14 = vcmp.ge.f32.partialorder %v2099_v59, 5e+29  ;;  %v1974_v15 = vadd.f32 0.005, %v1958_v16 }
 0x648   : >> { %v1943_v36 = vsel %vm1927_vm6, %v5582_v63, %v1907_v9  ;;  %v1973_v25 = vadd.f32 0.005, %v1957_v31  ;;  %v2138_v33 = vsel %vm2122_vm14, %v5592_v50, %v2099_v59  ;;  %v1988_v27 = vsel %vm7639_vm5, %v1972_v61, -1e+30  ;;  %v7646_v31 = vld [vmem:[#allocation56_spill] sm:$0xff]  ;;  %v7664_v9 = vld [vmem:[#allocation46_spill] sm:$0xff] }
 0x649   : >> { %v1959_v52 = vsub.f32 %v1943_v36, %v5582_v63  ;;  %v1990_v24 = vsel %vm7640_vm7, %v1974_v15, -1e+30  ;;  %v2154_v2 = vsub.f32 %v2138_v33, %v5592_v50  ;;  %v2000_v36 = vmax.f32 %v7647_v17, %v1988_v27  ;;  %v7648_v15 = vld [vmem:[#allocation43_spill] sm:$0xff]  ;;  %v7660_v17 = vld [vmem:[#allocation62_spill] sm:$0xff] }
 0x64a   : >> { %v2103_v53 = vpop.xlane.xlu0 %2102  ;;  %v2101_v55 = vpop.xlane.xlu1 %2100  ;;  %v1989_v22 = vsel %vm7643_vm12, %v1973_v25, -1e+30  ;;  %vm7649_vm8 = vcmp.le.f32.partialorder %v7648_v15, %v5550_v42  ;;  %v2002_v25 = vmax.f32 %v1998_v18, %v1990_v24  ;;  %v7653_v18 = vld [vmem:[#allocation59_spill] sm:$0xff] }
 0x64b   : >> { %vm2124_vm15 = vcmp.ge.f32.partialorder %v2103_v53, 5e+29  ;;  %vm2123_vm0 = vcmp.ge.f32.partialorder %v2101_v55, 5e+29  ;;  %v1975_v37 = vadd.f32 0.005, %v1959_v52  ;;  %vm7665_vm5 = vcmp.le.f32.partialorder %v7664_v9, %v7653_v18 }
 0x64c   : >> { %v2140_v34 = vsel %vm2124_vm15, %v5608_v6, %v2103_v53  ;;  %v2139_v59 = vsel %vm2123_vm0, %v7641_v32, %v2101_v55  ;;  %v7645_v53 = vld [vmem:[#allocation57_spill] sm:$0xff]  ;;  %v2170_v42 = vadd.f32 0.005, %v2154_v2  ;;  %v7658_v2 = vld [vmem:[#allocation47_spill] sm:$0xff] }
 0x64d   : >> { %v2156_v26 = vsub.f32 %v2140_v34, %v5608_v6  ;;  %v2155_v62 = vsub.f32 %v2139_v59, %v7641_v32  ;;  %v2001_v34 = vmax.f32 %v1997_v23, %v1989_v22  ;;  %v7656_v22 = vld [vmem:[#allocation48_spill] sm:$0xff]  ;;  %vm7659_vm15 = vcmp.le.f32.partialorder %v7658_v2, %v7644_v58 }
 0x64e   : >> { %v1909_v54 = vpop.xlane.xlu0 %1908  ;;  %v2105_v41 = vpop.xlane.xlu1 %2104  ;;  %vm7657_vm1 = vcmp.le.f32.partialorder %v7656_v22, %v7645_v53 }
 0x64f   : >> { %vm1928_vm3 = vcmp.ge.f32.partialorder %v1909_v54, 5e+29  ;;  %vm2125_vm10 = vcmp.ge.f32.partialorder %v2105_v41, 5e+29 }
 0x650   : >> { %v1944_v49 = vsel %vm1928_vm3, %v5624_v44, %v1909_v54  ;;  %v2141_v51 = vsel %vm2125_vm10, %v7646_v31, %v2105_v41  ;;  %v5842_v54 = vsel %vm7649_vm8, %v2169_v10, -1e+30  ;;  %v2172_v10 = vadd.f32 0.005, %v2156_v26 }
 0x651   : >> { %v1960_v38 = vsub.f32 %v1944_v49, %v5624_v44  ;;  %v2157_v14 = vsub.f32 %v2141_v51, %v7646_v31  ;;  %vm7667_vm10 = vcmp.le.f32.partialorder %v7666_v7, %v5592_v50  ;;  %v2194_v50 = vmax.f32 %v5763_v12, %v5788_v60 }
 0x652   : >> { %v1913_v57 = vpop.xlane.xlu0 %1912  ;;  %v1911_v20 = vpop.xlane.xlu1 %1910 }
 0x653   : >> { %vm1930_vm6 = vcmp.ge.f32.partialorder %v1913_v57, 5e+29  ;;  %vm1929_vm9 = vcmp.ge.f32.partialorder %v1911_v20, 5e+29  ;;  %v1976_v33 = vadd.f32 0.005, %v1960_v38 }
 0x654   : >> { %v1946_v16 = vsel %vm1930_vm6, %v7644_v58, %v1913_v57  ;;  %v1945_v55 = vsel %vm1929_vm9, %v7645_v53, %v1911_v20  ;;  %v7650_v57 = vld [vmem:[#allocation50_spill] sm:$0xff]  ;;  %v7654_v38 = vld [vmem:[#allocation49_spill] sm:$0xff] }
 0x655   : >> { %v1962_v61 = vsub.f32 %v1946_v16, %v7644_v58  ;;  %v1961_v30 = vsub.f32 %v1945_v55, %v7645_v53  ;;  %vm7651_vm13 = vcmp.le.f32.partialorder %v7650_v57, %v5582_v63  ;;  %v2171_v16 = vadd.f32 0.005, %v2155_v62 }
 0x656   : >> { %v2107_v52 = vpop.xlane.xlu0 %2106  ;;  %v1915_v49 = vpop.xlane.xlu1 %1914  ;;  %v1991_v20 = vsel %vm7651_vm13, %v1975_v37, -1e+30  ;;  %vm7655_vm14 = vcmp.le.f32.partialorder %v7654_v38, %v5624_v44  ;;  %v2173_v62 = vadd.f32 0.005, %v2157_v14 }
 0x657   : >> { %v1978_v59 = vadd.f32 0.005, %v1962_v61  ;;  %v1977_v41 = vadd.f32 0.005, %v1961_v30  ;;  %vm2126_vm11 = vcmp.ge.f32.partialorder %v2107_v52, 5e+29  ;;  %v2003_v30 = vmax.f32 %v1999_v40, %v1991_v20 }
 0x658   : >> { %v2142_v27 = vsel %vm2126_vm11, %v7652_v46, %v2107_v52  ;;  %vm1931_vm2 = vcmp.ge.f32.partialorder %v1915_v49, 5e+29  ;;  %v1992_v23 = vsel %vm7655_vm14, %v1976_v33, -1e+30  ;;  %v7661_v52 = vld [vmem:[#allocation61_spill] sm:$0xff] }
 0x659   : >> { %v1947_v24 = vsel %vm1931_vm2, %v7653_v18, %v1915_v49  ;;  %v1993_v55 = vsel %vm7657_vm1, %v1977_v41, -1e+30  ;;  %v2158_v63 = vsub.f32 %v2142_v27, %v7652_v46  ;;  %v1994_v26 = vsel %vm7659_vm15, %v1978_v59, -1e+30  ;;  %v7662_v49 = vld [vmem:[#allocation41_spill] sm:$0xff] }
 0x65a   : >> { %v1963_v37 = vsub.f32 %v1947_v24, %v7653_v18  ;;  %v2111_v51 = vpop.xlane.xlu0 %2110  ;;  %v2109_v61 = vpop.xlane.xlu1 %2108  ;;  %vm7663_vm4 = vcmp.le.f32.partialorder %v7662_v49, %v7641_v32  ;;  %v2005_v27 = vmax.f32 %v2001_v34, %v1993_v55  ;;  %v2004_v20 = vmax.f32 %v2000_v36, %v1992_v23  ;;  %v7668_v34 = vld [vmem:[#allocation40_spill] sm:$0xff]  ;;  %v7670_v36 = vld [vmem:[#allocation39_spill] sm:$0xff] }
 0x65b   : >> { %vm2128_vm0 = vcmp.ge.f32.partialorder %v2111_v51, 5e+29  ;;  %vm2127_vm3 = vcmp.ge.f32.partialorder %v2109_v61, 5e+29  ;;  %v2187_v41 = vsel %vm7663_vm4, %v2171_v16, -1e+30  ;;  %v2006_v58 = vmax.f32 %v2002_v25, %v1994_v26 }
 0x65c   : >> { %v1979_v44 = vadd.f32 0.005, %v1963_v37  ;;  %v2144_v33 = vsel %vm2128_vm0, %v7660_v17, %v2111_v51  ;;  %v2143_v53 = vsel %vm2127_vm3, %v7661_v52, %v2109_v61  ;;  %v2174_v59 = vadd.f32 0.005, %v2158_v63  ;;  %v7672_v23 = vld [vmem:[#allocation63_spill] sm:$0xff] }
 0x65d   : >> { %v2160_v24 = vsub.f32 %v2144_v33, %v7660_v17  ;;  %v2159_v40 = vsub.f32 %v2143_v53, %v7661_v52  ;;  %v2186_v32 = vsel %vm7667_vm10, %v2170_v42, -1e+30  ;;  %vm7669_vm12 = vcmp.le.f32.partialorder %v7668_v34, %v5608_v6  ;;  %v7678_v53 = vld [vmem:[#allocation36_spill] sm:$0xff] }
 0x65e   : >> { %v1995_v14 = vsel %vm7665_vm5, %v1979_v44, -1e+30  ;;  %v2113_v37 = vpop.xlane.xlu1 %2112  ;;  %v2188_v16 = vsel %vm7669_vm12, %v2172_v10, -1e+30  ;;  %vm7671_vm6 = vcmp.le.f32.partialorder %v7670_v36, %v7646_v31  ;;  %v2008_v55 = vmax.f32 %v2004_v20, %v2005_v27 }
 0x65f   : >> { %v2007_v51 = vmax.f32 %v2003_v30, %v1995_v14  ;;  %v2176_v15 = vadd.f32 0.005, %v2160_v24  ;;  %v2175_v61 = vadd.f32 0.005, %v2159_v40  ;;  %vm2129_vm7 = vcmp.ge.f32.partialorder %v2113_v37, 5e+29 }
 0x660   : >> { %v2189_v25 = vsel %vm7671_vm6, %v2173_v62, -1e+30  ;;  %v2145_v18 = vsel %vm2129_vm7, %v7672_v23, %v2113_v37  ;;  %v7673_v30 = vld [vmem:[#allocation37_spill] sm:$0xff]  ;;  %v2196_v6 = vmax.f32 %v5776_v35, %v5809_v1  ;;  %v2197_v31 = vmax.f32 %v5793_v28, %v5842_v54  ;;  %v7676_v62 = vld [vmem:[#allocation38_spill] sm:$0xff]  ;;  %v7680_v28 = vld [vmem:[#allocation35_spill] sm:$0xff] }
 0x661   : >> { %v2009_v63 = vmax.f32 %v2006_v58, %v2007_v51  ;;  %vm7674_vm9 = vcmp.le.f32.partialorder %v7673_v30, %v7661_v52  ;;  %v2161_v44 = vsub.f32 %v2145_v18, %v7672_v23  ;;  %v7675_v42 = vmax.f32 %v5781_v19, %v5802_v5  ;;  %v7683_v18 = vld [vmem:[#allocation54_spill] sm:$0xff] }
 0x662   : >> { %v2191_v26 = vsel %vm7674_vm9, %v2175_v61, -1e+30  ;;  %vm7677_vm8 = vcmp.le.f32.partialorder %v7676_v62, %v7652_v46  ;;  %vm7679_vm11 = vcmp.le.f32.partialorder %v7678_v53, %v7660_v17  ;;  %v2198_v60 = vmax.f32 %v2194_v50, %v2186_v32 }
 0x663   : >> { %v2199_v10 = vmax.f32 %v7675_v42, %v2187_v41  ;;  %v2190_v33 = vsel %vm7677_vm8, %v2174_v59, -1e+30  ;;  %v2010_v52 = vmax.f32 %v2008_v55, %v2009_v63  ;;  %v2192_v27 = vsel %vm7679_vm11, %v2176_v15, -1e+30  ;;  %v7685_v55 = vld [vmem:[#allocation53_spill] sm:$0xff] }
 0x664   : >> { %v2177_v12 = vadd.f32 0.005, %v2161_v44  ;;  %v2200_v24 = vmax.f32 %v2196_v6, %v2188_v16  ;;  %v2201_v35 = vmax.f32 %v2197_v31, %v2189_v25  ;;  %vm7681_vm13 = vcmp.le.f32.partialorder %v7680_v28, %v7672_v23 }
 0x665   : >> { %v2203_v1 = vmax.f32 %v2199_v10, %v2191_v26  ;;  %v2011_v40 = vrot.slane %v2010_v52, 4  ;;  %v2202_v5 = vmax.f32 %v2198_v60, %v2190_v33  ;;  %v7688_v26 = vld [vmem:[#allocation52_spill] sm:$0xff] }
 0x666   : >> { %v2193_v19 = vsel %vm7681_vm13, %v2177_v12, -1e+30  ;;  %v2204_v54 = vmax.f32 %v2200_v24, %v2192_v27 }
 0x667   : >> { %v2205_v41 = vmax.f32 %v2201_v35, %v2193_v19  ;;  %v2012_v46 = vmax.f32 %v2010_v52, %v2011_v40  ;;  %v2206_v20 = vmax.f32 %v2202_v5, %v2203_v1 }
 0x669   : >> { %v2207_v58 = vmax.f32 %v2204_v54, %v2205_v41  ;;  %v2013_v59 = vrot.slane %v2012_v46, 2 }
 0x66b   : >> { %v2208_v14 = vmax.f32 %v2206_v20, %v2207_v58  ;;  %v2014_v17 = vmax.f32 %v2012_v46, %v2013_v59 }
 0x66d   : >> { %v2209_v15 = vrot.slane %v2208_v14, 4  ;;  %v2015_v37 = vrot.slane %v2014_v17, 1 }
 0x66f   : >> { %v2210_v51 = vmax.f32 %v2208_v14, %v2209_v15  ;;  %v2016_v61 = vmax.f32 %v2014_v17, %v2015_v37 }
 0x671   : >> { %v2211_v32 = vrot.slane %v2210_v51, 2  ;;  %v2017_v16 = vmax.f32 %v2016_v61, 0.0 }
 0x673   : >> { %v2212_v25 = vmax.f32 %v2210_v51, %v2211_v32  ;;  %v5904_v43 = vadd.f32 %v4756_v43, %v2017_v16   ;;  %v5907_v40 = vadd.f32 %v7683_v18, %v2017_v16   ;;  %v5910_v51 = vadd.f32 %v7685_v55, %v2017_v16  }
 0x674   : >> { %v5913_v48 = vadd.f32 %v4744_v48, %v2017_v16   ;;  %v5916_v59 = vadd.f32 %v7688_v26, %v2017_v16   ;;  %v5919_v56 = vadd.f32 %v4736_v56, %v2017_v16   ;;  %v5922_v3 = vadd.f32 %v4732_v3, %v2017_v16  }
 0x675   : >> { %7682 = vst [vmem:[#allocation64_spill] sm:$0xff] %v5904_v43  ;;  %7684 = vst [vmem:[#allocation65_spill] sm:$0xff] %v5907_v40  ;;  %v5925_v0 = vadd.f32 %v4728_v0, %v2017_v16   ;;  %v5928_v13 = vadd.f32 %v4724_v13, %v2017_v16   ;;  %v5931_v43 = vadd.f32 %v7642_v29, %v2017_v16  }
 0x676   : >> { %7686 = vst [vmem:[#allocation66_spill] sm:$0xff] %v5910_v51  ;;  %7687 = vst [vmem:[#allocation67_spill] sm:$0xff] %v5913_v48  ;;  %v5934_v21 = vadd.f32 %v4716_v21, %v2017_v16   ;;  %v5937_v18 = vadd.f32 %v7650_v57, %v2017_v16   ;;  %v5943_v41 = vadd.f32 %v7656_v22, %v2017_v16   ;;  %v7722_v48 = vld [vmem:[#allocation44_spill] sm:$0xff] }
 0x677   : >> { %7689 = vst [vmem:[#allocation68_spill] sm:$0xff] %v5916_v59  ;;  %7690 = vst [vmem:[#allocation69_spill] sm:$0xff] %v5919_v56  ;;  %v5940_v56 = vadd.f32 %v7654_v38, %v2017_v16   ;;  %v5946_v46 = vadd.f32 %v7658_v2, %v2017_v16   ;;  %v5949_v38 = vadd.f32 %v7664_v9, %v2017_v16  }
 0x678   : >> { %7691 = vst [vmem:[#allocation70_spill] sm:$0xff] %v5922_v3  ;;  %7692 = vst [vmem:[#allocation71_spill] sm:$0xff] %v5925_v0  ;;  %v7696_v60 = vmov %v5934_v21  ;;  %v7698_v24 = vmov %v5937_v18  ;;  %v7702_v1 = vmov %v5943_v41  ;;  %v2213_v0 = vrot.slane %v2212_v25, 1 }
 0x679   : >> { %7693 = vst [vmem:[#allocation72_spill] sm:$0xff] %v5928_v13  ;;  %7694 = vst [vmem:[#allocation73_spill] sm:$0xff] %v5931_v43  ;;  %v7700_v35 = vmov %v5940_v56  ;;  %v7704_v19 = vmov %v5946_v46  ;;  %v7706_v5 = vmov %v5949_v38  ;;  %v7707_v13 = vld [vmem:[#allocation45_spill] sm:$0xff] }
 0x67a   : >> { %7695 = vst [vmem:[#allocation74_spill] sm:$0xff] %v5934_v21  ;;  %7697 = vst [vmem:[#allocation75_spill] sm:$0xff] %v5937_v18  ;;  %v5952_v16 = vadd.f32 %v7707_v13, %v2017_v16   ;;  %v2214_v21 = vmax.f32 %v2212_v25, %v2213_v0  ;;  %v7772_v18 = vmov %v7698_v24 }
 0x67b   : >> { %7699 = vst [vmem:[#allocation76_spill] sm:$0xff] %v5940_v56  ;;  %7701 = vst [vmem:[#allocation77_spill] sm:$0xff] %v5943_v41  ;;  %v7770_v41 = vmov %v7702_v1 }
 0x67c   : >> { %7703 = vst [vmem:[#allocation78_spill] sm:$0xff] %v5946_v46  ;;  %7705 = vst [vmem:[#allocation79_spill] sm:$0xff] %v5949_v38  ;;  %v2215_v3 = vmax.f32 %v2214_v21, 0.0  ;;  %v7725_v38 = vld [vmem:[#allocation43_spill] sm:$0xff]  ;;  %v7766_v29 = vmov %v5952_v16  ;;  %v7769_v46 = vmov %v7704_v19  ;;  %v7773_v21 = vmov %v7696_v60 }
 0x67d   : >> { %7708 = vst [vmem:[#allocation80_spill] sm:$0xff] %v5952_v16  ;;  %v7767_v16 = vmov %v7766_v29 }
 0x67e   : >> { %v5955_v11 = vadd.f32 %v4688_v11, %v2215_v3   ;;  %v5958_v4 = vadd.f32 %v4684_v4, %v2215_v3   ;;  %v5961_v47 = vadd.f32 %v4680_v47, %v2215_v3   ;;  %v5964_v39 = vadd.f32 %v4676_v39, %v2215_v3   ;;  %v7778_v56 = vld [vmem:[#allocation69_spill] sm:$0xff] }
 0x67f   : >> { %v5967_v45 = vadd.f32 %v4672_v45, %v2215_v3   ;;  %v5970_v8 = vadd.f32 %v4668_v8, %v2215_v3   ;;  %v5973_v9 = vadd.f32 %v7722_v48, %v2215_v3   ;;  %v5976_v61 = vadd.f32 %v7725_v38, %v2215_v3   ;;  %v7776_v0 = vld [vmem:[#allocation71_spill] sm:$0xff]  ;;  %v7790_v29 = vld [vmem:[#allocation70_spill] sm:$0xff] (%p6008_p4) }
 0x680   : >> { %7710 = vst [vmem:[#allocation81_spill] sm:$0xff] %v5955_v11  ;;  %v7711_v57 = vmov %v5955_v11  ;;  %7712 = vst [vmem:[#allocation82_spill] sm:$0xff] %v5958_v4  ;;  %v7713_v54 = vmov %v5958_v4  ;;  %v7715_v58 = vmov %v5961_v47  ;;  %v7717_v2 = vmov %v5964_v39  ;;  %v7775_v13 = vld [vmem:[#allocation72_spill] sm:$0xff]  ;;  %v7779_v48 = vld [vmem:[#allocation67_spill] sm:$0xff] }
 0x681   : >> { %7714 = vst [vmem:[#allocation83_spill] sm:$0xff] %v5961_v47  ;;  %7716 = vst [vmem:[#allocation84_spill] sm:$0xff] %v5964_v39  ;;  %v7719_v17 = vmov %v5967_v45  ;;  %v7721_v32 = vmov %v5970_v8  ;;  %v7724_v25 = vmov %v5973_v9  ;;  %v7727_v23 = vmov %v5976_v61 }
 0x682   : >> { %7718 = vst [vmem:[#allocation85_spill] sm:$0xff] %v5967_v45  ;;  %7720 = vst [vmem:[#allocation86_spill] sm:$0xff] %v5970_v8  ;;  %v5979_v26 = vadd.f32 %v7666_v7, %v2215_v3   ;;  %v5982_v15 = vadd.f32 %v7662_v49, %v2215_v3   ;;  %v5985_v22 = vadd.f32 %v7668_v34, %v2215_v3   ;;  %v7744_v45 = vld [vmem:[#allocation34_spill] sm:$0xff]  ;;  %v7759_v7 = vmov %v7724_v25  ;;  %v7782_v34 = vld [vmem:[#allocation66_spill] sm:$0xff] (%p6008_p4) }
 0x683   : >> { %7723 = vst [vmem:[#allocation87_spill] sm:$0xff] %v5973_v9  ;;  %7726 = vst [vmem:[#allocation88_spill] sm:$0xff] %v5976_v61  ;;  %v5988_v55 = vadd.f32 %v7670_v36, %v2215_v3   ;;  %v5991_v10 = vadd.f32 %v7676_v62, %v2215_v3   ;;  %v5994_v20 = vadd.f32 %v7673_v30, %v2215_v3   ;;  %v7758_v61 = vmov %v7727_v23  ;;  %v7783_v36 = vld [vmem:[#allocation64_spill] sm:$0xff] (%p6008_p4)  ;;  %v7785_v62 = vld [vmem:[#allocation67_spill] sm:$0xff] (%p6008_p4) }
 0x684   : >> { %7728 = vst [vmem:[#allocation89_spill] sm:$0xff] %v5979_v26  ;;  %v7729_v63 = vmov %v5979_v26  ;;  %7730 = vst [vmem:[#allocation90_spill] sm:$0xff] %v5982_v15  ;;  %v7731_v44 = vmov %v5982_v15  ;;  %v7733_v50 = vmov %v5985_v22  ;;  %v5997_v37 = vadd.f32 %v7678_v53, %v2215_v3   ;;  %2254 = vmin.xlane.f32.xlu1 (%p6008_p4), %v7782_v34  ;;  %2250 = vmin.xlane.f32.xlu0 (%p6008_p4), %v7783_v36  ;;  %v7786_v53 = vld [vmem:[#allocation65_spill] sm:$0xff] (%p6008_p4) }
 0x685   : >> { %7732 = vst [vmem:[#allocation91_spill] sm:$0xff] %v5985_v22  ;;  %7734 = vst [vmem:[#allocation92_spill] sm:$0xff] %v5988_v55  ;;  %v7735_v6 = vmov %v5988_v55  ;;  %v7737_v31 = vmov %v5991_v10  ;;  %v7739_v42 = vmov %v5994_v20  ;;  %v6000_v14 = vadd.f32 %v7680_v28, %v2215_v3   ;;  %1784 = sbr.rel (!%p6008_p4) target bundleno = 1281 (0x501), region = 135  ;;  %v7787_v28 = vld [vmem:[#allocation69_spill] sm:$0xff] (%p6008_p4) }
 0x686   : >> { %7736 = vst [vmem:[#allocation93_spill] sm:$0xff] %v5991_v10  ;;  %7738 = vst [vmem:[#allocation94_spill] sm:$0xff] %v5994_v20  ;;  %v7741_v33 = vmov %v5997_v37  ;;  %v6003_v12 = vadd.f32 %v7744_v45, %v2215_v3   ;;  %v7752_v20 = vmov %v7739_v42  ;;  %v7753_v10 = vmov %v7737_v31  ;;  %v7777_v3 = vld [vmem:[#allocation70_spill] sm:$0xff]  ;;  %v7791_v7 = vld [vmem:[#allocation73_spill] sm:$0xff] (%p6008_p4) }
 0x687   : >> { %7740 = vst [vmem:[#allocation95_spill] sm:$0xff] %v5997_v37  ;;  %7742 = vst [vmem:[#allocation96_spill] sm:$0xff] %v6000_v14  ;;  %v7743_v52 = vmov %v6000_v14  ;;  %v7751_v37 = vmov %v7741_v33  ;;  %v7754_v55 = vmov %v7735_v6  ;;  %v7755_v22 = vmov %v7733_v50 }
 0x688   : >> { %7745 = vst [vmem:[#allocation97_spill] sm:$0xff] %v6003_v12  ;;  %v7748_v27 = vmov %v6003_v12  ;;  %v7750_v14 = vmov %v7743_v52  ;;  %v7756_v15 = vmov %v7731_v44  ;;  %v7757_v26 = vmov %v7729_v63  ;;  %2256 = vmin.xlane.f32.xlu1 (%p6008_p4), %v7785_v62  ;;  %2252 = vmin.xlane.f32.xlu0 (%p6008_p4), %v7786_v53 }
 0x689   : >> { %v7749_v12 = vmov %v7748_v27  ;;  %v7760_v8 = vmov %v7721_v32  ;;  %v7761_v45 = vmov %v7719_v17  ;;  %v7762_v39 = vmov %v7717_v2  ;;  %v7789_v27 = vld [vmem:[#allocation71_spill] sm:$0xff] (%p6008_p4) }
 0x68a   : >> { %v7763_v47 = vmov %v7715_v58  ;;  %v7764_v4 = vmov %v7713_v54  ;;  %v7765_v11 = vmov %v7711_v57  ;;  %v7768_v38 = vmov %v7706_v5  ;;  %v7792_v39 = vld [vmem:[#allocation72_spill] sm:$0xff] (%p6008_p4) }
 0x68b   : >> { %v7771_v49 = vmov %v7700_v35  ;;  %v7774_v9 = vmov %v5931_v43  ;;  %v7780_v43 = vld [vmem:[#allocation64_spill] sm:$0xff]  ;;  %v7784_v30 = vmov (%p6008_p4), 0   ;;  %v2282_v47 = vlaneseq (%p6008_p4) }
 0x68c   : > { %4409 = vset.pattern.permute.xlu1 %v7784_v30  ;;  %4408 = vset.pattern.permute.xlu0 %v7784_v30  ;;  %v7788_v43 = vld [vmem:[#allocation68_spill] sm:$0xff] }
 0x68d   : > { %2260 = vmin.xlane.f32.xlu1 %v7787_v28  ;;  %2258 = vmin.xlane.f32.xlu0 %v7788_v43  ;;  %v6154_v8 = vand.u32 127, %v2282_v47 }
 0x68f   : > { %7793 = vst [vmem:[#allocation98_spill] sm:$0xff] %v6154_v8 }
 0x691   : > { %2264 = vmin.xlane.f32.xlu1 %v7789_v27  ;;  %2262 = vmin.xlane.f32.xlu0 %v7790_v29 }
 0x695   : > { %2268 = vmin.xlane.f32.xlu1 %v7791_v7  ;;  %2266 = vmin.xlane.f32.xlu0 %v7792_v39 }
 0x699   : > { %2272 = vmin.xlane.f32.xlu1 %v7698_v24  ;;  %2270 = vmin.xlane.f32.xlu0 %v7696_v60 }
 0x69d   : > { %2276 = vmin.xlane.f32.xlu1 %v7702_v1  ;;  %2274 = vmin.xlane.f32.xlu0 %v7700_v35 }
 0x6a1   : > { %2280 = vmin.xlane.f32.xlu1 %v7706_v5  ;;  %2278 = vmin.xlane.f32.xlu0 %v7704_v19 }
 0x6a5   : > { %2868 = vmin.xlane.f32.xlu1 %v7711_v57  ;;  %2890 = vmin.xlane.f32.xlu0 %v7735_v6 }
 0x6a9   : > { %2870 = vmin.xlane.f32.xlu1 %v7713_v54 }
 0x6ad   : > { %2872 = vmin.xlane.f32.xlu1 %v7715_v58 }
 0x6b1   : > { %2874 = vmin.xlane.f32.xlu1 %v7717_v2 }
 0x6b5   : > { %2876 = vmin.xlane.f32.xlu1 %v7719_v17 }
 0x6b9   : > { %2878 = vmin.xlane.f32.xlu1 %v7721_v32 }
 0x6bd   : > { %2880 = vmin.xlane.f32.xlu1 %v7724_v25 }
 0x6c1   : > { %2882 = vmin.xlane.f32.xlu1 %v7727_v23 }
 0x6c5   : > { %2884 = vmin.xlane.f32.xlu1 %v7729_v63 }
 0x6c9   : > { %2886 = vmin.xlane.f32.xlu1 %v7731_v44 }
 0x6cd   : > { %2888 = vmin.xlane.f32.xlu1 %v7733_v50 }
 0x6d1   : > { %2892 = vmin.xlane.f32.xlu1 %v7737_v31 }
 0x6d5   : > { %2894 = vmin.xlane.f32.xlu1 %v7739_v42 }
 0x6d9   : > { %2896 = vmin.xlane.f32.xlu1 %v7741_v33 }
 0x6dd   : > { %2898 = vmin.xlane.f32.xlu1 %v7743_v52 }
 0x711   : > { %v2255_v4 = vpop.xlane.xlu1 %2254  ;;  %v2251_v11 = vpop.xlane.xlu0 %2250 }
 0x712   : > { %vm2286_vm2 = vcmp.le.f32.partialorder %v7782_v34, %v2255_v4  ;;  %vm2284_vm14 = vcmp.le.f32.partialorder %v7783_v36, %v2251_v11 }
 0x713   : > { %v6159_v22 = vsel %vm2284_vm14, %v6154_v8, 128  ;;  %v6163_v10 = vsel %vm2286_vm2, %v6154_v8, 128 }
 0x714   : > { %v2317_v49 = vshra.s32 %v6159_v22, 16  ;;  %v2345_v59 = vshra.s32 %v6163_v10, 16 }
 0x715   : > { %v2257_v12 = vpop.xlane.xlu1 %2256  ;;  %v2253_v40 = vpop.xlane.xlu0 %2252 }
 0x716   : > { %vm2287_vm1 = vcmp.le.f32.partialorder %v7785_v62, %v2257_v12  ;;  %vm2285_vm15 = vcmp.le.f32.partialorder %v7786_v53, %v2253_v40  ;;  %v6167_v41 = vcvt.s32.f32 %v2317_v49  ;;  %v6182_v61 = vcvt.s32.f32 %v2345_v59 }
 0x717   : > { %v6170_v46 = vsel %vm2285_vm15, %v6154_v8, 128  ;;  %v6176_v14 = vsel %vm2287_vm1, %v6154_v8, 128 }
 0x718   : > { %2320 = vmin.xlane.f32.xlu0 %v6167_v41  ;;  %v2331_v20 = vshra.s32 %v6170_v46, 16  ;;  %v2359_v16 = vshra.s32 %v6176_v14, 16 }
 0x71a   : > { %v2261_v15 = vpop.xlane.xlu1 %2260  ;;  %v2259_v37 = vpop.xlane.xlu0 %2258  ;;  %v6178_v51 = vcvt.s32.f32 %v2331_v20  ;;  %v6190_v56 = vcvt.s32.f32 %v2359_v16 }
 0x71b   : > { %vm2288_vm0 = vcmp.le.f32.partialorder %v7788_v43, %v2259_v37  ;;  %vm2289_vm3 = vcmp.le.f32.partialorder %v7787_v28, %v2261_v15 }
 0x71c   : > { %2334 = vmin.xlane.f32.xlu0 %v6178_v51  ;;  %v6186_v55 = vsel %vm2288_vm0, %v6154_v8, 128  ;;  %v6194_v0 = vsel %vm2289_vm3, %v6154_v8, 128 }
 0x71d   : > { %v2373_v13 = vshra.s32 %v6186_v55, 16  ;;  %v2387_v9 = vshra.s32 %v6194_v0, 16 }
 0x71e   : > { %v2265_v18 = vpop.xlane.xlu1 %2264  ;;  %v2263_v26 = vpop.xlane.xlu0 %2262 }
 0x71f   : > { %vm2290_vm4 = vcmp.le.f32.partialorder %v7790_v29, %v2263_v26  ;;  %v6198_v48 = vcvt.s32.f32 %v2373_v13  ;;  %vm2291_vm5 = vcmp.le.f32.partialorder %v7789_v27, %v2265_v18  ;;  %v6206_v47 = vcvt.s32.f32 %v2387_v9 }
 0x720   : > { %2348 = vmin.xlane.f32.xlu0 %v6182_v61  ;;  %v6202_v45 = vsel %vm2290_vm4, %v6154_v8, 128  ;;  %v6210_v11 = vsel %vm2291_vm5, %v6154_v8, 128 }
 0x721   : > { %v2401_v4 = vshra.s32 %v6202_v45, 16  ;;  %v2415_v20 = vshra.s32 %v6210_v11, 16 }
 0x722   : > { %v2269_v21 = vpop.xlane.xlu1 %2268  ;;  %v2267_v3 = vpop.xlane.xlu0 %2266 }
 0x723   : > { %vm2292_vm7 = vcmp.le.f32.partialorder %v7792_v39, %v2267_v3  ;;  %v6214_v40 = vcvt.s32.f32 %v2401_v4  ;;  %vm2293_vm10 = vcmp.le.f32.partialorder %v7791_v7, %v2269_v21  ;;  %v6222_v16 = vcvt.s32.f32 %v2415_v20 }
 0x724   : > { %2362 = vmin.xlane.f32.xlu0 %v6190_v56  ;;  %v6218_v59 = vsel %vm2292_vm7, %v6154_v8, 128  ;;  %v6226_v26 = vsel %vm2293_vm10, %v6154_v8, 128 }
 0x725   : > { %v2429_v18 = vshra.s32 %v6218_v59, 16  ;;  %v2443_v21 = vshra.s32 %v6226_v26, 16 }
 0x726   : > { %v2273_v38 = vpop.xlane.xlu1 %2272  ;;  %v2271_v30 = vpop.xlane.xlu0 %2270 }
 0x727   : > { %vm2294_vm12 = vcmp.le.f32.partialorder %v7696_v60, %v2271_v30  ;;  %v6231_v9 = vcvt.s32.f32 %v2429_v18  ;;  %vm2295_vm9 = vcmp.le.f32.partialorder %v7698_v24, %v2273_v38 }
 0x728   : > { %2376 = vmin.xlane.f32.xlu0 %v6198_v48  ;;  %v6235_v4 = vsel %vm2294_vm12, %v6154_v8, 128  ;;  %v6252_v7 = vsel %vm2295_vm9, %v6154_v8, 128 }
 0x729   : > { %v2457_v60 = vshra.s32 %v6235_v4, 16  ;;  %v2471_v24 = vshra.s32 %v6252_v7, 16 }
 0x72a   : > { %v2277_v49 = vpop.xlane.xlu1 %2276  ;;  %v2275_v12 = vpop.xlane.xlu0 %2274 }
 0x72b   : > { %vm2296_vm11 = vcmp.le.f32.partialorder %v7700_v35, %v2275_v12  ;;  %vm2297_vm13 = vcmp.le.f32.partialorder %v7702_v1, %v2277_v49  ;;  %v6270_v12 = vcvt.s32.f32 %v2471_v24 }
 0x72c   : > { %2390 = vmin.xlane.f32.xlu0 %v6206_v47  ;;  %v6265_v29 = vsel %vm2296_vm11, %v6154_v8, 128 }
 0x72e   : > { %v2281_v15 = vpop.xlane.xlu1 %2280  ;;  %v2279_v37 = vpop.xlane.xlu0 %2278 }
 0x72f   : > { %vm2298_vm2 = vcmp.le.f32.partialorder %v7704_v19, %v2279_v37  ;;  %vm2299_vm14 = vcmp.le.f32.partialorder %v7706_v5, %v2281_v15 }
 0x730   : > { %2404 = vmin.xlane.f32.xlu0 %v6214_v40  ;;  %v6282_v1 = vsel %vm2298_vm2, %v6154_v8, 128  ;;  %v6290_v37 = vsel %vm2299_vm14, %v6154_v8, 128 }
 0x731   : > { %v2513_v62 = vshra.s32 %v6282_v1, 16  ;;  %v2527_v15 = vshra.s32 %v6290_v37, 16 }
 0x732   : > { %v2869_v13 = vpop.xlane.xlu1 %2868  ;;  %v2891_v3 = vpop.xlane.xlu0 %2890 }
 0x733   : > { %vm2911_vm6 = vcmp.le.f32.partialorder %v7735_v6, %v2891_v3  ;;  %v6247_v3 = vcvt.s32.f32 %v2443_v21  ;;  %v6261_v21 = vcvt.s32.f32 %v2457_v60  ;;  %vm2900_vm1 = vcmp.le.f32.partialorder %v7711_v57, %v2869_v13 }
 0x734   : > { %2418 = vmin.xlane.f32.xlu0 %v6222_v16  ;;  %v6238_v39 = vsel %vm2911_vm6, %v6154_v8, 128  ;;  %v6306_v13 = vcvt.s32.f32 %v2527_v15 }
 0x735   : > { %7794 = vst [vmem:[#allocation99_spill] sm:$0xff] %v6238_v39  ;;  %v3087_v6 = vshra.s32 %v6238_v39, 16 }
 0x736   : > { %v2871_v20 = vpop.xlane.xlu1 %2870 }
 0x737   : > { %vm2901_vm8 = vcmp.le.f32.partialorder %v7713_v54, %v2871_v20  ;;  %v6259_v20 = vcvt.s32.f32 %v3087_v6  ;;  %v6274_v6 = vsel %vm2297_vm13, %v6154_v8, 128 }
 0x738   : > { %v6243_v30 = vsel %vm2901_vm8, %v6154_v8, 128  ;;  %2432 = vmin.xlane.f32.xlu0 %v6231_v9  ;;  %v2499_v49 = vshra.s32 %v6274_v6, 16 }
 0x739   : > { %v2947_v18 = vshra.s32 %v6243_v30, 16  ;;  %7795 = vst [vmem:[#allocation100_spill] sm:$0xff] %v6259_v20 }
 0x73a   : > { %v2873_v27 = vpop.xlane.xlu1 %2872  ;;  %v6286_v24 = vcvt.s32.f32 %v2499_v49  ;;  %v6299_v49 = vsel %vm2900_vm1, %v6154_v8, 128 }
 0x73b   : > { %v6255_v38 = vcvt.s32.f32 %v2947_v18  ;;  %v2485_v18 = vshra.s32 %v6265_v29, 16  ;;  %vm2902_vm15 = vcmp.le.f32.partialorder %v7715_v58, %v2873_v27 }
 0x73c   : > { %2446 = vmin.xlane.f32.xlu0 %v6247_v3  ;;  %v6303_v5 = vsel %vm2902_vm15, %v6154_v8, 128 }
 0x73d   : > { %2950 = vmin.xlane.f32.xlu1 %v6255_v38  ;;  %v6278_v35 = vcvt.s32.f32 %v2485_v18  ;;  %v6294_v18 = vcvt.s32.f32 %v2513_v62  ;;  %v2933_v62 = vshra.s32 %v6299_v49, 16  ;;  %v2961_v27 = vshra.s32 %v6303_v5, 16 }
 0x73e   : > { %v2875_v28 = vpop.xlane.xlu1 %2874 }
 0x73f   : > { %vm2903_vm0 = vcmp.le.f32.partialorder %v7717_v2, %v2875_v28  ;;  %v6315_v53 = vcvt.s32.f32 %v2933_v62  ;;  %v6318_v36 = vcvt.s32.f32 %v2961_v27 }
 0x740   : > { %2460 = vmin.xlane.f32.xlu0 %v6261_v21  ;;  %v6312_v58 = vsel %vm2903_vm0, %v6154_v8, 128 }
 0x741   : > { %3090 = vmin.xlane.f32.xlu1 %v6259_v20  ;;  %v2975_v28 = vshra.s32 %v6312_v58, 16 }
 0x742   : > { %v2877_v60 = vpop.xlane.xlu1 %2876 }
 0x743   : > { %vm2904_vm3 = vcmp.le.f32.partialorder %v7719_v17, %v2877_v60  ;;  %v6326_v20 = vcvt.s32.f32 %v2975_v28 }
 0x744   : > { %2474 = vmin.xlane.f32.xlu0 %v6270_v12  ;;  %v6322_v15 = vsel %vm2904_vm3, %v6154_v8, 128 }
 0x745   : > { %7796 = vst [vmem:[#allocation101_spill] sm:$0xff] %v6326_v20  ;;  %v2989_v60 = vshra.s32 %v6322_v15, 16 }
 0x746   : > { %v2879_v43 = vpop.xlane.xlu1 %2878 }
 0x747   : > { %vm2905_vm4 = vcmp.le.f32.partialorder %v7721_v32, %v2879_v43  ;;  %v6334_v27 = vcvt.s32.f32 %v2989_v60 }
 0x748   : > { %2488 = vmin.xlane.f32.xlu0 %v6278_v35  ;;  %v6330_v62 = vsel %vm2905_vm4, %v6154_v8, 128 }
 0x749   : > { %7797 = vst [vmem:[#allocation102_spill] sm:$0xff] %v6330_v62  ;;  %v3003_v39 = vshra.s32 %v6330_v62, 16 }
 0x74a   : > { %v2881_v54 = vpop.xlane.xlu1 %2880 }
 0x74b   : > { %vm2906_vm5 = vcmp.le.f32.partialorder %v7724_v25, %v2881_v54  ;;  %v6347_v25 = vcvt.s32.f32 %v3003_v39 }
 0x74c   : > { %2502 = vmin.xlane.f32.xlu0 %v6286_v24  ;;  %v6338_v43 = vsel %vm2906_vm5, %v6154_v8, 128 }
 0x74d   : > { %v3017_v60 = vshra.s32 %v6338_v43, 16 }
 0x74e   : > { %v2883_v19 = vpop.xlane.xlu1 %2882 }
 0x74f   : > { %vm2907_vm7 = vcmp.le.f32.partialorder %v7727_v23, %v2883_v19 }
 0x750   : > { %2516 = vmin.xlane.f32.xlu0 %v6294_v18  ;;  %v6351_v62 = vsel %vm2907_vm7, %v6154_v8, 128 }
 0x752   : > { %v2885_v34 = vpop.xlane.xlu1 %2884 }
 0x753   : > { %vm2908_vm12 = vcmp.le.f32.partialorder %v7729_v63, %v2885_v34 }
 0x754   : > { %2530 = vmin.xlane.f32.xlu0 %v6306_v13  ;;  %v6362_v39 = vsel %vm2908_vm12, %v6154_v8, 128 }
 0x756   : > { %v2887_v57 = vpop.xlane.xlu1 %2886 }
 0x757   : > { %vm2909_vm6 = vcmp.le.f32.partialorder %v7731_v44, %v2887_v57 }
 0x758   : > { %2936 = vmin.xlane.f32.xlu0 %v6315_v53 }
 0x75a   : > { %v2889_v2 = vpop.xlane.xlu1 %2888 }
 0x75b   : > { %vm2910_vm8 = vcmp.le.f32.partialorder %v7733_v50, %v2889_v2 }
 0x75c   : > { %2964 = vmin.xlane.f32.xlu0 %v6318_v36 }
 0x75e   : > { %v2893_v17 = vpop.xlane.xlu1 %2892 }
 0x75f   : > { %vm2912_vm11 = vcmp.le.f32.partialorder %v7737_v31, %v2893_v17 }
 0x760   : > { %2978 = vmin.xlane.f32.xlu0 %v6326_v20 }
 0x762   : > { %v2895_v32 = vpop.xlane.xlu1 %2894 }
 0x763   : > { %vm2913_vm10 = vcmp.le.f32.partialorder %v7739_v42, %v2895_v32  ;;  %v6358_v32 = vcvt.s32.f32 %v3017_v60  ;;  %v3031_v42 = vshra.s32 %v6351_v62, 16  ;;  %v3045_v60 = vshra.s32 %v6362_v39, 16 }
 0x764   : > { %v6343_v28 = vsel %vm2913_vm10, %v6154_v8, 128  ;;  %2992 = vmin.xlane.f32.xlu0 %v6334_v27 }
 0x765   : > { %7798 = vst [vmem:[#allocation103_spill] sm:$0xff] %v6343_v28  ;;  %v3115_v54 = vshra.s32 %v6343_v28, 16  ;;  %v6371_v63 = vcvt.s32.f32 %v3031_v42  ;;  %v6386_v42 = vsel %vm2910_vm8, %v6154_v8, 128 }
 0x766   : > { %v2897_v20 = vpop.xlane.xlu1 %2896  ;;  %v3073_v2 = vshra.s32 %v6386_v42, 16 }
 0x767   : > { %v6354_v19 = vcvt.s32.f32 %v3115_v54  ;;  %vm2914_vm13 = vcmp.le.f32.partialorder %v7741_v33, %v2897_v20  ;;  %v2316_v20 = vand.u32 65535, %v6159_v22 }
 0x768   : > { %3006 = vmin.xlane.f32.xlu0 %v6347_v25  ;;  %v6402_v44 = vsel %vm2914_vm13, %v6154_v8, 128 }
 0x769   : > { %7799 = vst [vmem:[#allocation104_spill] sm:$0xff] %v6354_v19  ;;  %3118 = vmin.xlane.f32.xlu1 %v6354_v19  ;;  %v6375_v19 = vsel %vm2909_vm6, %v6154_v8, 128  ;;  %v2318_v33 = vcvt.s32.f32 %v2316_v20 }
 0x76a   : > { %v2899_v23 = vpop.xlane.xlu1 %2898  ;;  %v3059_v57 = vshra.s32 %v6375_v19, 16 }
 0x76b   : > { %vm2915_vm9 = vcmp.le.f32.partialorder %v7743_v52, %v2899_v23  ;;  %v6382_v23 = vcvt.s32.f32 %v3045_v60  ;;  %v6398_v60 = vcvt.s32.f32 %v3073_v2 }
 0x76c   : > { %v6367_v34 = vsel %vm2915_vm9, %v6154_v8, 128  ;;  %3020 = vmin.xlane.f32.xlu0 %v6358_v32  ;;  %v6390_v52 = vcvt.s32.f32 %v3059_v57  ;;  %v3129_v57 = vshra.s32 %v6402_v44, 16 }
 0x76d   : > { %7800 = vst [vmem:[#allocation105_spill] sm:$0xff] %v6367_v34  ;;  %v3143_v54 = vshra.s32 %v6367_v34, 16 }
 0x76e   : > { %v6409_v31 = vcvt.s32.f32 %v3129_v57  ;;  %v2344_v57 = vand.u32 65535, %v6163_v10  ;;  %v2372_v10 = vand.u32 65535, %v6186_v55  ;;  %v2400_v55 = vand.u32 65535, %v6202_v45 }
 0x76f   : > { %v6378_v28 = vcvt.s32.f32 %v3143_v54  ;;  %v6394_v54 = vsel %vm2912_vm11, %v6154_v8, 128  ;;  %v2330_v8 = vand.u32 65535, %v6170_v46  ;;  %v2358_v46 = vand.u32 65535, %v6176_v14 }
 0x770   : > { %3034 = vmin.xlane.f32.xlu0 %v6371_v63  ;;  %v3101_v50 = vshra.s32 %v6394_v54, 16  ;;  %7802 = vst [vmem:[#allocation107_spill] sm:$0xff] %v6409_v31  ;;  %v2346_v20 = vcvt.s32.f32 %v2344_v57  ;;  %v2386_v14 = vand.u32 65535, %v6194_v0  ;;  %v2414_v0 = vand.u32 65535, %v6210_v11 }
 0x771   : > { %7801 = vst [vmem:[#allocation106_spill] sm:$0xff] %v6378_v28  ;;  %3146 = vmin.xlane.f32.xlu1 %v6378_v28  ;;  %v2332_v34 = vcvt.s32.f32 %v2330_v8  ;;  %v2360_v8 = vcvt.s32.f32 %v2358_v46  ;;  %v2402_v46 = vcvt.s32.f32 %v2400_v55  ;;  %v2428_v45 = vand.u32 65535, %v6218_v59 }
 0x772   : > { %v6405_v17 = vcvt.s32.f32 %v3101_v50  ;;  %v2388_v57 = vcvt.s32.f32 %v2386_v14  ;;  %v2946_v11 = vand.u32 65535, %v6243_v30 }
 0x774   : > { %3048 = vmin.xlane.f32.xlu0 %v6382_v23 }
 0x778   : > { %3062 = vmin.xlane.f32.xlu0 %v6390_v52 }
 0x77c   : > { %3076 = vmin.xlane.f32.xlu0 %v6398_v60 }
 0x780   : > { %3104 = vmin.xlane.f32.xlu0 %v6405_v17 }
 0x784   : > { %3132 = vmin.xlane.f32.xlu0 %v6409_v31 }
 0x7a5   : > { %v6413_v2 = vpop.xlane.xlu0 %2320 }
 0x7a6   : > { %vm2322_vm2 = vcmp.eq.f32.partialorder %v6167_v41, %v6413_v2 }
 0x7a7   : > { %v2323_v50 = vsel %vm2322_vm2, %v2318_v33, inf }
 0x7a8   : > { %2324 = vmin.xlane.f32.xlu1 %v2323_v50 }
 0x7a9   : > { %v6418_v28 = vpop.xlane.xlu0 %2334 }
 0x7aa   : > { %vm2336_vm14 = vcmp.eq.f32.partialorder %v6178_v51, %v6418_v28 }
 0x7ab   : > { %v2337_v31 = vsel %vm2336_vm14, %v2332_v34, inf  ;;  %v2374_v34 = vcvt.s32.f32 %v2372_v10 }
 0x7ac   : > { %2338 = vmin.xlane.f32.xlu1 %v2337_v31 }
 0x7ad   : > { %v6423_v22 = vpop.xlane.xlu0 %2348 }
 0x7ae   : > { %vm2350_vm1 = vcmp.eq.f32.partialorder %v6182_v61, %v6423_v22 }
 0x7af   : > { %v2351_v33 = vsel %vm2350_vm1, %v2346_v20, inf }
 0x7b0   : > { %2352 = vmin.xlane.f32.xlu1 %v2351_v33 }
 0x7b1   : > { %v6428_v41 = vpop.xlane.xlu0 %2362 }
 0x7b2   : > { %vm2364_vm15 = vcmp.eq.f32.partialorder %v6190_v56, %v6428_v41 }
 0x7b3   : > { %v2365_v51 = vsel %vm2364_vm15, %v2360_v8, inf  ;;  %v2416_v8 = vcvt.s32.f32 %v2414_v0  ;;  %v2484_v0 = vand.u32 65535, %v6265_v29  ;;  %v2512_v29 = vand.u32 65535, %v6282_v1 }
 0x7b4   : > { %2366 = vmin.xlane.f32.xlu1 %v2365_v51  ;;  %v2430_v51 = vcvt.s32.f32 %v2428_v45  ;;  %v2932_v1 = vand.u32 65535, %v6299_v49  ;;  %v2974_v49 = vand.u32 65535, %v6312_v58 }
 0x7b5   : > { %v6433_v31 = vpop.xlane.xlu0 %2376 }
 0x7b6   : > { %vm2378_vm0 = vcmp.eq.f32.partialorder %v6198_v48, %v6433_v31 }
 0x7b7   : > { %v2379_v61 = vsel %vm2378_vm0, %v2374_v34, inf  ;;  %v2442_v34 = vand.u32 65535, %v6226_v26 }
 0x7b8   : > { %2380 = vmin.xlane.f32.xlu1 %v2379_v61  ;;  %v2948_v61 = vcvt.s32.f32 %v2946_v11  ;;  %v2514_v11 = vcvt.s32.f32 %v2512_v29  ;;  %v3030_v29 = vand.u32 65535, %v6351_v62  ;;  %v3058_v62 = vand.u32 65535, %v6375_v19 }
 0x7b9   : > { %v6438_v50 = vpop.xlane.xlu0 %2390 }
 0x7ba   : > { %vm2392_vm3 = vcmp.eq.f32.partialorder %v6206_v47, %v6438_v50 }
 0x7bb   : > { %v2393_v56 = vsel %vm2392_vm3, %v2388_v57, inf  ;;  %v2456_v57 = vand.u32 65535, %v6235_v4 }
 0x7bc   : > { %2394 = vmin.xlane.f32.xlu1 %v2393_v56  ;;  %v2470_v56 = vand.u32 65535, %v6252_v7  ;;  %v2498_v7 = vand.u32 65535, %v6274_v6  ;;  %v2526_v6 = vand.u32 65535, %v6290_v37  ;;  %v2960_v37 = vand.u32 65535, %v6303_v5 }
 0x7bd   : > { %v6443_v20 = vpop.xlane.xlu0 %2404  ;;  %v2458_v55 = vcvt.s32.f32 %v2456_v57  ;;  %v2988_v5 = vand.u32 65535, %v6322_v15  ;;  %v3016_v15 = vand.u32 65535, %v6338_v43  ;;  %v3044_v43 = vand.u32 65535, %v6362_v39 }
 0x7be   : > { %vm2406_vm4 = vcmp.eq.f32.partialorder %v6214_v40, %v6443_v20  ;;  %v3072_v39 = vand.u32 65535, %v6386_v42  ;;  %v7811_v42 = vld [vmem:[#allocation5_spill] sm:$0xff] }
 0x7bf   : > { %v2407_v48 = vsel %vm2406_vm4, %v2402_v46, inf }
 0x7c0   : > { %2408 = vmin.xlane.f32.xlu1 %v2407_v48 }
 0x7c1   : > { %v6448_v33 = vpop.xlane.xlu0 %2418 }
 0x7c2   : > { %vm2420_vm5 = vcmp.eq.f32.partialorder %v6222_v16, %v6448_v33  ;;  %v2444_v16 = vcvt.s32.f32 %v2442_v34 }
 0x7c3   : > { %v2421_v47 = vsel %vm2420_vm5, %v2416_v8, inf  ;;  %v2486_v8 = vcvt.s32.f32 %v2484_v0  ;;  %v7807_v0 = vld [vmem:[#allocation102_spill] sm:$0xff] }
 0x7c4   : > { %2422 = vmin.xlane.f32.xlu1 %v2421_v47  ;;  %v2500_v47 = vcvt.s32.f32 %v2498_v7  ;;  %v3002_v58 = vand.u32 65535, %v7807_v0  ;;  %v7822_v0 = vld [vmem:[#allocation6_spill] sm:$0xff] }
 0x7c5   : > { %v6453_v10 = vpop.xlane.xlu0 %2432 }
 0x7c6   : > { %vm2434_vm7 = vcmp.eq.f32.partialorder %v6231_v9, %v6453_v10 }
 0x7c7   : > { %v2435_v40 = vsel %vm2434_vm7, %v2430_v51, inf }
 0x7c8   : > { %2436 = vmin.xlane.f32.xlu1 %v2435_v40  ;;  %v2528_v40 = vcvt.s32.f32 %v2526_v6 }
 0x7c9   : > { %v6461_v59 = vpop.xlane.xlu0 %2446 }
 0x7ca   : > { %v6459_v14 = vpop.xlane.xlu1 %2950  ;;  %vm2448_vm12 = vcmp.eq.f32.partialorder %v6247_v3, %v6461_v59 }
 0x7cb   : > { %vm2952_vm10 = vcmp.eq.f32.partialorder %v6255_v38, %v6459_v14  ;;  %v2449_v30 = vsel %vm2448_vm12, %v2444_v16, inf  ;;  %v2472_v38 = vcvt.s32.f32 %v2470_v56  ;;  %v2934_v16 = vcvt.s32.f32 %v2932_v1  ;;  %v7806_v56 = vld [vmem:[#allocation101_spill] sm:$0xff] }
 0x7cc   : > { %v2953_v26 = vsel %vm2952_vm10, %v2948_v61, inf  ;;  %2450 = vmin.xlane.f32.xlu1 %v2449_v30  ;;  %v3060_v1 = vcvt.s32.f32 %v3058_v62  ;;  %v7831_v62 = vld [vmem:[#allocation14_spill] sm:$0xff] }
 0x7cd   : > { %2954 = vmin.xlane.f32.xlu0 %v2953_v26  ;;  %v6468_v9 = vpop.xlane.xlu0 %2460  ;;  %v2962_v26 = vcvt.s32.f32 %v2960_v37  ;;  %v7809_v37 = vld [vmem:[#allocation3_spill] sm:$0xff] }
 0x7ce   : > { %vm2462_vm6 = vcmp.eq.f32.partialorder %v6261_v21, %v6468_v9 }
 0x7cf   : > { %v2463_v46 = vsel %vm2462_vm6, %v2458_v55, inf  ;;  %v2976_v55 = vcvt.s32.f32 %v2974_v49  ;;  %v6553_v49 = vpop.xlane.xlu1 %3090 }
 0x7d0   : > { %2464 = vmin.xlane.f32.xlu1 %v2463_v46  ;;  %7814 = vst [vmem:[#allocation101_spill] sm:$0xff] %v6553_v49 }
 0x7d1   : > { %v6473_v4 = vpop.xlane.xlu0 %2474 }
 0x7d2   : > { %vm2476_vm9 = vcmp.eq.f32.partialorder %v6270_v12, %v6473_v4 }
 0x7d3   : > { %v2477_v3 = vsel %vm2476_vm9, %v2472_v38, inf  ;;  %v2990_v38 = vcvt.s32.f32 %v2988_v5  ;;  %v7818_v5 = vld [vmem:[#allocation7_spill] sm:$0xff] }
 0x7d4   : > { %2478 = vmin.xlane.f32.xlu1 %v2477_v3 }
 0x7d5   : > { %v6478_v48 = vpop.xlane.xlu0 %2488 }
 0x7d6   : > { %vm2490_vm8 = vcmp.eq.f32.partialorder %v6278_v35, %v6478_v48 }
 0x7d7   : > { %v2491_v21 = vsel %vm2490_vm8, %v2486_v8, inf  ;;  %v3004_v8 = vcvt.s32.f32 %v3002_v58  ;;  %v7823_v58 = vld [vmem:[#allocation8_spill] sm:$0xff] }
 0x7d8   : > { %2492 = vmin.xlane.f32.xlu1 %v2491_v21 }
 0x7d9   : > { %v6483_v45 = vpop.xlane.xlu0 %2502 }
 0x7da   : > { %7803 = vst [vmem:[#allocation108_spill] sm:$0xff] %v6483_v45  ;;  %vm2504_vm11 = vcmp.eq.f32.partialorder %v6286_v24, %v6483_v45 }
 0x7db   : > { %v2505_v12 = vsel %vm2504_vm11, %v2500_v47, inf  ;;  %v3018_v47 = vcvt.s32.f32 %v3016_v15  ;;  %v7825_v15 = vld [vmem:[#allocation10_spill] sm:$0xff] }
 0x7dc   : > { %2506 = vmin.xlane.f32.xlu1 %v2505_v12 }
 0x7dd   : > { %v6488_v51 = vpop.xlane.xlu0 %2516 }
 0x7de   : > { %7804 = vst [vmem:[#allocation109_spill] sm:$0xff] %v6488_v51  ;;  %vm2518_vm13 = vcmp.eq.f32.partialorder %v6294_v18, %v6488_v51 }
 0x7df   : > { %v2519_v35 = vsel %vm2518_vm13, %v2514_v11, inf  ;;  %v3032_v11 = vcvt.s32.f32 %v3030_v29  ;;  %v7827_v29 = vld [vmem:[#allocation12_spill] sm:$0xff] }
 0x7e0   : > { %2520 = vmin.xlane.f32.xlu1 %v2519_v35  ;;  %v3046_v35 = vcvt.s32.f32 %v3044_v43  ;;  %v7829_v43 = vld [vmem:[#allocation28_spill] sm:$0xff] }
 0x7e1   : > { %v6493_v34 = vpop.xlane.xlu0 %2530 }
 0x7e2   : > { %7805 = vst [vmem:[#allocation110_spill] sm:$0xff] %v6493_v34  ;;  %vm2532_vm2 = vcmp.eq.f32.partialorder %v6306_v13, %v6493_v34  ;;  %v7874_v34 = vld [vmem:[#allocation86_spill] sm:$0xff] }
 0x7e3   : > { %v2533_v24 = vsel %vm2532_vm2, %v2528_v40, inf }
 0x7e4   : > { %2534 = vmin.xlane.f32.xlu1 %v2533_v24 }
 0x7e5   : > { %v6498_v61 = vpop.xlane.xlu0 %2936 }
 0x7e6   : > { %vm2938_vm14 = vcmp.eq.f32.partialorder %v6315_v53, %v6498_v61 }
 0x7e7   : > { %v2939_v18 = vsel %vm2938_vm14, %v2934_v16, inf  ;;  %v3074_v16 = vcvt.s32.f32 %v3072_v39  ;;  %v7833_v39 = vld [vmem:[#allocation30_spill] sm:$0xff] }
 0x7e8   : > { %2940 = vmin.xlane.f32.xlu1 %v2939_v18  ;;  %v7810_v18 = vld [vmem:[#allocation19_spill] sm:$0xff] }
 0x7e9   : > { %v6503_v57 = vpop.xlane.xlu0 %2964 }
 0x7ea   : > { %vm2966_vm1 = vcmp.eq.f32.partialorder %v6318_v36, %v6503_v57 }
 0x7eb   : > { %v2967_v13 = vsel %vm2966_vm1, %v2962_v26, inf  ;;  %v7812_v26 = vld [vmem:[#allocation18_spill] sm:$0xff] }
 0x7ec   : > { %2968 = vmin.xlane.f32.xlu1 %v2967_v13  ;;  %v7815_v13 = vld [vmem:[#allocation4_spill] sm:$0xff] }
 0x7ed   : > { %v6508_v30 = vpop.xlane.xlu0 %2978 }
 0x7ee   : > { %vm2980_vm15 = vcmp.eq.f32.partialorder %v7806_v56, %v6508_v30  ;;  %v7819_v56 = vld [vmem:[#allocation23_spill] sm:$0xff] }
 0x7ef   : > { %v2981_v53 = vsel %vm2980_vm15, %v2976_v55, inf  ;;  %v7816_v55 = vld [vmem:[#allocation20_spill] sm:$0xff] }
 0x7f0   : > { %2982 = vmin.xlane.f32.xlu0 %v2981_v53 }
 0x7f1   : > { %v6513_v46 = vpop.xlane.xlu0 %2992 }
 0x7f2   : > { %vm2994_vm0 = vcmp.eq.f32.partialorder %v6334_v27, %v6513_v46 }
 0x7f3   : > { %v2995_v36 = vsel %vm2994_vm0, %v2990_v38, inf  ;;  %v7821_v38 = vld [vmem:[#allocation22_spill] sm:$0xff] }
 0x7f4   : > { %2996 = vmin.xlane.f32.xlu1 %v2995_v36 }
 0x7f5   : > { %v6518_v3 = vpop.xlane.xlu0 %3006 }
 0x7f6   : > { %vm3008_vm3 = vcmp.eq.f32.partialorder %v6347_v25, %v6518_v3 }
 0x7f7   : > { %v3009_v7 = vsel %vm3008_vm3, %v3004_v8, inf  ;;  %v7824_v8 = vld [vmem:[#allocation9_spill] sm:$0xff] }
 0x7f8   : > { %3010 = vmin.xlane.f32.xlu0 %v3009_v7 }
 0x7f9   : > { %v6523_v21 = vpop.xlane.xlu0 %3020 }
 0x7fa   : > { %vm3022_vm4 = vcmp.eq.f32.partialorder %v6358_v32, %v6523_v21 }
 0x7fb   : > { %v3023_v27 = vsel %vm3022_vm4, %v3018_v47, inf  ;;  %v7826_v47 = vld [vmem:[#allocation25_spill] sm:$0xff] }
 0x7fc   : > { %3024 = vmin.xlane.f32.xlu1 %v3023_v27 }
 0x7fd   : > { %v6528_v12 = vpop.xlane.xlu0 %3034 }
 0x7fe   : > { %vm3036_vm5 = vcmp.eq.f32.partialorder %v6371_v63, %v6528_v12 }
 0x7ff   : > { %v3037_v25 = vsel %vm3036_vm5, %v3032_v11, inf  ;;  %v7828_v11 = vld [vmem:[#allocation24_spill] sm:$0xff] }
 0x800   : > { %3038 = vmin.xlane.f32.xlu0 %v3037_v25 }
 0x801   : > { %v6533_v6 = vpop.xlane.xlu0 %3048 }
 0x802   : > { %vm3050_vm7 = vcmp.eq.f32.partialorder %v6382_v23, %v6533_v6  ;;  %v7808_v23 = vld [vmem:[#allocation2_spill] sm:$0xff] }
 0x803   : > { %v3051_v32 = vsel %vm3050_vm7, %v3046_v35, inf  ;;  %v7830_v35 = vld [vmem:[#allocation11_spill] sm:$0xff] }
 0x804   : > { %3052 = vmin.xlane.f32.xlu1 %v3051_v32 }
 0x805   : > { %v6538_v40 = vpop.xlane.xlu0 %3062 }
 0x806   : > { %vm3064_vm10 = vcmp.eq.f32.partialorder %v6390_v52, %v6538_v40  ;;  %v7813_v52 = vld [vmem:[#allocation21_spill] sm:$0xff] }
 0x807   : > { %v3065_v63 = vsel %vm3064_vm10, %v3060_v1, inf  ;;  %v7832_v1 = vld [vmem:[#allocation27_spill] sm:$0xff] }
 0x808   : > { %3066 = vmin.xlane.f32.xlu0 %v3065_v63 }
 0x809   : > { %v6543_v24 = vpop.xlane.xlu0 %3076 }
 0x80a   : > { %vm3078_vm12 = vcmp.eq.f32.partialorder %v6398_v60, %v6543_v24  ;;  %v6557_v60 = vpop.xlane.xlu1 %3118 }
 0x80b   : > { %v3079_v19 = vsel %vm3078_vm12, %v3074_v16, inf  ;;  %7817 = vst [vmem:[#allocation102_spill] sm:$0xff] %v6557_v60  ;;  %v7834_v16 = vld [vmem:[#allocation26_spill] sm:$0xff] }
 0x80c   : > { %3080 = vmin.xlane.f32.xlu1 %v3079_v19  ;;  %v7835_v19 = vld [vmem:[#allocation16_spill] sm:$0xff] }
 0x80e   : > { %v6561_v53 = vpop.xlane.xlu1 %3146 }
 0x80f   : > { %7820 = vst [vmem:[#allocation2_spill] sm:$0xff] %v6561_v53 }
 0x81d   : > { %2579 = vperm.xlu1 %4409, %v7808_v23  }
 0x81e   : > { %2574 = vperm.xlu0 %4408, %v7809_v37   ;;  %v7836_v37 = vld [vmem:[#allocation13_spill] sm:$0xff] }
 0x821   : > { %3190 = vperm.xlu1 %4409, %v7810_v18   ;;  %v7837_v18 = vld [vmem:[#allocation32_spill] sm:$0xff] }
 0x822   : > { %2584 = vperm.xlu0 %4408, %v7811_v42  }
 0x825   : > { %3195 = vperm.xlu1 %4409, %v7812_v26   ;;  %v7838_v26 = vld [vmem:[#allocation29_spill] sm:$0xff] }
 0x826   : > { %3200 = vperm.xlu0 %4408, %v7813_v52  }
 0x829   : > { %2589 = vperm.xlu1 %4409, %v7815_v13   ;;  %v7839_v13 = vld [vmem:[#allocation15_spill] sm:$0xff] }
 0x82a   : > { %3205 = vperm.xlu0 %4408, %v7816_v55  }
 0x82d   : > { %2594 = vperm.xlu1 %4409, %v7818_v5   ;;  %v7840_v5 = vld [vmem:[#allocation31_spill] sm:$0xff] }
 0x82e   : > { %3210 = vperm.xlu0 %4408, %v7819_v56   ;;  %v7841_v56 = vld [vmem:[#allocation17_spill] sm:$0xff] }
 0x831   : > { %3215 = vperm.xlu1 %4409, %v7821_v38  }
 0x832   : > { %2599 = vperm.xlu0 %4408, %v7822_v0   ;;  %v7842_v0 = vld [vmem:[#allocation33_spill] sm:$0xff] }
 0x835   : > { %2609 = vperm.xlu1 %4409, %v7823_v58   ;;  %v6566_v36 = vpop.xlane.xlu1 %2324 }
 0x836   : > { %2604 = vperm.xlu0 %4408, %v7824_v8  }
 0x839   : > { %2619 = vperm.xlu1 %4409, %v7825_v15   ;;  %v6570_v7 = vpop.xlane.xlu1 %2338  ;;  %v3100_v15 = vand.u32 65535, %v6394_v54  ;;  %v7850_v54 = vld [vmem:[#allocation103_spill] sm:$0xff] }
 0x83a   : > { %3220 = vperm.xlu0 %4408, %v7826_v47   ;;  %v6612_v47 = vpop.xlane.xlu0 %3104 }
 0x83b   : > { %7844 = vst [vmem:[#allocation19_spill] sm:$0xff] %v6612_v47  ;;  %vm3106_vm6 = vcmp.eq.f32.partialorder %v6405_v17, %v6612_v47  ;;  %v7851_v17 = vld [vmem:[#allocation104_spill] sm:$0xff] }
 0x83c   : > { %vm3120_vm8 = vcmp.eq.f32.partialorder %v7851_v17, %v6557_v60  ;;  %v2425_v17 = vcvt.f32.s32 %v6448_v33 }
 0x83d   : > { %2629 = vperm.xlu1 %4409, %v7827_v29   ;;  %v6574_v27 = vpop.xlane.xlu1 %2352 }
 0x83e   : > { %3225 = vperm.xlu0 %4408, %v7828_v11   ;;  %v3102_v11 = vcvt.s32.f32 %v3100_v15  ;;  %v7853_v15 = vld [vmem:[#allocation107_spill] sm:$0xff]  ;;  %v2354_v45 = vcvt.f32.s32 %v6574_v27  ;;  %v7879_v27 = vld [vmem:[#allocation73_spill] sm:$0xff] }
 0x841   : > { %3245 = vperm.xlu1 %4409, %v7829_v43   ;;  %v6578_v25 = vpop.xlane.xlu1 %2366  ;;  %v3107_v43 = vsel %vm3106_vm6, %v3102_v11, inf  ;;  %v7854_v11 = vld [vmem:[#allocation105_spill] sm:$0xff] }
 0x842   : > { %2614 = vperm.xlu0 %4408, %v7830_v35  }
 0x845   : > { %2639 = vperm.xlu1 %4409, %v7831_v62   ;;  %v6582_v32 = vpop.xlane.xlu1 %2380  ;;  %v7847_v62 = vld [vmem:[#allocation99_spill] sm:$0xff] }
 0x846   : > { %3230 = vperm.xlu0 %4408, %v7832_v1   ;;  %v3086_v1 = vand.u32 65535, %v7847_v62  ;;  %v2327_v62 = vcvt.f32.s32 %v6413_v2 }
 0x848   : > { %v6650_v2 = vshll.u32 %v2327_v62, 16  ;;  %v2957_v62 = vcvt.f32.s32 %v6459_v14  ;;  %v2971_v14 = vcvt.f32.s32 %v6503_v57 }
 0x849   : > { %3255 = vperm.xlu1 %4409, %v7833_v39   ;;  %v6586_v63 = vpop.xlane.xlu1 %2394 }
 0x84a   : > { %3235 = vperm.xlu0 %4408, %v7834_v16   ;;  %v7849_v16 = vld [vmem:[#allocation100_spill] sm:$0xff] }
 0x84b   : > { %vm3092_vm9 = vcmp.eq.f32.partialorder %v7849_v16, %v6553_v49  ;;  %v7866_v49 = vld [vmem:[#allocation81_spill] sm:$0xff] }
 0x84d   : > { %2649 = vperm.xlu1 %4409, %v7835_v19   ;;  %v6590_v23 = vpop.xlane.xlu1 %2408  ;;  %v3114_v19 = vand.u32 65535, %v7850_v54  ;;  %v2355_v54 = vcvt.f32.s32 %v6423_v22 }
 0x84e   : > { %2624 = vperm.xlu0 %4408, %v7836_v37   ;;  %v3088_v37 = vcvt.s32.f32 %v3086_v1  ;;  %v2341_v1 = vcvt.f32.s32 %v6418_v28  ;;  %v7855_v28 = vld [vmem:[#allocation106_spill] sm:$0xff] }
 0x84f   : > { %vm3148_vm13 = vcmp.eq.f32.partialorder %v7855_v28, %v6561_v53  ;;  %v6685_v28 = vshll.u32 %v2957_v62, 16 }
 0x850   : > { %v6652_v22 = vshll.u32 %v2341_v1, 16  ;;  %v2453_v1 = vcvt.f32.s32 %v6461_v59  ;;  %v2999_v59 = vcvt.f32.s32 %v6513_v46 }
 0x851   : > { %3265 = vperm.xlu1 %4409, %v7837_v18   ;;  %v6594_v42 = vpop.xlane.xlu1 %2422  ;;  %v3093_v18 = vsel %vm3092_vm9, %v3088_v37, inf  ;;  %v2397_v37 = vcvt.f32.s32 %v6438_v50  ;;  %v6655_v50 = vshll.u32 %v2355_v54, 16  ;;  %v2495_v54 = vcvt.f32.s32 %v6478_v48 }
 0x852   : > { %3240 = vperm.xlu0 %4408, %v7838_v26   ;;  %v3128_v26 = vand.u32 65535, %v6402_v44  ;;  %v2369_v44 = vcvt.f32.s32 %v6428_v41  ;;  %v2439_v41 = vcvt.f32.s32 %v6453_v10  ;;  %v2467_v10 = vcvt.f32.s32 %v6468_v9 }
 0x853   : > { %v3013_v9 = vcvt.f32.s32 %v6518_v3  ;;  %v3041_v48 = vcvt.f32.s32 %v6528_v12  ;;  %v6696_v46 = vshll.u32 %v2495_v54, 16  ;;  %v7861_v12 = vld [vmem:[#allocation80_spill] sm:$0xff] }
 0x854   : > { %v3130_v16 = vcvt.s32.f32 %v3128_v26  ;;  %v6661_v26 = vshll.u32 %v2397_v37, 16  ;;  %v6676_v37 = vshll.u32 %v2439_v41, 16  ;;  %v3069_v41 = vcvt.f32.s32 %v6538_v40 }
 0x855   : > { %v6597_v52 = vpop.xlane.xlu1 %2436  ;;  %v6692_v57 = vshll.u32 %v2467_v10, 16  ;;  %7857 = vst [vmem:[#allocation7_spill] sm:$0xff] %v6696_v46 }
 0x856   : > { %2634 = vperm.xlu0 %4408, %v7839_v13   ;;  %v6629_v13 = vpop.xlane.xlu0 %3132  ;;  %v6719_v53 = vshll.u32 %v3069_v41, 16 }
 0x857   : > { %7852 = vst [vmem:[#allocation4_spill] sm:$0xff] %v6629_v13  ;;  %vm3134_vm11 = vcmp.eq.f32.partialorder %v7853_v15, %v6629_v13 }
 0x858   : > { %7860 = vst [vmem:[#allocation6_spill] sm:$0xff] %v6719_v53 }
 0x859   : > { %v6600_v55 = vpop.xlane.xlu1 %2450 }
 0x85a   : > { %3250 = vperm.xlu0 %4408, %v7840_v5   ;;  %v3116_v5 = vcvt.s32.f32 %v3114_v19  ;;  %v2383_v19 = vcvt.f32.s32 %v6433_v31 }
 0x85c   : > { %v6659_v33 = vshll.u32 %v2383_v19, 16 }
 0x85d   : > { %v6604_v38 = vpop.xlane.xlu1 %2464 }
 0x85e   : > { %2644 = vperm.xlu0 %4408, %v7841_v56  }
 0x861   : > { %v6607_v58 = vpop.xlane.xlu1 %2478 }
 0x862   : > { %3260 = vperm.xlu0 %4408, %v7842_v0   ;;  %v3121_v0 = vsel %vm3120_vm8, %v3116_v5, inf  ;;  %v3135_v5 = vsel %vm3134_vm11, %v3130_v16, inf  ;;  %v6665_v16 = vshll.u32 %v2425_v17, 16  ;;  %v2985_v17 = vcvt.f32.s32 %v6508_v30 }
 0x864   : > { %v6707_v40 = vshll.u32 %v2985_v17, 16 }
 0x865   : > { %v6609_v8 = vpop.xlane.xlu1 %2492 }
 0x866   : > { %7843 = vst [vmem:[#allocation3_spill] sm:$0xff] %v6609_v8  ;;  %v2368_v8 = vcvt.f32.s32 %v6578_v25  ;;  %v2410_v25 = vcvt.f32.s32 %v6590_v23 }
 0x869   : > { %v6616_v29 = vpop.xlane.xlu1 %2506 }
 0x86a   : > { %7845 = vst [vmem:[#allocation5_spill] sm:$0xff] %v6616_v29  ;;  %v2382_v29 = vcvt.f32.s32 %v6582_v32  ;;  %v6773_v32 = vadd.s32 %v6655_v50, %v2354_v45 }
 0x86c   : > { %v6788_v45 = vadd.s32 %v6659_v33, %v2382_v29  ;;  %v7887_v33 = vld [vmem:[#allocation74_spill] sm:$0xff] }
 0x86d   : > { %v6618_v35 = vpop.xlane.xlu1 %2520 }
 0x86e   : > { %7846 = vst [vmem:[#allocation18_spill] sm:$0xff] %v6618_v35  ;;  %v7869_v35 = vld [vmem:[#allocation84_spill] sm:$0xff] }
 0x871   : > { %v6621_v39 = vpop.xlane.xlu1 %2534 }
 0x872   : > { %7848 = vst [vmem:[#allocation21_spill] sm:$0xff] %v6621_v39  ;;  %v7867_v39 = vld [vmem:[#allocation83_spill] sm:$0xff] }
 0x875   : > { %3108 = vmin.xlane.f32.xlu1 %v3107_v43  ;;  %v6631_v56 = vpop.xlane.xlu1 %2940  ;;  %v3142_v43 = vand.u32 65535, %v7854_v11 }
 0x877   : > { %v3144_v31 = vcvt.s32.f32 %v3142_v43  ;;  %v2481_v43 = vcvt.f32.s32 %v6473_v4  ;;  %v3027_v4 = vcvt.f32.s32 %v6523_v21 }
 0x879   : > { %v6646_v15 = vpop.xlane.xlu1 %2968  ;;  %v6694_v30 = vshll.u32 %v2481_v43, 16  ;;  %v6713_v10 = vshll.u32 %v3027_v4, 16  ;;  %v6715_v43 = vshll.u32 %v3041_v48, 16  ;;  %v7864_v48 = vld [vmem:[#allocation66_spill] sm:$0xff] }
 0x87a   : > { %v2558_v47 = vsub.f32 %v7864_v48, %v7861_v12  ;;  %v7871_v48 = vld [vmem:[#allocation85_spill] sm:$0xff] }
 0x87b   : > { %7856 = vst [vmem:[#allocation20_spill] sm:$0xff] %v6694_v30  ;;  %7858 = vst [vmem:[#allocation23_spill] sm:$0xff] %v6715_v43  ;;  %v7888_v30 = vld [vmem:[#allocation79_spill] sm:$0xff] }
 0x881   : > { %3094 = vmin.xlane.f32.xlu0 %v3093_v18  ;;  %v2411_v18 = vcvt.f32.s32 %v6443_v20  ;;  %v6657_v20 = vshll.u32 %v2369_v44, 16  ;;  %v6674_v19 = vpop.xlane.xlu1 %2996 }
 0x883   : > { %v6663_v11 = vshll.u32 %v2411_v18, 16  ;;  %v2943_v18 = vcvt.f32.s32 %v6498_v61  ;;  %v3083_v61 = vcvt.f32.s32 %v6543_v24  ;;  %v6709_v24 = vshll.u32 %v2999_v59, 16 }
 0x885   : > { %3122 = vmin.xlane.f32.xlu0 %v3121_v0  ;;  %v6644_v0 = vpop.xlane.xlu0 %2954  ;;  %v6703_v62 = vshll.u32 %v2943_v18, 16  ;;  %v3084_v13 = vshll.u32 %v3083_v61, 16  ;;  %v7862_v18 = vld [vmem:[#allocation64_spill] sm:$0xff]  ;;  %v2340_v61 = vcvt.f32.s32 %v6570_v7  ;;  %v7881_v7 = vld [vmem:[#allocation75_spill] sm:$0xff] }
 0x886   : > { %v2556_v60 = vsub.f32 %v7862_v18, %v7861_v12 }
 0x887   : > { %v6766_v18 = vadd.s32 %v6652_v22, %v2340_v61  ;;  %v6780_v22 = vadd.s32 %v6657_v20, %v2368_v8  ;;  %v7885_v8 = vld [vmem:[#allocation77_spill] sm:$0xff] }
 0x889   : > { %3136 = vmin.xlane.f32.xlu0 %v3135_v5  ;;  %v3149_v5 = vsel %vm3148_vm13, %v3144_v31, inf  ;;  %v6672_v44 = vpop.xlane.xlu0 %2982  ;;  %v3055_v31 = vcvt.f32.s32 %v6533_v6  ;;  %v6700_v21 = vpop.xlane.xlu1 %3024  ;;  %v6705_v6 = vshll.u32 %v2971_v14, 16  ;;  %v2326_v14 = vcvt.f32.s32 %v6566_v36  ;;  %v7868_v36 = vld [vmem:[#allocation82_spill] sm:$0xff] }
 0x88b   : > { %v6717_v54 = vshll.u32 %v3055_v31, 16  ;;  %v7865_v31 = vld [vmem:[#allocation97_spill] sm:$0xff] }
 0x88c   : > { %v3172_v41 = vsub.f32 %v7866_v49, %v7865_v31  ;;  %v7878_v49 = vld [vmem:[#allocation87_spill] sm:$0xff] }
 0x88d   : > { %3150 = vmin.xlane.f32.xlu0 %v3149_v5  ;;  %v6690_v5 = vshll.u32 %v2453_v1, 16  ;;  %v6698_v3 = vpop.xlane.xlu0 %3010  ;;  %v6711_v1 = vshll.u32 %v3013_v9, 16  ;;  %7859 = vst [vmem:[#allocation22_spill] sm:$0xff] %v6717_v54  ;;  %v7863_v9 = vld [vmem:[#allocation65_spill] sm:$0xff]  ;;  %v6756_v54 = vadd.s32 %v6650_v2, %v2326_v14  ;;  %v7890_v2 = vld [vmem:[#allocation76_spill] sm:$0xff] }
 0x88e   : > { %v2557_v4 = vsub.f32 %v7863_v9, %v7861_v12  ;;  %v7870_v9 = vld [vmem:[#allocation67_spill] sm:$0xff] }
 0x891   : > { %v6724_v17 = vpop.xlane.xlu0 %3038  ;;  %v6726_v59 = vpop.xlane.xlu1 %3052 }
 0x895   : > { %v6759_v46 = vpop.xlane.xlu0 %3066 }
 0x896   : > { %7876 = vst [vmem:[#allocation8_spill] sm:$0xff] %v6759_v46  ;;  %v2396_v46 = vcvt.f32.s32 %v6586_v63  ;;  %v2438_v63 = vcvt.f32.s32 %v6597_v52  ;;  %v6802_v52 = vadd.s32 %v6663_v11, %v2410_v25  ;;  %v2452_v11 = vcvt.f32.s32 %v6600_v55 }
 0x897   : > { %v2466_v25 = vcvt.f32.s32 %v6604_v38  ;;  %v2984_v55 = vcvt.f32.s32 %v6672_v44  ;;  %v2998_v38 = vcvt.f32.s32 %v6674_v19 }
 0x898   : > { %v6799_v29 = vadd.s32 %v6661_v26, %v2396_v46  ;;  %v6818_v46 = vadd.s32 %v6676_v37, %v2438_v63  ;;  %v2942_v26 = vcvt.f32.s32 %v6631_v56  ;;  %v2970_v37 = vcvt.f32.s32 %v6646_v15 }
 0x899   : > { %v3081_v43 = vpop.xlane.xlu1 %3080  ;;  %v3012_v63 = vcvt.f32.s32 %v6698_v3  ;;  %v3026_v56 = vcvt.f32.s32 %v6700_v21  ;;  %v7892_v3 = vsub.f32 %v7867_v39, %v7865_v31 }
 0x89a   : > { %v3082_v53 = vcvt.f32.s32 %v3081_v43  ;;  %v2424_v43 = vcvt.f32.s32 %v6594_v42  ;;  %v2956_v42 = vcvt.f32.s32 %v6644_v0  ;;  %v6859_v21 = vadd.s32 %v6705_v6, %v2970_v37 }
 0x89b   : > { %v6869_v39 = vadd.s32 %v6711_v1, %v3012_v63  ;;  %v6878_v6 = vadd.s32 %v6713_v10, %v3026_v56  ;;  %v7895_v1 = vsub.f32 %v7869_v35, %v7865_v31 }
 0x89c   : > { %v6783_v61 = vadd.s32 %v3084_v13, %v3082_v53  ;;  %v6809_v20 = vadd.s32 %v6665_v16, %v2424_v43  ;;  %v6825_v43 = vadd.s32 %v6685_v28, %v2956_v42  ;;  %v6839_v42 = vadd.s32 %v6690_v5, %v2452_v11 }
 0x89d   : > { %v2575_v50 = vpop.permute.xlu0 %2574  ;;  %v2580_v23 = vpop.permute.xlu1 %2579  ;;  %v7893_v5 = vsub.f32 %v7868_v36, %v7865_v31  ;;  %v6856_v11 = vadd.s32 %v6703_v62, %v2942_v26  ;;  %v7894_v62 = vld [vmem:[#allocation98_spill] sm:$0xff]  ;;  %v7905_v26 = vld [vmem:[#allocation71_spill] sm:$0xff] }
 0x89e   : > { %7882 = vst [vmem:[#allocation9_spill] sm:$0xff] %v6783_v61  ;;  %v2652_v53 = vadd.f32 %v2575_v50, %v2556_v60  ;;  %v2653_v13 = vadd.f32 %v2580_v23, %v2557_v4  ;;  %v7886_v61 = vld [vmem:[#allocation90_spill] sm:$0xff]  ;;  %v7889_v4 = vld [vmem:[#allocation91_spill] sm:$0xff]  ;;  %vm2540_vm2 = vcmp.eq.s32.totalorder %v7894_v62, %v6756_v54  ;;  %vm2541_vm3 = vcmp.eq.s32.totalorder %v7894_v62, %v6766_v18 }
 0x89f   : > { %v3181_v14 = vsub.f32 %v7886_v61, %v7865_v31  ;;  %vm3156_vm12 = vcmp.eq.s32.totalorder %v7894_v62, %v6856_v11  ;;  %vm2542_vm8 = vcmp.eq.s32.totalorder %v7894_v62, %v6773_v32  ;;  %v7906_v18 = vsub.f32 %v7905_v26, %v7861_v12 }
 0x8a0   : > { %v6811_v60 = vmax.f32 %v2652_v53, 0.0  ;;  %v6813_v0 = vmax.f32 %v2653_v13, 0.0 }
 0x8a1   : > { %v2585_v50 = vpop.permute.xlu0 %2584  ;;  %v3191_v23 = vpop.permute.xlu1 %3190 }
 0x8a2   : > { %4410 = vrsqrt.f32 %v6811_v60  ;;  %v2654_v53 = vadd.f32 %v2585_v50, %v2558_v47  ;;  %v3268_v13 = vadd.f32 %v3191_v23, %v3172_v41  ;;  %v6842_v47 = vadd.s32 %v6692_v57, %v2466_v25  ;;  %v7891_v41 = vld [vmem:[#allocation78_spill] sm:$0xff] }
 0x8a3   : > { %4412 = vrsqrt.f32 %v6813_v0  ;;  %v6862_v25 = vadd.s32 %v6707_v40, %v2984_v55  ;;  %v3040_v40 = vcvt.f32.s32 %v6724_v17  ;;  %vm2686_vm14 = vcmp.eq.f32.partialorder %v6811_v60, inf }
 0x8a4   : > { %v6834_v16 = vmax.f32 %v2654_v53, 0.0  ;;  %v6836_v28 = vmax.f32 %v3268_v13, 0.0  ;;  %v6866_v53 = vadd.s32 %v6709_v24, %v2998_v38  ;;  %v7896_v38 = vsub.f32 %v7870_v9, %v7861_v12 }
 0x8a5   : > { %v3201_v15 = vpop.permute.xlu0 %3200  ;;  %v3196_v44 = vpop.permute.xlu1 %3195  ;;  %vm2688_vm1 = vcmp.eq.f32.partialorder %v6811_v60, 0.0  ;;  %v2689_v10 = vand.u32 2147483648, %v6811_v60  ;;  %vm2693_vm15 = vcmp.eq.f32.partialorder %v6813_v0, inf  ;;  %vm2695_vm0 = vcmp.eq.f32.partialorder %v6813_v0, 0.0 }
 0x8a6   : > { %4414 = vrsqrt.f32 %v6834_v16  ;;  %v3270_v23 = vadd.f32 %v3201_v15, %v7892_v3  ;;  %v3269_v57 = vadd.f32 %v3196_v44, %v7893_v5  ;;  %v2696_v35 = vand.u32 2147483648, %v6813_v0 }
 0x8a7   : > { %4416 = vrsqrt.f32 %v6836_v28  ;;  %vm3302_vm4 = vcmp.eq.f32.partialorder %v6836_v28, inf  ;;  %vm3304_vm5 = vcmp.eq.f32.partialorder %v6836_v28, 0.0  ;;  %vm2700_vm7 = vcmp.eq.f32.partialorder %v6834_v16, inf }
 0x8a8   : > { %v6871_v13 = vmax.f32 %v3270_v23, 0.0  ;;  %v6873_v36 = vmax.f32 %v3269_v57, 0.0  ;;  %v3305_v57 = vand.u32 2147483648, %v6836_v28  ;;  %vm2702_vm10 = vcmp.eq.f32.partialorder %v6834_v16, 0.0 }
 0x8a9   : > { %v3206_v37 = vpop.permute.xlu0 %3205  ;;  %v2590_v24 = vpop.permute.xlu1 %2589  ;;  %v2703_v50 = vand.u32 2147483648, %v6834_v16 }
 0x8aa   : > { %4418 = vrsqrt.f32 %v6871_v13  ;;  %v3271_v55 = vadd.f32 %v3206_v37, %v7895_v1  ;;  %v2655_v63 = vadd.f32 %v2590_v24, %v7896_v38  ;;  %v7897_v37 = vsub.f32 %v7871_v48, %v7865_v31  ;;  %v7898_v1 = vld [vmem:[#allocation68_spill] sm:$0xff] }
 0x8ab   : > { %4420 = vrsqrt.f32 %v6873_v36  ;;  %vm3309_vm6 = vcmp.eq.f32.partialorder %v6873_v36, inf  ;;  %vm3311_vm9 = vcmp.eq.f32.partialorder %v6873_v36, 0.0  ;;  %vm3316_vm11 = vcmp.eq.f32.partialorder %v6871_v13, inf }
 0x8ac   : > { %v4411_v56 = vpop.eup %4410  ;;  %v6895_v15 = vmax.f32 %v3271_v55, 0.0  ;;  %v6897_v44 = vmax.f32 %v2655_v63, 0.0  ;;  %v7899_v55 = vsub.f32 %v7898_v1, %v7861_v12  ;;  %vm3318_vm13 = vcmp.eq.f32.partialorder %v6871_v13, 0.0 }
 0x8ad   : > { %v4413_v9 = vpop.eup %4412  ;;  %v3211_v3 = vpop.permute.xlu0 %3210  ;;  %v2685_v5 = vmul.f32 %v4411_v56, %v6811_v60 }
 0x8ae   : > { %v2595_v23 = vpop.permute.xlu1 %2594  ;;  %4422 = vrsqrt.f32 %v6895_v15  ;;  %v3272_v24 = vadd.f32 %v3211_v3, %v7897_v37  ;;  %v2692_v63 = vmul.f32 %v4413_v9, %v6813_v0 }
 0x8af   : > { %v2656_v38 = vadd.f32 %v2595_v23, %v7899_v55  ;;  %4424 = vrsqrt.f32 %v6897_v44  ;;  %v2687_v56 = vsel %vm2686_vm14, %v6811_v60, %v2685_v5  ;;  %vm2707_vm14 = vcmp.eq.f32.partialorder %v6897_v44, inf }
 0x8b0   : > { %v4415_v19 = vpop.eup %4414  ;;  %v6921_v51 = vmax.f32 %v3272_v24, 0.0  ;;  %v2690_v3 = vsel %vm2688_vm1, %v2689_v10, %v2687_v56  ;;  %v2694_v9 = vsel %vm2693_vm15, %v6813_v0, %v2692_v63  ;;  %v7900_v10 = vld [vmem:[#allocation69_spill] sm:$0xff]  ;;  %v3312_v63 = vand.u32 2147483648, %v6873_v36 }
 0x8b1   : > { %v6923_v48 = vmax.f32 %v2656_v38, 0.0  ;;  %v4417_v23 = vpop.eup %4416  ;;  %v2600_v5 = vpop.permute.xlu0 %2599  ;;  %v2796_v24 = vsel %vm2540_vm2, %v2690_v3, 0.0  ;;  %v2699_v60 = vmul.f32 %v4415_v19, %v6834_v16  ;;  %v7901_v1 = vsub.f32 %v7900_v10, %v7861_v12 }
 0x8b2   : > { %v3216_v37 = vpop.permute.xlu1 %3215  ;;  %2812 = vadd.xlane.f32.xlu0 %v2796_v24  ;;  %v2697_v38 = vsel %vm2695_vm0, %v2696_v35, %v2694_v9  ;;  %v3301_v54 = vmul.f32 %v4417_v23, %v6836_v28  ;;  %v3319_v19 = vand.u32 2147483648, %v6871_v13  ;;  %v7902_v35 = vsub.f32 %v7874_v34, %v7865_v31 }
 0x8b3   : > { %v2657_v55 = vadd.f32 %v2600_v5, %v7901_v1  ;;  %4426 = vrsqrt.f32 %v6923_v48  ;;  %vm3157_vm2 = vcmp.eq.s32.totalorder %v7894_v62, %v6825_v43  ;;  %vm3158_vm1 = vcmp.eq.s32.totalorder %v7894_v62, %v6859_v21  ;;  %v7903_v1 = vld [vmem:[#allocation70_spill] sm:$0xff] }
 0x8b4   : > { %v4419_v56 = vpop.eup %4418  ;;  %4428 = vrsqrt.f32 %v6921_v51  ;;  %v3273_v3 = vadd.f32 %v3216_v37, %v7902_v35  ;;  %v2797_v24 = vsel %vm2541_vm3, %v2697_v38, 0.0  ;;  %v3303_v34 = vsel %vm3302_vm4, %v6836_v28, %v3301_v54 }
 0x8b5   : > { %v6952_v0 = vmax.f32 %v2657_v55, 0.0  ;;  %v4421_v9 = vpop.eup %4420  ;;  %v2605_v23 = vpop.permute.xlu0 %2604  ;;  %v2701_v37 = vsel %vm2700_vm7, %v6834_v16, %v2699_v60  ;;  %v3315_v10 = vmul.f32 %v4419_v56, %v6871_v13  ;;  %v7904_v55 = vsub.f32 %v7903_v1, %v7861_v12 }
 0x8b6   : > { %v2610_v5 = vpop.permute.xlu1 %2609  ;;  %2814 = vadd.xlane.f32.xlu0 %v2797_v24  ;;  %v3306_v54 = vsel %vm3304_vm5, %v3305_v57, %v3303_v34  ;;  %vm2543_vm15 = vcmp.eq.s32.totalorder %v7894_v62, %v6780_v22  ;;  %v3308_v60 = vmul.f32 %v4421_v9, %v6873_v36  ;;  %vm2709_vm0 = vcmp.eq.f32.partialorder %v6897_v44, 0.0 }
 0x8b7   : > { %4430 = vrsqrt.f32 %v6952_v0  ;;  %v2658_v35 = vadd.f32 %v2605_v23, %v7904_v55  ;;  %v2659_v38 = vadd.f32 %v2610_v5, %v7906_v18  ;;  %v2710_v56 = vand.u32 2147483648, %v6897_v44 }
 0x8b8   : > { %v3317_v23 = vsel %vm3316_vm11, %v6871_v13, %v3315_v10  ;;  %v4423_v1 = vpop.eup %4422  ;;  %v6989_v26 = vmax.f32 %v3273_v3, 0.0  ;;  %v2704_v57 = vsel %vm2702_vm10, %v2703_v50, %v2701_v37  ;;  %v3412_v55 = vsel %vm3156_vm12, %v3306_v54, 0.0 }
 0x8b9   : > { %v6991_v5 = vmax.f32 %v2658_v35, 0.0  ;;  %v6993_v28 = vmax.f32 %v2659_v38, 0.0  ;;  %v4425_v24 = vpop.eup %4424  ;;  %v3221_v9 = vpop.permute.xlu0 %3220  ;;  %v3310_v10 = vsel %vm3309_vm6, %v6873_v36, %v3308_v60  ;;  %vm2714_vm3 = vcmp.eq.f32.partialorder %v6923_v48, inf }
 0x8ba   : > { %v2620_v34 = vpop.permute.xlu1 %2619  ;;  %vm2716_vm4 = vcmp.eq.f32.partialorder %v6923_v48, 0.0  ;;  %v7907_v16 = vsub.f32 %v7878_v49, %v7865_v31  ;;  %3428 = vadd.xlane.f32.xlu0 %v3412_v55  ;;  %v3313_v3 = vsel %vm3311_vm9, %v3312_v63, %v3310_v10  ;;  %vm2544_vm5 = vcmp.eq.s32.totalorder %v7894_v62, %v6788_v45 }
 0x8bb   : > { %4432 = vrsqrt.f32 %v6991_v5  ;;  %v3320_v11 = vsel %vm3318_vm13, %v3319_v19, %v3317_v23  ;;  %v7908_v37 = vsub.f32 %v7879_v27, %v7861_v12  ;;  %v2706_v18 = vmul.f32 %v4425_v24, %v6897_v44 }
 0x8bc   : > { %v3274_v50 = vadd.f32 %v3221_v9, %v7907_v16  ;;  %4434 = vrsqrt.f32 %v6993_v28  ;;  %v2798_v49 = vsel %vm2542_vm8, %v2704_v57, 0.0  ;;  %v2717_v63 = vand.u32 2147483648, %v6923_v48  ;;  %v7909_v57 = vld [vmem:[#allocation88_spill] sm:$0xff] }
 0x8bd   : > { %v2661_v35 = vadd.f32 %v2620_v34, %v7908_v37  ;;  %4436 = vrsqrt.f32 %v6989_v26  ;;  %vm2545_vm7 = vcmp.eq.s32.totalorder %v7894_v62, %v6799_v29  ;;  %v3322_v13 = vmul.f32 %v4423_v1, %v6895_v15  ;;  %v4427_v19 = vpop.eup %4426  ;;  %v3226_v27 = vpop.permute.xlu0 %3225 }
 0x8be   : > { %v7024_v36 = vmax.f32 %v3274_v50, 0.0  ;;  %v2630_v38 = vpop.permute.xlu1 %2629  ;;  %v3413_v54 = vsel %vm3157_vm2, %v3313_v3, 0.0  ;;  %v2708_v32 = vsel %vm2707_vm14, %v6897_v44, %v2706_v18  ;;  %v3414_v60 = vsel %vm3158_vm1, %v3320_v11, 0.0  ;;  %v4429_v23 = vpop.eup %4428 }
 0x8bf   : > { %vm2721_vm10 = vcmp.eq.f32.partialorder %v6952_v0, inf  ;;  %v7910_v1 = vsub.f32 %v7909_v57, %v7865_v31  ;;  %3430 = vadd.xlane.f32.xlu0 %v3413_v54  ;;  %v2711_v43 = vsel %vm2709_vm0, %v2710_v56, %v2708_v32  ;;  %vm2723_vm12 = vcmp.eq.f32.partialorder %v6952_v0, 0.0 }
 0x8c0   : > { %v2724_v9 = vand.u32 2147483648, %v6952_v0  ;;  %v7047_v34 = vmax.f32 %v2661_v35, 0.0  ;;  %v2799_v21 = vsel %vm2543_vm15, %v2711_v43, 0.0  ;;  %v2713_v55 = vmul.f32 %v4427_v19, %v6923_v48  ;;  %v7912_v35 = vld [vmem:[#allocation72_spill] sm:$0xff] }
 0x8c1   : > { %v3275_v24 = vadd.f32 %v3226_v27, %v7910_v1  ;;  %vm3323_vm6 = vcmp.eq.f32.partialorder %v6895_v15, inf  ;;  %v4431_v10 = vpop.eup %4430  ;;  %4438 = vrsqrt.f32 %v7024_v36  ;;  %v7911_v44 = vsub.f32 %v7881_v7, %v7861_v12  ;;  %2818 = vadd.xlane.f32.xlu1 %v2799_v21  ;;  %v2615_v50 = vpop.permute.xlu0 %2614 }
 0x8c2   : > { %vm3159_vm9 = vcmp.eq.s32.totalorder %v7894_v62, %v6862_v25  ;;  %v3324_v16 = vsel %vm3323_vm6, %v6895_v15, %v3322_v13  ;;  %vm3325_vm8 = vcmp.eq.f32.partialorder %v6895_v15, 0.0  ;;  %vm2546_vm11 = vcmp.eq.s32.totalorder %v7894_v62, %v6802_v52  ;;  %v7066_v3 = vpop.permute.xlu1 %3245  ;;  %v7917_v52 = vld [vmem:[#allocation23_spill] sm:$0xff] }
 0x8c3   : > { %v2663_v56 = vadd.f32 %v2630_v38, %v7911_v44  ;;  %v7064_v22 = vmax.f32 %v3275_v24, 0.0  ;;  %v2715_v7 = vsel %vm2714_vm3, %v6923_v48, %v2713_v55  ;;  %v2720_v11 = vmul.f32 %v4431_v10, %v6952_v0  ;;  %2816 = vadd.xlane.f32.xlu0 %v2798_v49 }
 0x8c4   : > { %v3326_v37 = vand.u32 2147483648, %v6895_v15  ;;  %v7913_v18 = vsub.f32 %v7912_v35, %v7861_v12  ;;  %v2718_v19 = vsel %vm2716_vm4, %v2717_v63, %v2715_v7  ;;  %vm2728_vm13 = vcmp.eq.f32.partialorder %v6991_v5, inf }
 0x8c5   : > { %v3329_v27 = vmul.f32 %v4429_v23, %v6921_v51  ;;  %4440 = vrsqrt.f32 %v7047_v34  ;;  %v2800_v38 = vsel %vm2544_vm5, %v2718_v19, 0.0  ;;  %v2722_v54 = vsel %vm2721_vm10, %v6952_v0, %v2720_v11  ;;  %v4433_v32 = vpop.eup %4432  ;;  %v3231_v1 = vpop.permute.xlu0 %3230 }
 0x8c6   : > { %v2660_v13 = vadd.f32 %v2615_v50, %v7913_v18  ;;  %v3327_v49 = vsel %vm3325_vm8, %v3326_v37, %v3324_v16  ;;  %v7089_v48 = vmax.f32 %v2663_v56, 0.0  ;;  %2820 = vadd.xlane.f32.xlu1 %v2800_v38  ;;  %v2725_v23 = vsel %vm2723_vm12, %v2724_v9, %v2722_v54  ;;  %v4435_v45 = vpop.eup %4434  ;;  %v2640_v15 = vpop.permute.xlu1 %2639  ;;  %v7914_v9 = vld [vmem:[#allocation89_spill] sm:$0xff]  ;;  %v7919_v54 = vld [vmem:[#allocation22_spill] sm:$0xff] }
 0x8c7   : > { %v2731_v57 = vand.u32 2147483648, %v6991_v5  ;;  %vm3160_vm2 = vcmp.eq.s32.totalorder %v7894_v62, %v6866_v53  ;;  %4442 = vrsqrt.f32 %v7064_v22  ;;  %v2801_v24 = vsel %vm2545_vm7, %v2725_v23, 0.0  ;;  %v4437_v0 = vpop.eup %4436  ;;  %3432 = vadd.xlane.f32.xlu0 %v3414_v60 }
 0x8c8   : > { %v7091_v63 = vmax.f32 %v2660_v13, 0.0  ;;  %v2727_v43 = vmul.f32 %v4433_v32, %v6991_v5  ;;  %vm3330_vm14 = vcmp.eq.f32.partialorder %v6921_v51, inf  ;;  %v7915_v21 = vsub.f32 %v7914_v9, %v7865_v31 }
 0x8c9   : > { %v3331_v10 = vsel %vm3330_vm14, %v6921_v51, %v3329_v27  ;;  %vm2547_vm1 = vcmp.eq.s32.totalorder %v7894_v62, %v6809_v20  ;;  %v2734_v29 = vmul.f32 %v4435_v45, %v6993_v28  ;;  %vm2730_vm15 = vcmp.eq.f32.partialorder %v6991_v5, 0.0  ;;  %v3236_v11 = vpop.permute.xlu0 %3235 }
 0x8ca   : > { %4444 = vrsqrt.f32 %v7091_v63  ;;  %v3276_v55 = vadd.f32 %v3231_v1, %v7915_v21  ;;  %v2729_v44 = vsel %vm2728_vm13, %v6991_v5, %v2727_v43  ;;  %vm3332_vm0 = vcmp.eq.f32.partialorder %v6921_v51, 0.0  ;;  %2822 = vadd.xlane.f32.xlu1 %v2801_v24  ;;  %v7137_v13 = vpop.permute.xlu1 %3255  ;;  %v7921_v21 = vld [vmem:[#allocation8_spill] sm:$0xff] }
 0x8cb   : > { %v3333_v56 = vand.u32 2147483648, %v6921_v51  ;;  %v7916_v60 = vsub.f32 %v7885_v8, %v7861_v12  ;;  %v2732_v7 = vsel %vm2730_vm15, %v2731_v57, %v2729_v44  ;;  %vm2735_vm3 = vcmp.eq.f32.partialorder %v6993_v28, inf  ;;  %v4439_v35 = vpop.eup %4438 }
 0x8cc   : > { %v7118_v16 = vmax.f32 %v3276_v55, 0.0  ;;  %vm3161_vm4 = vcmp.eq.s32.totalorder %v7894_v62, %v6869_v39  ;;  %v3415_v5 = vsel %vm3159_vm9, %v3327_v49, 0.0  ;;  %v2802_v51 = vsel %vm2546_vm11, %v2732_v7, 0.0 }
 0x8cd   : > { %v2665_v50 = vadd.f32 %v2640_v15, %v7916_v60  ;;  %v3334_v37 = vsel %vm3332_vm0, %v3333_v56, %v3331_v10  ;;  %v2736_v8 = vsel %vm2735_vm3, %v6993_v28, %v2734_v29  ;;  %v3277_v18 = vadd.f32 %v3236_v11, %v3181_v14  ;;  %3434 = vadd.xlane.f32.xlu0 %v3415_v5 }
 0x8ce   : > { %4446 = vrsqrt.f32 %v7118_v16  ;;  %v2738_v25 = vand.u32 2147483648, %v6993_v28  ;;  %v3336_v19 = vmul.f32 %v4437_v0, %v6989_v26  ;;  %v7144_v27 = vadd.s32 %v7917_v52, %v3040_v40  ;;  %2824 = vadd.xlane.f32.xlu1 %v2802_v51 }
 0x8cf   : > { %v7918_v38 = vcvt.f32.s32 %v6726_v59  ;;  %vm2737_vm5 = vcmp.eq.f32.partialorder %v6993_v28, 0.0  ;;  %vm3337_vm7 = vcmp.eq.f32.partialorder %v6989_v26, inf  ;;  %vm3162_vm10 = vcmp.eq.s32.totalorder %v7894_v62, %v6878_v6  ;;  %v4441_v59 = vpop.eup %4440  ;;  %v2625_v28 = vpop.permute.xlu0 %2624 }
 0x8d0   : > { %v7155_v14 = vmax.f32 %v2665_v50, 0.0  ;;  %v7157_v61 = vmax.f32 %v3277_v18, 0.0  ;;  %v2739_v17 = vsel %vm2737_vm5, %v2738_v25, %v2736_v8  ;;  %v3338_v40 = vsel %vm3337_vm7, %v6989_v26, %v3336_v19 }
 0x8d1   : > { %v7149_v49 = vadd.s32 %v7919_v54, %v7918_v38  ;;  %vm2548_vm12 = vcmp.eq.s32.totalorder %v7894_v62, %v6818_v46  ;;  %4448 = vrsqrt.f32 %v7089_v48  ;;  %v3416_v32 = vsel %vm3160_vm2, %v3334_v37, 0.0  ;;  %v4443_v15 = vpop.eup %4442 }
 0x8d2   : > { %v3340_v23 = vand.u32 2147483648, %v6989_v26  ;;  %v3343_v57 = vmul.f32 %v4439_v35, %v7024_v36  ;;  %4450 = vrsqrt.f32 %v7157_v61  ;;  %v7920_v45 = vsub.f32 %v7887_v33, %v7861_v12  ;;  %3436 = vadd.xlane.f32.xlu0 %v3416_v32 }
 0x8d3   : > { %vm3339_vm6 = vcmp.eq.f32.partialorder %v6989_v26, 0.0  ;;  %vm3344_vm9 = vcmp.eq.f32.partialorder %v7024_v36, inf  ;;  %v2803_v53 = vsel %vm2547_vm1, %v2739_v17, 0.0  ;;  %v3347_v0 = vand.u32 2147483648, %v7024_v36  ;;  %v2650_v26 = vpop.permute.xlu1 %2649  ;;  %v3241_v20 = vpop.permute.xlu0 %3240  ;;  %v7925_v17 = vld [vmem:[#allocation6_spill] sm:$0xff] }
 0x8d4   : > { %v2662_v1 = vadd.f32 %v2625_v28, %v7920_v45  ;;  %v3341_v24 = vsel %vm3339_vm6, %v3340_v23, %v3338_v40  ;;  %v3345_v43 = vsel %vm3344_vm9, %v7024_v36, %v3343_v57  ;;  %v4445_v9 = vpop.eup %4444  ;;  %v3068_v55 = vcvt.f32.s32 %v7921_v21  ;;  %2826 = vadd.xlane.f32.xlu1 %v2803_v53  ;;  %v7927_v53 = vld [vmem:[#allocation20_spill] sm:$0xff] }
 0x8d5   : > { %4452 = vrsqrt.f32 %v7155_v14  ;;  %vm3346_vm8 = vcmp.eq.f32.partialorder %v7024_v36, 0.0  ;;  %vm3163_vm11 = vcmp.eq.s32.totalorder %v7894_v62, %v7144_v27  ;;  %vm2549_vm13 = vcmp.eq.s32.totalorder %v7894_v62, %v6839_v42 }
 0x8d6   : > { %v7181_v33 = vmax.f32 %v2662_v1, 0.0  ;;  %v3417_v10 = vsel %vm3161_vm4, %v3341_v24, 0.0  ;;  %v3348_v29 = vsel %vm3346_vm8, %v3347_v0, %v3345_v43  ;;  %v2741_v44 = vmul.f32 %v4445_v9, %v7091_v63  ;;  %v7928_v9 = vld [vmem:[#allocation3_spill] sm:$0xff] }
 0x8d7   : > { %vm2742_vm2 = vcmp.eq.f32.partialorder %v7091_v63, inf  ;;  %v7922_v36 = vsub.f32 %v7889_v4, %v7865_v31  ;;  %3438 = vadd.xlane.f32.xlu0 %v3417_v10  ;;  %v2745_v60 = vand.u32 2147483648, %v7091_v63  ;;  %v3350_v50 = vmul.f32 %v4443_v15, %v7064_v22  ;;  %v2635_v35 = vpop.permute.xlu0 %2634 }
 0x8d8   : > { %4454 = vrsqrt.f32 %v7181_v33  ;;  %v7923_v39 = vsub.f32 %v7888_v30, %v7861_v12  ;;  %v2743_v11 = vsel %vm2742_vm2, %v7091_v63, %v2741_v44  ;;  %vm2744_vm14 = vcmp.eq.f32.partialorder %v7091_v63, 0.0  ;;  %v4447_v5 = vpop.eup %4446 }
 0x8d9   : > { %v3278_v56 = vadd.f32 %v3241_v20, %v7922_v36  ;;  %vm3351_vm1 = vcmp.eq.f32.partialorder %v7064_v22, inf  ;;  %v3418_v4 = vsel %vm3162_vm10, %v3348_v29, 0.0  ;;  %v2746_v37 = vsel %vm2744_vm14, %v2745_v60, %v2743_v11 }
 0x8da   : > { %v2667_v7 = vadd.f32 %v2650_v26, %v7923_v39  ;;  %v3352_v8 = vsel %vm3351_vm1, %v7064_v22, %v3350_v50  ;;  %v2804_v30 = vsel %vm2548_vm12, %v2746_v37, 0.0  ;;  %vm3353_vm15 = vcmp.eq.f32.partialorder %v7064_v22, 0.0 }
 0x8db   : > { %v7205_v51 = vmax.f32 %v3278_v56, 0.0  ;;  %v3354_v63 = vand.u32 2147483648, %v7064_v22  ;;  %v2748_v18 = vmul.f32 %v4441_v59, %v7047_v34  ;;  %v7924_v6 = vsub.f32 %v7890_v2, %v7861_v12  ;;  %3440 = vadd.xlane.f32.xlu0 %v3418_v4  ;;  %2828 = vadd.xlane.f32.xlu1 %v2804_v30  ;;  %v4449_v46 = vpop.eup %4448  ;;  %v7232_v28 = vpop.permute.xlu0 %3250  ;;  %v7932_v30 = vld [vmem:[#allocation9_spill] sm:$0xff] }
 0x8dc   : > { %vm2749_vm0 = vcmp.eq.f32.partialorder %v7047_v34, inf  ;;  %v2752_v19 = vand.u32 2147483648, %v7047_v34  ;;  %vm2751_vm3 = vcmp.eq.f32.partialorder %v7047_v34, 0.0  ;;  %v3357_v22 = vmul.f32 %v4447_v5, %v7118_v16  ;;  %v4451_v54 = vpop.eup %4450  ;;  %v7930_v5 = vld [vmem:[#allocation7_spill] sm:$0xff] }
 0x8dd   : > { %4456 = vrsqrt.f32 %v7205_v51  ;;  %v2664_v25 = vadd.f32 %v2635_v35, %v7924_v6  ;;  %v3355_v52 = vsel %vm3353_vm15, %v3354_v63, %v3352_v8  ;;  %v2750_v38 = vsel %vm2749_vm0, %v7047_v34, %v2748_v18  ;;  %v7931_v35 = vld [vmem:[#allocation5_spill] sm:$0xff]  ;;  %v7933_v18 = vld [vmem:[#allocation108_spill] sm:$0xff] }
 0x8de   : > { %v3071_v40 = vadd.s32 %v7925_v17, %v3068_v55  ;;  %v2753_v2 = vsel %vm2751_vm3, %v2752_v19, %v2750_v38  ;;  %vm3358_vm4 = vcmp.eq.f32.partialorder %v7118_v16, inf  ;;  %vm2550_vm5 = vcmp.eq.s32.totalorder %v7894_v62, %v6842_v47  ;;  %v7935_v38 = vld [vmem:[#allocation109_spill] sm:$0xff] }
 0x8df   : > { %v7227_v59 = vmax.f32 %v2664_v25, 0.0  ;;  %v3419_v32 = vsel %vm3163_vm11, %v3355_v52, 0.0  ;;  %v2805_v34 = vsel %vm2549_vm13, %v2753_v2, 0.0  ;;  %v3359_v23 = vsel %vm3358_vm4, %v7118_v16, %v3357_v22  ;;  %v4453_v45 = vpop.eup %4452 }
 0x8e0   : > { %v3361_v57 = vand.u32 2147483648, %v7118_v16  ;;  %v7242_v1 = vmax.f32 %v2667_v7, 0.0  ;;  %3442 = vadd.xlane.f32.xlu0 %v3419_v32  ;;  %2830 = vadd.xlane.f32.xlu1 %v2805_v34  ;;  %vm3360_vm7 = vcmp.eq.f32.partialorder %v7118_v16, 0.0  ;;  %v3364_v27 = vmul.f32 %v4451_v54, %v7157_v61  ;;  %v2645_v16 = vpop.permute.xlu0 %2644  ;;  %v7936_v32 = vld [vmem:[#allocation18_spill] sm:$0xff] }
 0x8e1   : > { %4458 = vrsqrt.f32 %v7227_v59  ;;  %v7926_v15 = vcvt.f32.s32 %v6607_v58  ;;  %vm3365_vm10 = vcmp.eq.f32.partialorder %v7157_v61, inf  ;;  %v3368_v43 = vand.u32 2147483648, %v7157_v61 }
 0x8e2   : > { %v3362_v24 = vsel %vm3360_vm7, %v3361_v57, %v3359_v23  ;;  %v4455_v0 = vpop.eup %4454  ;;  %v2494_v21 = vcvt.f32.s32 %v7928_v9  ;;  %vm3164_vm12 = vcmp.eq.s32.totalorder %v7894_v62, %v7149_v49  ;;  %v3366_v55 = vsel %vm3365_vm10, %v7157_v61, %v3364_v27 }
 0x8e3   : > { %v2483_v42 = vadd.s32 %v7927_v53, %v7926_v15  ;;  %vm3367_vm6 = vcmp.eq.f32.partialorder %v7157_v61, 0.0  ;;  %v3420_v26 = vsel %vm3164_vm12, %v3362_v24, 0.0  ;;  %vm3165_vm9 = vcmp.eq.s32.totalorder %v7894_v62, %v3071_v40  ;;  %v7937_v15 = vld [vmem:[#allocation110_spill] sm:$0xff] }
 0x8e4   : > { %v3369_v58 = vsel %vm3367_vm6, %v3368_v43, %v3366_v55  ;;  %v2755_v20 = vmul.f32 %v4455_v0, %v7181_v33  ;;  %4460 = vrsqrt.f32 %v7242_v1  ;;  %v7929_v10 = vsub.f32 %v7891_v41, %v7861_v12  ;;  %3444 = vadd.xlane.f32.xlu0 %v3420_v26  ;;  %v7938_v0 = vld [vmem:[#allocation21_spill] sm:$0xff] }
 0x8e5   : > { %vm2756_vm8 = vcmp.eq.f32.partialorder %v7181_v33, inf  ;;  %v2759_v49 = vand.u32 2147483648, %v7181_v33  ;;  %v3421_v44 = vsel %vm3165_vm9, %v3369_v58, 0.0  ;;  %vm2758_vm11 = vcmp.eq.f32.partialorder %v7181_v33, 0.0 }
 0x8e6   : > { %v2666_v29 = vadd.f32 %v2645_v16, %v7929_v10  ;;  %v2757_v61 = vsel %vm2756_vm8, %v7181_v33, %v2755_v20  ;;  %v2762_v36 = vmul.f32 %v4449_v46, %v7089_v48  ;;  %vm2763_vm13 = vcmp.eq.f32.partialorder %v7089_v48, inf }
 0x8e7   : > { %v4457_v56 = vpop.eup %4456  ;;  %v2760_v50 = vsel %vm2758_vm11, %v2759_v49, %v2757_v61  ;;  %v2766_v12 = vand.u32 2147483648, %v7089_v48  ;;  %vm2765_vm2 = vcmp.eq.f32.partialorder %v7089_v48, 0.0  ;;  %vm3372_vm14 = vcmp.eq.f32.partialorder %v7205_v51, inf  ;;  %v7939_v61 = vld [vmem:[#allocation92_spill] sm:$0xff] }
 0x8e8   : > { %v7268_v60 = vmax.f32 %v2666_v29, 0.0  ;;  %v2806_v41 = vsel %vm2550_vm5, %v2760_v50, 0.0  ;;  %v3371_v39 = vmul.f32 %v4457_v56, %v7205_v51  ;;  %v2764_v7 = vsel %vm2763_vm13, %v7089_v48, %v2762_v36  ;;  %3446 = vadd.xlane.f32.xlu0 %v3421_v44  ;;  %v7940_v50 = vld [vmem:[#allocation93_spill] sm:$0xff] }
 0x8e9   : > { %2832 = vadd.xlane.f32.xlu1 %v2806_v41  ;;  %v3375_v33 = vand.u32 2147483648, %v7205_v51  ;;  %v2767_v11 = vsel %vm2765_vm2, %v2766_v12, %v2764_v7  ;;  %v2497_v4 = vadd.s32 %v7930_v5, %v2494_v21  ;;  %vm3374_vm1 = vcmp.eq.f32.partialorder %v7205_v51, 0.0  ;;  %v7942_v5 = vld [vmem:[#allocation95_spill] sm:$0xff] }
 0x8ea   : > { %4462 = vrsqrt.f32 %v7268_v60  ;;  %v3373_v47 = vsel %vm3372_vm14, %v7205_v51, %v3371_v39  ;;  %v2776_v37 = vmul.f32 %v4453_v45, %v7155_v14  ;;  %v2508_v48 = vcvt.f32.s32 %v7931_v35  ;;  %v7941_v39 = vld [vmem:[#allocation94_spill] sm:$0xff] }
 0x8eb   : > { %v4459_v8 = vpop.eup %4458  ;;  %vm3166_vm15 = vcmp.eq.s32.totalorder %v7894_v62, %v7932_v30  ;;  %v3376_v63 = vsel %vm3374_vm1, %v3375_v33, %v3373_v47  ;;  %vm2551_vm0 = vcmp.eq.s32.totalorder %v7894_v62, %v2483_v42  ;;  %v7934_v6 = vcvt.f32.s32 %v7933_v18  ;;  %v3261_v47 = vpop.permute.xlu0 %3260 }
 0x8ec   : > { %v3422_v19 = vsel %vm3166_vm15, %v3376_v63, 0.0  ;;  %v2807_v46 = vsel %vm2551_vm0, %v2767_v11, 0.0  ;;  %v2769_v52 = vmul.f32 %v4459_v8, %v7227_v59  ;;  %v2523_v51 = vcvt.f32.s32 %v7935_v38 }
 0x8ed   : > { %v2510_v25 = vshll.u32 %v7934_v6, 16  ;;  %3448 = vadd.xlane.f32.xlu0 %v3422_v19  ;;  %2834 = vadd.xlane.f32.xlu1 %v2807_v46  ;;  %vm2770_vm3 = vcmp.eq.f32.partialorder %v7227_v59, inf  ;;  %v2773_v22 = vand.u32 2147483648, %v7227_v59  ;;  %vm2777_vm4 = vcmp.eq.f32.partialorder %v7155_v14, inf }
 0x8ee   : > { %vm2552_vm5 = vcmp.eq.s32.totalorder %v7894_v62, %v2497_v4  ;;  %v2771_v54 = vsel %vm2770_vm3, %v7227_v59, %v2769_v52  ;;  %vm2772_vm7 = vcmp.eq.f32.partialorder %v7227_v59, 0.0  ;;  %v2778_v17 = vsel %vm2777_vm4, %v7155_v14, %v2776_v37  ;;  %v4461_v40 = vpop.eup %4460 }
 0x8ef   : > { %v2511_v2 = vadd.s32 %v2510_v25, %v2508_v48  ;;  %v2522_v34 = vcvt.f32.s32 %v7936_v32  ;;  %v2774_v23 = vsel %vm2772_vm7, %v2773_v22, %v2771_v54  ;;  %v2780_v57 = vand.u32 2147483648, %v7155_v14  ;;  %v3266_v48 = vpop.permute.xlu1 %3265  ;;  %v7945_v25 = vld [vmem:[#allocation19_spill] sm:$0xff]  ;;  %v7946_v22 = vld [vmem:[#allocation102_spill] sm:$0xff] }
 0x8f0   : > { %v2808_v45 = vsel %vm2552_vm5, %v2774_v23, 0.0  ;;  %vm2779_vm10 = vcmp.eq.f32.partialorder %v7155_v14, 0.0  ;;  %v2524_v27 = vshll.u32 %v2523_v51, 16  ;;  %v2537_v53 = vcvt.f32.s32 %v7937_v15 }
 0x8f1   : > { %2836 = vadd.xlane.f32.xlu1 %v2808_v45  ;;  %v2781_v42 = vsel %vm2779_vm10, %v2780_v57, %v2778_v17  ;;  %v2790_v24 = vmul.f32 %v4461_v40, %v7242_v1  ;;  %v2536_v9 = vcvt.f32.s32 %v7938_v0  ;;  %vm2553_vm12 = vcmp.eq.s32.totalorder %v7894_v62, %v2511_v2 }
 0x8f2   : > { %v2525_v43 = vadd.s32 %v2524_v27, %v2522_v34  ;;  %v2809_v21 = vsel %vm2553_vm12, %v2781_v42, 0.0  ;;  %v2538_v16 = vshll.u32 %v2537_v53, 16  ;;  %vm2784_vm6 = vcmp.eq.f32.partialorder %v7268_v60, inf  ;;  %v7947_v53 = vld [vmem:[#allocation4_spill] sm:$0xff] }
 0x8f3   : > { %v2787_v14 = vand.u32 2147483648, %v7268_v60  ;;  %vm2791_vm9 = vcmp.eq.f32.partialorder %v7242_v1, inf  ;;  %vm2786_vm8 = vcmp.eq.f32.partialorder %v7268_v60, 0.0  ;;  %v2794_v29 = vand.u32 2147483648, %v7242_v1 }
 0x8f4   : > { %v4463_v59 = vpop.eup %4462  ;;  %v2792_v58 = vsel %vm2791_vm9, %v7242_v1, %v2790_v24  ;;  %v2539_v20 = vadd.s32 %v2538_v16, %v2536_v9  ;;  %vm2554_vm11 = vcmp.eq.s32.totalorder %v7894_v62, %v2525_v43  ;;  %vm2793_vm13 = vcmp.eq.f32.partialorder %v7242_v1, 0.0 }
 0x8f5   : > { %v2783_v55 = vmul.f32 %v4463_v59, %v7268_v60  ;;  %2838 = vadd.xlane.f32.xlu1 %v2809_v21  ;;  %v2795_v44 = vsel %vm2793_vm13, %v2794_v29, %v2792_v58  ;;  %v3183_v36 = vsub.f32 %v7939_v61, %v7865_v31  ;;  %v3184_v12 = vsub.f32 %v7940_v50, %v7865_v31 }
 0x8f6   : > { %vm2555_vm2 = vcmp.eq.s32.totalorder %v7894_v62, %v2539_v20  ;;  %v3185_v7 = vsub.f32 %v7941_v39, %v7865_v31  ;;  %v3186_v4 = vsub.f32 %v7942_v5, %v7865_v31  ;;  %v3111_v19 = vcvt.f32.s32 %v7945_v25 }
 0x8f7   : > { %v2785_v26 = vsel %vm2784_vm6, %v7268_v60, %v2783_v55  ;;  %v2811_v56 = vsel %vm2555_vm2, %v2795_v44, 0.0  ;;  %v3279_v60 = vadd.f32 %v7066_v3, %v3183_v36  ;;  %v3280_v1 = vadd.f32 %v7232_v28, %v3184_v12  ;;  %v7943_v3 = vld [vmem:[#allocation96_spill] sm:$0xff] }
 0x8f8   : > { %v2788_v10 = vsel %vm2786_vm8, %v2787_v14, %v2785_v26  ;;  %v3281_v33 = vadd.f32 %v7137_v13, %v3185_v7  ;;  %v3187_v8 = vsub.f32 %v7943_v3, %v7865_v31  ;;  %v3282_v35 = vadd.f32 %v3261_v47, %v3186_v4  ;;  %v7944_v13 = vld [vmem:[#allocation101_spill] sm:$0xff]  ;;  %v7948_v26 = vld [vmem:[#allocation2_spill] sm:$0xff] }
 0x8f9   : > { %v2810_v49 = vsel %vm2554_vm11, %v2788_v10, 0.0  ;;  %v3295_v41 = vmax.f32 %v3279_v60, 0.0  ;;  %v3296_v11 = vmax.f32 %v3280_v1, 0.0  ;;  %v3097_v18 = vcvt.f32.s32 %v7944_v13 }
 0x8fa   : > { %2840 = vadd.xlane.f32.xlu1 %v2810_v49  ;;  %v7329_v37 = vmax.f32 %v3281_v33, 0.0  ;;  %v3283_v30 = vadd.f32 %v3266_v48, %v3187_v8  ;;  %v7334_v28 = vmax.f32 %v3282_v35, 0.0  ;;  %v3125_v54 = vcvt.f32.s32 %v7946_v22 }
 0x8fb   : > { %4464 = vrsqrt.f32 %v3295_v41  ;;  %v3098_v51 = vshll.u32 %v3097_v18, 16  ;;  %v3112_v40 = vshll.u32 %v3111_v19, 16  ;;  %vm3379_vm14 = vcmp.eq.f32.partialorder %v3295_v41, inf }
 0x8fc   : > { %4466 = vrsqrt.f32 %v3296_v11  ;;  %v7338_v46 = vmax.f32 %v3283_v30, 0.0  ;;  %v3382_v27 = vand.u32 2147483648, %v3295_v41  ;;  %v3126_v15 = vshll.u32 %v3125_v54, 16 }
 0x8fd   : > { %4468 = vrsqrt.f32 %v7329_v37  ;;  %v3139_v42 = vcvt.f32.s32 %v7947_v53  ;;  %vm3381_vm1 = vcmp.eq.f32.partialorder %v3295_v41, 0.0  ;;  %vm3386_vm0 = vcmp.eq.f32.partialorder %v3296_v11, inf }
 0x8fe   : > { %2842 = vadd.xlane.f32.xlu1 %v2811_v56  ;;  %4470 = vrsqrt.f32 %v7334_v28  ;;  %v3389_v14 = vand.u32 2147483648, %v3296_v11  ;;  %v3153_v58 = vcvt.f32.s32 %v7948_v26  ;;  %vm3388_vm4 = vcmp.eq.f32.partialorder %v3296_v11, 0.0 }
 0x8ff   : > { %4472 = vrsqrt.f32 %v7338_v46  ;;  %v3140_v10 = vshll.u32 %v3139_v42, 16  ;;  %vm3393_vm5 = vcmp.eq.f32.partialorder %v7329_v37, inf  ;;  %v3396_v50 = vand.u32 2147483648, %v7329_v37 }
 0x900   : > { %vm3395_vm10 = vcmp.eq.f32.partialorder %v7329_v37, 0.0  ;;  %vm3400_vm12 = vcmp.eq.f32.partialorder %v7334_v28, inf  ;;  %v3403_v4 = vand.u32 2147483648, %v7334_v28  ;;  %vm3402_vm9 = vcmp.eq.f32.partialorder %v7334_v28, 0.0 }
 0x901   : > { %vm3407_vm8 = vcmp.eq.f32.partialorder %v7338_v46, inf  ;;  %v3410_v8 = vand.u32 2147483648, %v7338_v46  ;;  %vm3409_vm13 = vcmp.eq.f32.partialorder %v7338_v46, 0.0  ;;  %vm2866_vm2 = vcmask 0  }
 0x902   : > { %v3109_v6 = vpop.xlane.xlu1 %3108 }
 0x903   : > { %v3110_v38 = vcvt.f32.s32 %v3109_v6 }
 0x905   : > { %v4465_v63 = vpop.eup %4464  ;;  %v3113_v57 = vadd.s32 %v3112_v40, %v3110_v38 }
 0x906   : > { %v3378_v52 = vmul.f32 %v4465_v63, %v3295_v41  ;;  %v4467_v31 = vpop.eup %4466 }
 0x907   : > { %v3385_v34 = vmul.f32 %v4467_v31, %v3296_v11  ;;  %v4469_v23 = vpop.eup %4468  ;;  %vm3168_vm3 = vcmp.eq.s32.totalorder %v7894_v62, %v3113_v57 }
 0x908   : > { %v3380_v32 = vsel %vm3379_vm14, %v3295_v41, %v3378_v52  ;;  %v3392_v21 = vmul.f32 %v4469_v23, %v7329_v37  ;;  %v4471_v55 = vpop.eup %4470  ;;  %v3154_v41 = vshll.u32 %v3153_v58, 16 }
 0x909   : > { %v3383_v43 = vsel %vm3381_vm1, %v3382_v27, %v3380_v32  ;;  %v3387_v9 = vsel %vm3386_vm0, %v3296_v11, %v3385_v34  ;;  %v3399_v36 = vmul.f32 %v4471_v55, %v7334_v28  ;;  %v4473_v56 = vpop.eup %4472 }
 0x90a   : > { %v3390_v49 = vsel %vm3388_vm4, %v3389_v14, %v3387_v9  ;;  %v3394_v61 = vsel %vm3393_vm5, %v7329_v37, %v3392_v21  ;;  %v3406_v11 = vmul.f32 %v4473_v56, %v7338_v46 }
 0x90b   : > { %v3424_v44 = vsel %vm3168_vm3, %v3390_v49, 0.0  ;;  %v3397_v7 = vsel %vm3395_vm10, %v3396_v50, %v3394_v61  ;;  %v3401_v33 = vsel %vm3400_vm12, %v7334_v28, %v3399_v36 }
 0x90c   : > { %v3404_v47 = vsel %vm3402_vm9, %v3403_v4, %v3401_v33  ;;  %v3408_v3 = vsel %vm3407_vm8, %v7338_v46, %v3406_v11 }
 0x90d   : > { %v3411_v35 = vsel %vm3409_vm13, %v3410_v8, %v3408_v3 }
 0x90e   : > { %v3095_v17 = vpop.xlane.xlu0 %3094 }
 0x90f   : > { %v3096_v2 = vcvt.f32.s32 %v3095_v17 }
 0x911   : > { %v3099_v45 = vadd.s32 %v3098_v51, %v3096_v2 }
 0x912   : > { %v3123_v24 = vpop.xlane.xlu0 %3122 }
 0x913   : > { %v3124_v59 = vcvt.f32.s32 %v3123_v24  ;;  %vm3167_vm15 = vcmp.eq.s32.totalorder %v7894_v62, %v3099_v45 }
 0x914   : > { %v3423_v0 = vsel %vm3167_vm15, %v3383_v43, 0.0 }
 0x915   : > { %v3127_v16 = vadd.s32 %v3126_v15, %v3124_v59  ;;  %3450 = vadd.xlane.f32.xlu0 %v3423_v0 }
 0x916   : > { %v3137_v20 = vpop.xlane.xlu0 %3136 }
 0x917   : > { %v3138_v29 = vcvt.f32.s32 %v3137_v20  ;;  %vm3169_vm7 = vcmp.eq.s32.totalorder %v7894_v62, %v3127_v16 }
 0x918   : > { %v3425_v1 = vsel %vm3169_vm7, %v3397_v7, 0.0 }
 0x919   : > { %v3141_v60 = vadd.s32 %v3140_v10, %v3138_v29  ;;  %3452 = vadd.xlane.f32.xlu0 %v3424_v44 }
 0x91a   : > { %v3151_v12 = vpop.xlane.xlu0 %3150 }
 0x91b   : > { %v3152_v39 = vcvt.f32.s32 %v3151_v12  ;;  %vm3170_vm6 = vcmp.eq.s32.totalorder %v7894_v62, %v3141_v60 }
 0x91c   : > { %v3426_v37 = vsel %vm3170_vm6, %v3404_v47, 0.0 }
 0x91d   : > { %v3155_v5 = vadd.s32 %v3154_v41, %v3152_v39  ;;  %3454 = vadd.xlane.f32.xlu0 %v3425_v1 }
 0x91f   : > { %vm3171_vm11 = vcmp.eq.s32.totalorder %v7894_v62, %v3155_v5 }
 0x920   : > { %v3427_v48 = vsel %vm3171_vm11, %v3411_v35, 0.0 }
 0x921   : > { %3456 = vadd.xlane.f32.xlu0 %v3426_v37 }
 0x925   : > { %3458 = vadd.xlane.f32.xlu0 %v3427_v48 }
 0x93f   : > { %v2813_v30 = vpop.xlane.xlu0 %2812 }
 0x943   : > { %v2815_v63 = vpop.xlane.xlu0 %2814 }
 0x944   : > { %v2844_v31 = vadd.f32 %v2815_v63, %v2813_v30 }
 0x947   : > { %v3429_v18 = vpop.xlane.xlu0 %3428 }
 0x94c   : > { %v3431_v25 = vpop.xlane.xlu0 %3430 }
 0x94d   : > { %v3460_v60 = vadd.f32 %v3431_v25, %v3429_v18 }
 0x94e   : > { %v2819_v13 = vpop.xlane.xlu1 %2818 }
 0x950   : > { %v2817_v52 = vpop.xlane.xlu0 %2816 }
 0x951   : > { %v2845_v51 = vadd.f32 %v2844_v31, %v2817_v52 }
 0x953   : > { %v2821_v28 = vpop.xlane.xlu1 %2820  ;;  %v2846_v22 = vadd.f32 %v2845_v51, %v2819_v13 }
 0x954   : > { %v3433_v46 = vpop.xlane.xlu0 %3432 }
 0x955   : > { %v2847_v54 = vadd.f32 %v2846_v22, %v2821_v28  ;;  %v3461_v12 = vadd.f32 %v3460_v60, %v3433_v46 }
 0x957   : > { %v2823_v6 = vpop.xlane.xlu1 %2822 }
 0x958   : > { %v2848_v40 = vadd.f32 %v2847_v54, %v2823_v6 }
 0x95a   : > { %v3435_v23 = vpop.xlane.xlu0 %3434 }
 0x95b   : > { %v2825_v19 = vpop.xlane.xlu1 %2824  ;;  %v3462_v41 = vadd.f32 %v3461_v12, %v3435_v23 }
 0x95c   : > { %v2849_v32 = vadd.f32 %v2848_v40, %v2825_v19 }
 0x95f   : > { %v3437_v53 = vpop.xlane.xlu0 %3436 }
 0x960   : > { %v3463_v39 = vadd.f32 %v3462_v41, %v3437_v53 }
 0x961   : > { %v2827_v38 = vpop.xlane.xlu1 %2826 }
 0x962   : > { %v2850_v57 = vadd.f32 %v2849_v32, %v2827_v38 }
 0x964   : > { %v3439_v9 = vpop.xlane.xlu0 %3438 }
 0x965   : > { %v3464_v1 = vadd.f32 %v3463_v39, %v3439_v9 }
 0x968   : > { %v2829_v62 = vpop.xlane.xlu1 %2828  ;;  %v3441_v26 = vpop.xlane.xlu0 %3440 }
 0x969   : > { %v2851_v45 = vadd.f32 %v2850_v57, %v2829_v62  ;;  %v3465_v33 = vadd.f32 %v3464_v1, %v3441_v26 }
 0x96d   : > { %v2831_v17 = vpop.xlane.xlu1 %2830  ;;  %v3443_v29 = vpop.xlane.xlu0 %3442 }
 0x96e   : > { %v2852_v15 = vadd.f32 %v2851_v45, %v2831_v17  ;;  %v3466_v5 = vadd.f32 %v3465_v33, %v3443_v29 }
 0x971   : > { %v3445_v36 = vpop.xlane.xlu0 %3444 }
 0x972   : > { %v3467_v4 = vadd.f32 %v3466_v5, %v3445_v36 }
 0x975   : > { %v3447_v50 = vpop.xlane.xlu0 %3446 }
 0x976   : > { %v2833_v2 = vpop.xlane.xlu1 %2832  ;;  %v3468_v37 = vadd.f32 %v3467_v4, %v3447_v50 }
 0x977   : > { %v2853_v42 = vadd.f32 %v2852_v15, %v2833_v2 }
 0x97a   : > { %v2835_v34 = vpop.xlane.xlu1 %2834  ;;  %v3449_v7 = vpop.xlane.xlu0 %3448 }
 0x97b   : > { %v2854_v59 = vadd.f32 %v2853_v42, %v2835_v34  ;;  %v3469_v3 = vadd.f32 %v3468_v37, %v3449_v7 }
 0x97e   : > { %v2837_v27 = vpop.xlane.xlu1 %2836 }
 0x97f   : > { %v2855_v43 = vadd.f32 %v2854_v59, %v2837_v27 }
 0x982   : > { %v2839_v24 = vpop.xlane.xlu1 %2838 }
 0x983   : > { %v2856_v21 = vadd.f32 %v2855_v43, %v2839_v24 }
 0x987   : > { %v2841_v0 = vpop.xlane.xlu1 %2840 }
 0x988   : > { %v2857_v55 = vadd.f32 %v2856_v21, %v2841_v0 }
 0x98b   : > { %v2843_v16 = vpop.xlane.xlu1 %2842 }
 0x98c   : > { %v2858_v14 = vadd.f32 %v2857_v55, %v2843_v16 }
 0x98e   : > { %v2859_v58 = vrot.slane %v2858_v14, 4 }
 0x990   : > { %v2860_v20 = vadd.f32 %v2859_v58, %v2858_v14 }
 0x992   : > { %v2861_v10 = vrot.slane %v2860_v20, 2 }
 0x994   : > { %v2862_v49 = vadd.f32 %v2861_v10, %v2860_v20 }
 0x996   : > { %v2863_v44 = vrot.slane %v2862_v49, 1 }
 0x998   : > { %v2864_v61 = vadd.f32 %v2863_v44, %v2862_v49 }
 0x99a   : > { %v2865_v56 = vmul.f32 0.0078125, %v2864_v61 }
 0x99c   : > { %2867 = vst.msk [vmem:[%s466_s26] sm:$0x1] %vm2866_vm2, %v2865_v56 }
 0x9a2   : > { %v3451_v11 = vpop.xlane.xlu0 %3450 }
 0x9a3   : > { %v3470_v35 = vadd.f32 %v3469_v3, %v3451_v11 }
 0x9a6   : > { %v3453_v47 = vpop.xlane.xlu0 %3452 }
 0x9a7   : > { %v3471_v48 = vadd.f32 %v3470_v35, %v3453_v47 }
 0x9aa   : > { %v3455_v8 = vpop.xlane.xlu0 %3454 }
 0x9ab   : > { %v3472_v63 = vadd.f32 %v3471_v48, %v3455_v8 }
 0x9ae   : > { %v3457_v30 = vpop.xlane.xlu0 %3456 }
 0x9af   : > { %v3473_v13 = vadd.f32 %v3472_v63, %v3457_v30 }
 0x9b2   : > { %v3459_v28 = vpop.xlane.xlu0 %3458 }
 0x9b3   : > { %v3474_v18 = vadd.f32 %v3473_v13, %v3459_v28 }
 0x9b5   : > { %v3475_v6 = vrot.slane %v3474_v18, 4 }
 0x9b7   : > { %v3476_v25 = vadd.f32 %v3475_v6, %v3474_v18 }
 0x9b9   : > { %v3477_v19 = vrot.slane %v3476_v25, 2 }
 0x9bb   : > { %v3478_v52 = vadd.f32 %v3477_v19, %v3476_v25 }
 0x9bd   : > { %v3479_v31 = vrot.slane %v3478_v52, 1 }
 0x9bf   : > { %v3480_v38 = vadd.f32 %v3479_v31, %v3478_v52 }
 0x9c1   : > { %v3481_v51 = vmul.f32 0.0078125, %v3480_v38 }
 0x9c3   : > { %3482 = vst.msk [vmem:[%s469_s14] sm:$0x1] %vm2866_vm2, %v3481_v51 }
 0x9c4 PF: > { %s23_s21 = sadd.s32 1, %s4620_s21  }
 0x9c5   : > { %p20_p5 = scmp.ge.s32.totalorder %s23_s21, 4  }
 0x9c7   :  { %22 = sbr.rel (!%p20_p5) target bundleno = 1 (0x1), region = 146 }

</bundles_post_ra>
